<compile_context>
chip_gen: v7x
topology: tpu7x:2x2x1
jax: 0.10.0
libtpu: 0.0.40
codegen_flags: <defaults>
</compile_context>

<pallas_src>
import functools

import numpy as np

import jax
import jax.numpy as jnp
from jax import lax
from jax.experimental import pallas as pl
from jax.experimental.pallas import tpu as pltpu


def _ceil_div(a, b):
    return -(-a // b)


# ----------------------------------------------------------------------------
# Fused kernel: conv1 -> pool+relu -> conv2 -> pool+relu -> fc1+relu -> fc2
# ----------------------------------------------------------------------------
def _lenet_kernel(x_ref, a1_ref, b1_ref, a2_ref, b2_ref,
                  f1_ref, fb1_ref, f2_ref, fb2_ref, out_ref, *, tb: int):
    f32, bf16 = jnp.float32, jnp.bfloat16

    # ---- conv1: 5 accumulated width-band matmuls ---------------------------
    # x: (tb, 28, 32) f32, lanes = input width (28 valid).
    # a1[i]: (32, 256) bf16 band matrix.  Result lanes [0:128) hold even
    # output columns (ow = 2*pw), [128:256) hold odd columns (ow = 2*pw+1),
    # packed as pw*10 + c.
    x = x_ref[...]
    acc1 = jnp.zeros((tb * 24, 256), f32)
    for i in range(5):
        xi = x[:, i:i + 24, :].reshape(tb * 24, 32).astype(bf16)
        acc1 = acc1 + jnp.dot(xi, a1_ref[i], preferred_element_type=f32)

    # ---- max-pool 2x2 + bias + ReLU ----------------------------------------
    wp1 = jnp.maximum(acc1[:, :128], acc1[:, 128:])        # pool over width
    t1 = wp1.reshape(tb * 12, 2, 128)
    p1 = jnp.maximum(t1[:, 0, :], t1[:, 1, :])             # pool over height
    p1 = jnp.maximum(p1 + b1_ref[...], 0.0)                # bias + ReLU
    p1 = p1.reshape(tb, 12, 128)                           # (b, ph1, pw1*10+c1)

    # ---- conv2: 5 accumulated band matmuls over (pw1, c1) ------------------
    # (nn.Dropout2d is identity in eval mode.)
    acc2 = jnp.zeros((tb * 8, 256), f32)
    for i in range(5):
        li = p1[:, i:i + 8, :].reshape(tb * 8, 128).astype(bf16)
        acc2 = acc2 + jnp.dot(li, a2_ref[i], preferred_element_type=f32)

    # ---- max-pool 2x2 + bias + ReLU ----------------------------------------
    wp2 = jnp.maximum(acc2[:, :128], acc2[:, 128:])
    t2 = wp2.reshape(tb * 4, 2, 128)
    p2 = jnp.maximum(t2[:, 0, :], t2[:, 1, :])
    p2 = jnp.maximum(p2 + b2_ref[...], 0.0)
    p2 = p2.reshape(tb, 4, 128)                            # (b, ph2, pw2*20+c2)

    # ---- fc1 + ReLU: contract (pw2, c2) per spatial row h2, accumulate -----
    accf = jnp.zeros((tb, 128), f32)
    for h in range(4):
        accf = accf + jnp.dot(p2[:, h, :].astype(bf16), f1_ref[h],
                              preferred_element_type=f32)
    h1 = jnp.maximum(accf + fb1_ref[...], 0.0)             # (tb, 128), 50 valid
    # (F.dropout is identity in eval mode.)

    # ---- fc2 ----------------------------------------------------------------
    out = jnp.dot(h1.astype(bf16), f2_ref[...],
                  preferred_element_type=f32) + fb2_ref[...]
    out_ref[...] = out.astype(out_ref.dtype)               # (tb, 128) lane-dense


# ----------------------------------------------------------------------------
# One-time host-side weight repacking into band matrices (numpy)
# ----------------------------------------------------------------------------
def pack_params(params):
    w1 = np.asarray(params["conv1_w"], np.float32)   # (10, 1, 5, 5)
    b1 = np.asarray(params["conv1_b"], np.float32)   # (10,)
    w2 = np.asarray(params["conv2_w"], np.float32)   # (20, 10, 5, 5)
    b2 = np.asarray(params["conv2_b"], np.float32)   # (20,)
    f1w = np.asarray(params["fc1_w"], np.float32)    # (50, 320)  (out, in)
    f1b = np.asarray(params["fc1_b"], np.float32)    # (50,)
    f2w = np.asarray(params["fc2_w"], np.float32)    # (10, 50)
    f2b = np.asarray(params["fc2_b"], np.float32)    # (10,)

    # conv1 bands: rows = input width w (28 valid of 32),
    #   cols [0:128)  : even output column ow = 2*pw,   packed pw*10 + c
    #   cols [128:256): odd  output column ow = 2*pw+1, packed pw*10 + c
    a1 = np.zeros((5, 32, 256), np.float32)
    for i in range(5):
        for j in range(5):
            for pw in range(12):
                a1[i, 2 * pw + j, pw * 10:pw * 10 + 10] = w1[:, 0, i, j]
                a1[i, 2 * pw + 1 + j,
                   128 + pw * 10:128 + pw * 10 + 10] = w1[:, 0, i, j]
    b1t = np.zeros((1, 128), np.float32)
    for pw in range(12):
        b1t[0, pw * 10:pw * 10 + 10] = b1

    # conv2 bands: rows = pw1*10 + c1 (120 valid of 128),
    #   even/odd output columns packed pw2*20 + c2 in the two 128-lane halves.
    a2 = np.zeros((5, 128, 256), np.float32)
    for i in range(5):
        for j in range(5):
            for pw2 in range(4):
                for c1 in range(10):
                    a2[i, (2 * pw2 + j) * 10 + c1,
                       pw2 * 20:pw2 * 20 + 20] = w2[:, c1, i, j]
                    a2[i, (2 * pw2 + 1 + j) * 10 + c1,
                       128 + pw2 * 20:128 + pw2 * 20 + 20] = w2[:, c1, i, j]
    b2t = np.zeros((1, 128), np.float32)
    for pw2 in range(4):
        b2t[0, pw2 * 20:pw2 * 20 + 20] = b2

    # fc1: PyTorch flatten order k = c2*16 + h2*4 + w2; activation rows are h2,
    # lanes pw2*20 + c2  ->  one (128, 128) slab per h2.
    f1 = np.zeros((4, 128, 128), np.float32)
    for h in range(4):
        for pw in range(4):
            for c in range(20):
                f1[h, pw * 20 + c, :50] = f1w[:, c * 16 + h * 4 + pw]
    fb1 = np.zeros((1, 128), np.float32)
    fb1[0, :50] = f1b

    # fc2: (in, out) with lane padding.
    f2 = np.zeros((128, 128), np.float32)
    f2[:50, :10] = f2w.T
    fb2 = np.zeros((1, 128), np.float32)
    fb2[0, :10] = f2b

    return {
        "a1": jnp.asarray(a1, jnp.bfloat16), "b1": jnp.asarray(b1t),
        "a2": jnp.asarray(a2, jnp.bfloat16), "b2": jnp.asarray(b2t),
        "f1": jnp.asarray(f1, jnp.bfloat16), "fb1": jnp.asarray(fb1),
        "f2": jnp.asarray(f2, jnp.bfloat16), "fb2": jnp.asarray(fb2),
    }


# ----------------------------------------------------------------------------
# Forward pass (single pallas_call, batch-tiled grid)
# ----------------------------------------------------------------------------
def lenet_forward(packed, x, *, batch_tile=None):
    """x: (B, 1, 28, 28) -> logits (B, 10)."""
    B = x.shape[0]
    assert x.shape[1:] == (1, 28, 28), "reference LeNet requires 1x28x28 input"

    if batch_tile is None:
        batch_tile = min(32, 8 * _ceil_div(B, 8))   # small net: 32 fits all gens
    tb = batch_tile
    bp = tb * _ceil_div(B, tb)

    # (B,1,28,28) -> (bp, 28, 32): drop channel, zero-pad width 28->32 and
    # batch B->bp.  Only ~3.5 KB/sample of HBM input (no host-side im2col).
    xr = x.reshape(B, 28, 28).astype(jnp.float32)
    xr = jnp.pad(xr, ((0, bp - B), (0, 0), (0, 4)))

    operands = (xr, packed["a1"], packed["b1"], packed["a2"], packed["b2"],
                packed["f1"], packed["fb1"], packed["f2"], packed["fb2"])

    const = lambda nd: (lambda b: (0,) * nd)
    in_specs = [
        pl.BlockSpec((tb, 28, 32), lambda b: (b, 0, 0)),     # input batch tile
        pl.BlockSpec((5, 32, 256), const(3)),                # conv1 bands
        pl.BlockSpec((1, 128), const(2)),                    # conv1 bias
        pl.BlockSpec((5, 128, 256), const(3)),               # conv2 bands
        pl.BlockSpec((1, 128), const(2)),                    # conv2 bias
        pl.BlockSpec((4, 128, 128), const(3)),               # fc1 slabs
        pl.BlockSpec((1, 128), const(2)),                    # fc1 bias
        pl.BlockSpec((128, 128), const(2)),                  # fc2
        pl.BlockSpec((1, 128), const(2)),                    # fc2 bias
    ]

    flops_per_sample = (5 * 2 * 24 * 32 * 256 +   # conv1 band matmuls
                        5 * 2 * 8 * 128 * 256 +   # conv2 band matmuls
                        4 * 2 * 128 * 128 +       # fc1
                        2 * 128 * 128)            # fc2
    bytes_accessed = (sum(int(a.size) * a.dtype.itemsize for a in operands)
                      + bp * 128 * 4)

    out = pl.pallas_call(
        functools.partial(_lenet_kernel, tb=tb),
        out_shape=jax.ShapeDtypeStruct((bp, 128), jnp.float32),
        grid=(bp // tb,),
        in_specs=in_specs,
        out_specs=pl.BlockSpec((tb, 128), lambda b: (b, 0)),
        compiler_params=pltpu.CompilerParams(
            dimension_semantics=("parallel",),        # megacore split on v7x
            vmem_limit_bytes=32 * 1024 * 1024),       # safe on 64 MiB v7x VMEM
        cost_estimate=pl.CostEstimate(flops=bp * flops_per_sample,
                                      transcendentals=0,
                                      bytes_accessed=bytes_accessed),
    )(*operands)
    return out[:B, :10]                               # drop batch/lane padding


# ----------------------------------------------------------------------------
# Plain-JAX f32 reference (eval mode) + PyTorch-style init
# ----------------------------------------------------------------------------
def lenet_reference(params, x):
    def conv(x, w, b):
        y = lax.conv_general_dilated(x, w, (1, 1), "VALID",
                                     dimension_numbers=("NCHW", "OIHW", "NCHW"))
        return y + b[None, :, None, None]

    def maxpool2(x):
        return lax.reduce_window(x, -jnp.inf, lax.max,
                                 (1, 1, 2, 2), (1, 1, 2, 2), "VALID")

    y = jnp.maximum(maxpool2(conv(x, params["conv1_w"], params["conv1_b"])), 0.0)
    y = jnp.maximum(maxpool2(conv(y, params["conv2_w"], params["conv2_b"])), 0.0)
    y = y.reshape(y.shape[0], -1)                     # (B, 320), k = c*16+h*4+w
    y = jnp.maximum(y @ params["fc1_w"].T + params["fc1_b"], 0.0)
    return y @ params["fc2_w"].T + params["fc2_b"]


def init_params(key):
    ks = jax.random.split(key, 8)

    def u(k, shape, fan_in):
        bound = 1.0 / (fan_in ** 0.5)
        return jax.random.uniform(k, shape, jnp.float32, -bound, bound)

    return {
        "conv1_w": u(ks[0], (10, 1, 5, 5), 1 * 5 * 5),
        "conv1_b": u(ks[1], (10,), 1 * 5 * 5),
        "conv2_w": u(ks[2], (20, 10, 5, 5), 10 * 5 * 5),
        "conv2_b": u(ks[3], (20,), 10 * 5 * 5),
        "fc1_w": u(ks[4], (50, 320), 320),    # PyTorch Linear layout: (out, in)
        "fc1_b": u(ks[5], (50,), 320),
        "fc2_w": u(ks[6], (10, 50), 50),
        "fc2_b": u(ks[7], (10,), 50),
    }


if __name__ == "__main__":
    key = jax.random.PRNGKey(0)
    pkey, xkey = jax.random.split(key)
    params = init_params(pkey)
    packed = pack_params(params)                      # one-time weight repack

    # MNIST-shaped input: x.view(-1, 320) in the reference requires 28x28.
    x = jax.random.normal(xkey, (2, 1, 28, 28), dtype=jnp.float32)

    out = jax.block_until_ready(jax.jit(lenet_forward)(packed, x))
    assert out.shape == (2, 10) and out.dtype == jnp.float32

    # bf16 MXU operands (f32 accumulation) -> not bit-exact vs f32 reference.
    ref = lenet_reference(params, x)
    err = float(jnp.max(jnp.abs(out - ref)))
    scale = float(jnp.max(jnp.abs(ref)))
    assert err <= 5e-2 * (scale + 1.0), (err, scale)
    print("KERNEL_OK")
</pallas_src>

<mosaic_0001>
module attributes {stable_mosaic.version = 11 : i64} {
  func.func @_lenet_kernel(%arg0: i32, %arg1: memref<8x28x32xf32, #tpu.memory_space<vmem>>, %arg2: memref<5x32x256xbf16, #tpu.memory_space<vmem>>, %arg3: memref<1x128xf32, #tpu.memory_space<vmem>>, %arg4: memref<5x128x256xbf16, #tpu.memory_space<vmem>>, %arg5: memref<1x128xf32, #tpu.memory_space<vmem>>, %arg6: memref<4x128x128xbf16, #tpu.memory_space<vmem>>, %arg7: memref<1x128xf32, #tpu.memory_space<vmem>>, %arg8: memref<128x128xbf16, #tpu.memory_space<vmem>>, %arg9: memref<1x128xf32, #tpu.memory_space<vmem>>, %arg10: memref<8x128xf32, #tpu.memory_space<vmem>>) attributes {dimension_semantics = [#tpu.dimension_semantics<parallel>], iteration_bounds = array<i64: 1>, scalar_prefetch = 0 : i64, scratch_operands = 0 : i64, tpu.core_type = #tpu.core_type<tc>, window_params = [{transform_indices = @transform_0, window_bounds = array<i64: 8, 28, 32>}, {pipeline_mode = #tpu.pipeline_mode<synchronous>, transform_indices = @transform_1, window_bounds = array<i64: 5, 32, 256>}, {pipeline_mode = #tpu.pipeline_mode<synchronous>, transform_indices = @transform_2, window_bounds = array<i64: 1, 128>}, {pipeline_mode = #tpu.pipeline_mode<synchronous>, transform_indices = @transform_3, window_bounds = array<i64: 5, 128, 256>}, {pipeline_mode = #tpu.pipeline_mode<synchronous>, transform_indices = @transform_4, window_bounds = array<i64: 1, 128>}, {pipeline_mode = #tpu.pipeline_mode<synchronous>, transform_indices = @transform_5, window_bounds = array<i64: 4, 128, 128>}, {pipeline_mode = #tpu.pipeline_mode<synchronous>, transform_indices = @transform_6, window_bounds = array<i64: 1, 128>}, {pipeline_mode = #tpu.pipeline_mode<synchronous>, transform_indices = @transform_7, window_bounds = array<i64: 128, 128>}, {pipeline_mode = #tpu.pipeline_mode<synchronous>, transform_indices = @transform_8, window_bounds = array<i64: 1, 128>}, {transform_indices = @transform_9, window_bounds = array<i64: 8, 128>}]} {
    %c0 = arith.constant 0 : index
    %c0_0 = arith.constant 0 : index
    %c0_1 = arith.constant 0 : index
    %0 = vector.load %arg1[%c0, %c0_0, %c0_1] : memref<8x28x32xf32, #tpu.memory_space<vmem>>, vector<8x28x32xf32>
    %cst = arith.constant 0.000000e+00 : f32
    %1 = vector.broadcast %cst : f32 to vector<192x256xf32>
    %2 = vector.extract_strided_slice %0 {offsets = [0, 0, 0], sizes = [8, 24, 32], strides = [1, 1, 1]} : vector<8x28x32xf32> to vector<8x24x32xf32>
    %3 = vector.shape_cast %2 : vector<8x24x32xf32> to vector<192x32xf32>
    %4 = arith.truncf %3 : vector<192x32xf32> to vector<192x32xbf16>
    %c0_2 = arith.constant 0 : index
    %c0_3 = arith.constant 0 : index
    %c0_4 = arith.constant 0 : index
    %5 = vector.load %arg2[%c0_2, %c0_3, %c0_4] : memref<5x32x256xbf16, #tpu.memory_space<vmem>>, vector<1x32x256xbf16>
    %6 = vector.shape_cast %5 : vector<1x32x256xbf16> to vector<32x256xbf16>
    %cst_5 = arith.constant dense<0.000000e+00> : vector<192x256xf32>
    %7 = tpu.matmul %4, %6, %cst_5 {dimension_numbers = #tpu.dot_dimension_numbers<[1], [0], [0], [1], [0, 0, 1, 1], [], []>} : vector<192x32xbf16>, vector<32x256xbf16>, vector<192x256xf32> -> vector<192x256xf32>
    %8 = arith.addf %1, %7 : vector<192x256xf32>
    %9 = vector.extract_strided_slice %0 {offsets = [0, 1, 0], sizes = [8, 24, 32], strides = [1, 1, 1]} : vector<8x28x32xf32> to vector<8x24x32xf32>
    %10 = vector.shape_cast %9 : vector<8x24x32xf32> to vector<192x32xf32>
    %11 = arith.truncf %10 : vector<192x32xf32> to vector<192x32xbf16>
    %c1 = arith.constant 1 : index
    %c0_6 = arith.constant 0 : index
    %c0_7 = arith.constant 0 : index
    %12 = vector.load %arg2[%c1, %c0_6, %c0_7] : memref<5x32x256xbf16, #tpu.memory_space<vmem>>, vector<1x32x256xbf16>
    %13 = vector.shape_cast %12 : vector<1x32x256xbf16> to vector<32x256xbf16>
    %cst_8 = arith.constant dense<0.000000e+00> : vector<192x256xf32>
    %14 = tpu.matmul %11, %13, %cst_8 {dimension_numbers = #tpu.dot_dimension_numbers<[1], [0], [0], [1], [0, 0, 1, 1], [], []>} : vector<192x32xbf16>, vector<32x256xbf16>, vector<192x256xf32> -> vector<192x256xf32>
    %15 = arith.addf %8, %14 : vector<192x256xf32>
    %16 = vector.extract_strided_slice %0 {offsets = [0, 2, 0], sizes = [8, 24, 32], strides = [1, 1, 1]} : vector<8x28x32xf32> to vector<8x24x32xf32>
    %17 = vector.shape_cast %16 : vector<8x24x32xf32> to vector<192x32xf32>
    %18 = arith.truncf %17 : vector<192x32xf32> to vector<192x32xbf16>
    %c2 = arith.constant 2 : index
    %c0_9 = arith.constant 0 : index
    %c0_10 = arith.constant 0 : index
    %19 = vector.load %arg2[%c2, %c0_9, %c0_10] : memref<5x32x256xbf16, #tpu.memory_space<vmem>>, vector<1x32x256xbf16>
    %20 = vector.shape_cast %19 : vector<1x32x256xbf16> to vector<32x256xbf16>
    %cst_11 = arith.constant dense<0.000000e+00> : vector<192x256xf32>
    %21 = tpu.matmul %18, %20, %cst_11 {dimension_numbers = #tpu.dot_dimension_numbers<[1], [0], [0], [1], [0, 0, 1, 1], [], []>} : vector<192x32xbf16>, vector<32x256xbf16>, vector<192x256xf32> -> vector<192x256xf32>
    %22 = arith.addf %15, %21 : vector<192x256xf32>
    %23 = vector.extract_strided_slice %0 {offsets = [0, 3, 0], sizes = [8, 24, 32], strides = [1, 1, 1]} : vector<8x28x32xf32> to vector<8x24x32xf32>
    %24 = vector.shape_cast %23 : vector<8x24x32xf32> to vector<192x32xf32>
    %25 = arith.truncf %24 : vector<192x32xf32> to vector<192x32xbf16>
    %c3 = arith.constant 3 : index
    %c0_12 = arith.constant 0 : index
    %c0_13 = arith.constant 0 : index
    %26 = vector.load %arg2[%c3, %c0_12, %c0_13] : memref<5x32x256xbf16, #tpu.memory_space<vmem>>, vector<1x32x256xbf16>
    %27 = vector.shape_cast %26 : vector<1x32x256xbf16> to vector<32x256xbf16>
    %cst_14 = arith.constant dense<0.000000e+00> : vector<192x256xf32>
    %28 = tpu.matmul %25, %27, %cst_14 {dimension_numbers = #tpu.dot_dimension_numbers<[1], [0], [0], [1], [0, 0, 1, 1], [], []>} : vector<192x32xbf16>, vector<32x256xbf16>, vector<192x256xf32> -> vector<192x256xf32>
    %29 = arith.addf %22, %28 : vector<192x256xf32>
    %30 = vector.extract_strided_slice %0 {offsets = [0, 4, 0], sizes = [8, 24, 32], strides = [1, 1, 1]} : vector<8x28x32xf32> to vector<8x24x32xf32>
    %31 = vector.shape_cast %30 : vector<8x24x32xf32> to vector<192x32xf32>
    %32 = arith.truncf %31 : vector<192x32xf32> to vector<192x32xbf16>
    %c4 = arith.constant 4 : index
    %c0_15 = arith.constant 0 : index
    %c0_16 = arith.constant 0 : index
    %33 = vector.load %arg2[%c4, %c0_15, %c0_16] : memref<5x32x256xbf16, #tpu.memory_space<vmem>>, vector<1x32x256xbf16>
    %34 = vector.shape_cast %33 : vector<1x32x256xbf16> to vector<32x256xbf16>
    %cst_17 = arith.constant dense<0.000000e+00> : vector<192x256xf32>
    %35 = tpu.matmul %32, %34, %cst_17 {dimension_numbers = #tpu.dot_dimension_numbers<[1], [0], [0], [1], [0, 0, 1, 1], [], []>} : vector<192x32xbf16>, vector<32x256xbf16>, vector<192x256xf32> -> vector<192x256xf32>
    %36 = arith.addf %29, %35 : vector<192x256xf32>
    %37 = vector.extract_strided_slice %36 {offsets = [0, 0], sizes = [192, 128], strides = [1, 1]} : vector<192x256xf32> to vector<192x128xf32>
    %38 = vector.extract_strided_slice %36 {offsets = [0, 128], sizes = [192, 128], strides = [1, 1]} : vector<192x256xf32> to vector<192x128xf32>
    %39 = arith.maximumf %37, %38 : vector<192x128xf32>
    %40 = vector.shape_cast %39 : vector<192x128xf32> to vector<96x2x128xf32>
    %41 = vector.extract_strided_slice %40 {offsets = [0, 0, 0], sizes = [96, 1, 128], strides = [1, 1, 1]} : vector<96x2x128xf32> to vector<96x1x128xf32>
    %42 = vector.shape_cast %41 : vector<96x1x128xf32> to vector<96x128xf32>
    %43 = vector.extract_strided_slice %40 {offsets = [0, 1, 0], sizes = [96, 1, 128], strides = [1, 1, 1]} : vector<96x2x128xf32> to vector<96x1x128xf32>
    %44 = vector.shape_cast %43 : vector<96x1x128xf32> to vector<96x128xf32>
    %45 = arith.maximumf %42, %44 : vector<96x128xf32>
    %c0_18 = arith.constant 0 : index
    %c0_19 = arith.constant 0 : index
    %46 = vector.load %arg3[%c0_18, %c0_19] : memref<1x128xf32, #tpu.memory_space<vmem>>, vector<1x128xf32>
    %47 = vector.broadcast %46 : vector<1x128xf32> to vector<96x128xf32>
    %48 = arith.addf %45, %47 : vector<96x128xf32>
    %cst_20 = arith.constant 0.000000e+00 : f32
    %49 = vector.broadcast %cst_20 : f32 to vector<96x128xf32>
    %50 = arith.maximumf %48, %49 : vector<96x128xf32>
    %51 = vector.shape_cast %50 : vector<96x128xf32> to vector<8x12x128xf32>
    %cst_21 = arith.constant 0.000000e+00 : f32
    %52 = vector.broadcast %cst_21 : f32 to vector<64x256xf32>
    %53 = vector.extract_strided_slice %51 {offsets = [0, 0, 0], sizes = [8, 8, 128], strides = [1, 1, 1]} : vector<8x12x128xf32> to vector<8x8x128xf32>
    %54 = vector.shape_cast %53 : vector<8x8x128xf32> to vector<64x128xf32>
    %55 = arith.truncf %54 : vector<64x128xf32> to vector<64x128xbf16>
    %c0_22 = arith.constant 0 : index
    %c0_23 = arith.constant 0 : index
    %c0_24 = arith.constant 0 : index
    %56 = vector.load %arg4[%c0_22, %c0_23, %c0_24] : memref<5x128x256xbf16, #tpu.memory_space<vmem>>, vector<1x128x256xbf16>
    %57 = vector.shape_cast %56 : vector<1x128x256xbf16> to vector<128x256xbf16>
    %cst_25 = arith.constant dense<0.000000e+00> : vector<64x256xf32>
    %58 = tpu.matmul %55, %57, %cst_25 {dimension_numbers = #tpu.dot_dimension_numbers<[1], [0], [0], [1], [0, 0, 1, 1], [], []>} : vector<64x128xbf16>, vector<128x256xbf16>, vector<64x256xf32> -> vector<64x256xf32>
    %59 = arith.addf %52, %58 : vector<64x256xf32>
    %60 = vector.extract_strided_slice %51 {offsets = [0, 1, 0], sizes = [8, 8, 128], strides = [1, 1, 1]} : vector<8x12x128xf32> to vector<8x8x128xf32>
    %61 = vector.shape_cast %60 : vector<8x8x128xf32> to vector<64x128xf32>
    %62 = arith.truncf %61 : vector<64x128xf32> to vector<64x128xbf16>
    %c1_26 = arith.constant 1 : index
    %c0_27 = arith.constant 0 : index
    %c0_28 = arith.constant 0 : index
    %63 = vector.load %arg4[%c1_26, %c0_27, %c0_28] : memref<5x128x256xbf16, #tpu.memory_space<vmem>>, vector<1x128x256xbf16>
    %64 = vector.shape_cast %63 : vector<1x128x256xbf16> to vector<128x256xbf16>
    %cst_29 = arith.constant dense<0.000000e+00> : vector<64x256xf32>
    %65 = tpu.matmul %62, %64, %cst_29 {dimension_numbers = #tpu.dot_dimension_numbers<[1], [0], [0], [1], [0, 0, 1, 1], [], []>} : vector<64x128xbf16>, vector<128x256xbf16>, vector<64x256xf32> -> vector<64x256xf32>
    %66 = arith.addf %59, %65 : vector<64x256xf32>
    %67 = vector.extract_strided_slice %51 {offsets = [0, 2, 0], sizes = [8, 8, 128], strides = [1, 1, 1]} : vector<8x12x128xf32> to vector<8x8x128xf32>
    %68 = vector.shape_cast %67 : vector<8x8x128xf32> to vector<64x128xf32>
    %69 = arith.truncf %68 : vector<64x128xf32> to vector<64x128xbf16>
    %c2_30 = arith.constant 2 : index
    %c0_31 = arith.constant 0 : index
    %c0_32 = arith.constant 0 : index
    %70 = vector.load %arg4[%c2_30, %c0_31, %c0_32] : memref<5x128x256xbf16, #tpu.memory_space<vmem>>, vector<1x128x256xbf16>
    %71 = vector.shape_cast %70 : vector<1x128x256xbf16> to vector<128x256xbf16>
    %cst_33 = arith.constant dense<0.000000e+00> : vector<64x256xf32>
    %72 = tpu.matmul %69, %71, %cst_33 {dimension_numbers = #tpu.dot_dimension_numbers<[1], [0], [0], [1], [0, 0, 1, 1], [], []>} : vector<64x128xbf16>, vector<128x256xbf16>, vector<64x256xf32> -> vector<64x256xf32>
    %73 = arith.addf %66, %72 : vector<64x256xf32>
    %74 = vector.extract_strided_slice %51 {offsets = [0, 3, 0], sizes = [8, 8, 128], strides = [1, 1, 1]} : vector<8x12x128xf32> to vector<8x8x128xf32>
    %75 = vector.shape_cast %74 : vector<8x8x128xf32> to vector<64x128xf32>
    %76 = arith.truncf %75 : vector<64x128xf32> to vector<64x128xbf16>
    %c3_34 = arith.constant 3 : index
    %c0_35 = arith.constant 0 : index
    %c0_36 = arith.constant 0 : index
    %77 = vector.load %arg4[%c3_34, %c0_35, %c0_36] : memref<5x128x256xbf16, #tpu.memory_space<vmem>>, vector<1x128x256xbf16>
    %78 = vector.shape_cast %77 : vector<1x128x256xbf16> to vector<128x256xbf16>
    %cst_37 = arith.constant dense<0.000000e+00> : vector<64x256xf32>
    %79 = tpu.matmul %76, %78, %cst_37 {dimension_numbers = #tpu.dot_dimension_numbers<[1], [0], [0], [1], [0, 0, 1, 1], [], []>} : vector<64x128xbf16>, vector<128x256xbf16>, vector<64x256xf32> -> vector<64x256xf32>
    %80 = arith.addf %73, %79 : vector<64x256xf32>
    %81 = vector.extract_strided_slice %51 {offsets = [0, 4, 0], sizes = [8, 8, 128], strides = [1, 1, 1]} : vector<8x12x128xf32> to vector<8x8x128xf32>
    %82 = vector.shape_cast %81 : vector<8x8x128xf32> to vector<64x128xf32>
    %83 = arith.truncf %82 : vector<64x128xf32> to vector<64x128xbf16>
    %c4_38 = arith.constant 4 : index
    %c0_39 = arith.constant 0 : index
    %c0_40 = arith.constant 0 : index
    %84 = vector.load %arg4[%c4_38, %c0_39, %c0_40] : memref<5x128x256xbf16, #tpu.memory_space<vmem>>, vector<1x128x256xbf16>
    %85 = vector.shape_cast %84 : vector<1x128x256xbf16> to vector<128x256xbf16>
    %cst_41 = arith.constant dense<0.000000e+00> : vector<64x256xf32>
    %86 = tpu.matmul %83, %85, %cst_41 {dimension_numbers = #tpu.dot_dimension_numbers<[1], [0], [0], [1], [0, 0, 1, 1], [], []>} : vector<64x128xbf16>, vector<128x256xbf16>, vector<64x256xf32> -> vector<64x256xf32>
    %87 = arith.addf %80, %86 : vector<64x256xf32>
    %88 = vector.extract_strided_slice %87 {offsets = [0, 0], sizes = [64, 128], strides = [1, 1]} : vector<64x256xf32> to vector<64x128xf32>
    %89 = vector.extract_strided_slice %87 {offsets = [0, 128], sizes = [64, 128], strides = [1, 1]} : vector<64x256xf32> to vector<64x128xf32>
    %90 = arith.maximumf %88, %89 : vector<64x128xf32>
    %91 = vector.shape_cast %90 : vector<64x128xf32> to vector<32x2x128xf32>
    %92 = vector.extract_strided_slice %91 {offsets = [0, 0, 0], sizes = [32, 1, 128], strides = [1, 1, 1]} : vector<32x2x128xf32> to vector<32x1x128xf32>
    %93 = vector.shape_cast %92 : vector<32x1x128xf32> to vector<32x128xf32>
    %94 = vector.extract_strided_slice %91 {offsets = [0, 1, 0], sizes = [32, 1, 128], strides = [1, 1, 1]} : vector<32x2x128xf32> to vector<32x1x128xf32>
    %95 = vector.shape_cast %94 : vector<32x1x128xf32> to vector<32x128xf32>
    %96 = arith.maximumf %93, %95 : vector<32x128xf32>
    %c0_42 = arith.constant 0 : index
    %c0_43 = arith.constant 0 : index
    %97 = vector.load %arg5[%c0_42, %c0_43] : memref<1x128xf32, #tpu.memory_space<vmem>>, vector<1x128xf32>
    %98 = vector.broadcast %97 : vector<1x128xf32> to vector<32x128xf32>
    %99 = arith.addf %96, %98 : vector<32x128xf32>
    %cst_44 = arith.constant 0.000000e+00 : f32
    %100 = vector.broadcast %cst_44 : f32 to vector<32x128xf32>
    %101 = arith.maximumf %99, %100 : vector<32x128xf32>
    %102 = vector.shape_cast %101 : vector<32x128xf32> to vector<8x4x128xf32>
    %cst_45 = arith.constant 0.000000e+00 : f32
    %103 = vector.broadcast %cst_45 : f32 to vector<8x128xf32>
    %104 = vector.extract_strided_slice %102 {offsets = [0, 0, 0], sizes = [8, 1, 128], strides = [1, 1, 1]} : vector<8x4x128xf32> to vector<8x1x128xf32>
    %105 = vector.shape_cast %104 : vector<8x1x128xf32> to vector<8x128xf32>
    %106 = arith.truncf %105 : vector<8x128xf32> to vector<8x128xbf16>
    %c0_46 = arith.constant 0 : index
    %c0_47 = arith.constant 0 : index
    %c0_48 = arith.constant 0 : index
    %107 = vector.load %arg6[%c0_46, %c0_47, %c0_48] : memref<4x128x128xbf16, #tpu.memory_space<vmem>>, vector<1x128x128xbf16>
    %108 = vector.shape_cast %107 : vector<1x128x128xbf16> to vector<128x128xbf16>
    %cst_49 = arith.constant dense<0.000000e+00> : vector<8x128xf32>
    %109 = tpu.matmul %106, %108, %cst_49 {dimension_numbers = #tpu.dot_dimension_numbers<[1], [0], [0], [1], [0, 0, 1, 1], [], []>} : vector<8x128xbf16>, vector<128x128xbf16>, vector<8x128xf32> -> vector<8x128xf32>
    %110 = arith.addf %103, %109 : vector<8x128xf32>
    %111 = vector.extract_strided_slice %102 {offsets = [0, 1, 0], sizes = [8, 1, 128], strides = [1, 1, 1]} : vector<8x4x128xf32> to vector<8x1x128xf32>
    %112 = vector.shape_cast %111 : vector<8x1x128xf32> to vector<8x128xf32>
    %113 = arith.truncf %112 : vector<8x128xf32> to vector<8x128xbf16>
    %c1_50 = arith.constant 1 : index
    %c0_51 = arith.constant 0 : index
    %c0_52 = arith.constant 0 : index
    %114 = vector.load %arg6[%c1_50, %c0_51, %c0_52] : memref<4x128x128xbf16, #tpu.memory_space<vmem>>, vector<1x128x128xbf16>
    %115 = vector.shape_cast %114 : vector<1x128x128xbf16> to vector<128x128xbf16>
    %cst_53 = arith.constant dense<0.000000e+00> : vector<8x128xf32>
    %116 = tpu.matmul %113, %115, %cst_53 {dimension_numbers = #tpu.dot_dimension_numbers<[1], [0], [0], [1], [0, 0, 1, 1], [], []>} : vector<8x128xbf16>, vector<128x128xbf16>, vector<8x128xf32> -> vector<8x128xf32>
    %117 = arith.addf %110, %116 : vector<8x128xf32>
    %118 = vector.extract_strided_slice %102 {offsets = [0, 2, 0], sizes = [8, 1, 128], strides = [1, 1, 1]} : vector<8x4x128xf32> to vector<8x1x128xf32>
    %119 = vector.shape_cast %118 : vector<8x1x128xf32> to vector<8x128xf32>
    %120 = arith.truncf %119 : vector<8x128xf32> to vector<8x128xbf16>
    %c2_54 = arith.constant 2 : index
    %c0_55 = arith.constant 0 : index
    %c0_56 = arith.constant 0 : index
    %121 = vector.load %arg6[%c2_54, %c0_55, %c0_56] : memref<4x128x128xbf16, #tpu.memory_space<vmem>>, vector<1x128x128xbf16>
    %122 = vector.shape_cast %121 : vector<1x128x128xbf16> to vector<128x128xbf16>
    %cst_57 = arith.constant dense<0.000000e+00> : vector<8x128xf32>
    %123 = tpu.matmul %120, %122, %cst_57 {dimension_numbers = #tpu.dot_dimension_numbers<[1], [0], [0], [1], [0, 0, 1, 1], [], []>} : vector<8x128xbf16>, vector<128x128xbf16>, vector<8x128xf32> -> vector<8x128xf32>
    %124 = arith.addf %117, %123 : vector<8x128xf32>
    %125 = vector.extract_strided_slice %102 {offsets = [0, 3, 0], sizes = [8, 1, 128], strides = [1, 1, 1]} : vector<8x4x128xf32> to vector<8x1x128xf32>
    %126 = vector.shape_cast %125 : vector<8x1x128xf32> to vector<8x128xf32>
    %127 = arith.truncf %126 : vector<8x128xf32> to vector<8x128xbf16>
    %c3_58 = arith.constant 3 : index
    %c0_59 = arith.constant 0 : index
    %c0_60 = arith.constant 0 : index
    %128 = vector.load %arg6[%c3_58, %c0_59, %c0_60] : memref<4x128x128xbf16, #tpu.memory_space<vmem>>, vector<1x128x128xbf16>
    %129 = vector.shape_cast %128 : vector<1x128x128xbf16> to vector<128x128xbf16>
    %cst_61 = arith.constant dense<0.000000e+00> : vector<8x128xf32>
    %130 = tpu.matmul %127, %129, %cst_61 {dimension_numbers = #tpu.dot_dimension_numbers<[1], [0], [0], [1], [0, 0, 1, 1], [], []>} : vector<8x128xbf16>, vector<128x128xbf16>, vector<8x128xf32> -> vector<8x128xf32>
    %131 = arith.addf %124, %130 : vector<8x128xf32>
    %c0_62 = arith.constant 0 : index
    %c0_63 = arith.constant 0 : index
    %132 = vector.load %arg7[%c0_62, %c0_63] : memref<1x128xf32, #tpu.memory_space<vmem>>, vector<1x128xf32>
    %133 = vector.broadcast %132 : vector<1x128xf32> to vector<8x128xf32>
    %134 = arith.addf %131, %133 : vector<8x128xf32>
    %cst_64 = arith.constant 0.000000e+00 : f32
    %135 = vector.broadcast %cst_64 : f32 to vector<8x128xf32>
    %136 = arith.maximumf %134, %135 : vector<8x128xf32>
    %137 = arith.truncf %136 : vector<8x128xf32> to vector<8x128xbf16>
    %c0_65 = arith.constant 0 : index
    %c0_66 = arith.constant 0 : index
    %138 = vector.load %arg8[%c0_65, %c0_66] : memref<128x128xbf16, #tpu.memory_space<vmem>>, vector<128x128xbf16>
    %cst_67 = arith.constant dense<0.000000e+00> : vector<8x128xf32>
    %139 = tpu.matmul %137, %138, %cst_67 {dimension_numbers = #tpu.dot_dimension_numbers<[1], [0], [0], [1], [0, 0, 1, 1], [], []>} : vector<8x128xbf16>, vector<128x128xbf16>, vector<8x128xf32> -> vector<8x128xf32>
    %c0_68 = arith.constant 0 : index
    %c0_69 = arith.constant 0 : index
    %140 = vector.load %arg9[%c0_68, %c0_69] : memref<1x128xf32, #tpu.memory_space<vmem>>, vector<1x128xf32>
    %141 = vector.broadcast %140 : vector<1x128xf32> to vector<8x128xf32>
    %142 = arith.addf %139, %141 : vector<8x128xf32>
    %c0_70 = arith.constant 0 : index
    %c0_71 = arith.constant 0 : index
    %143 = vector.load %arg10[%c0_70, %c0_71] : memref<8x128xf32, #tpu.memory_space<vmem>>, vector<8x128xf32>
    tpu.vector_store %arg10[%c0_70, %c0_71], %142 {strides = array<i32>} : memref<8x128xf32, #tpu.memory_space<vmem>>, vector<8x128xf32>,
    return
  }
  func.func @transform_0(%arg0: i32) -> (i32, i32, i32) {
    %c0_i32 = arith.constant 0 : i32
    %c0_i32_0 = arith.constant 0 : i32
    %c0_i32_1 = arith.constant 0 : i32
    return %arg0, %c0_i32, %c0_i32_0 : i32, i32, i32
  }
  func.func @transform_1(%arg0: i32) -> (i32, i32, i32) {
    %c0_i32 = arith.constant 0 : i32
    %c0_i32_0 = arith.constant 0 : i32
    %c0_i32_1 = arith.constant 0 : i32
    %c0_i32_2 = arith.constant 0 : i32
    return %c0_i32, %c0_i32_0, %c0_i32_1 : i32, i32, i32
  }
  func.func @transform_2(%arg0: i32) -> (i32, i32) {
    %c0_i32 = arith.constant 0 : i32
    %c0_i32_0 = arith.constant 0 : i32
    %c0_i32_1 = arith.constant 0 : i32
    return %c0_i32, %c0_i32_0 : i32, i32
  }
  func.func @transform_3(%arg0: i32) -> (i32, i32, i32) {
    %c0_i32 = arith.constant 0 : i32
    %c0_i32_0 = arith.constant 0 : i32
    %c0_i32_1 = arith.constant 0 : i32
    %c0_i32_2 = arith.constant 0 : i32
    return %c0_i32, %c0_i32_0, %c0_i32_1 : i32, i32, i32
  }
  func.func @transform_4(%arg0: i32) -> (i32, i32) {
    %c0_i32 = arith.constant 0 : i32
    %c0_i32_0 = arith.constant 0 : i32
    %c0_i32_1 = arith.constant 0 : i32
    return %c0_i32, %c0_i32_0 : i32, i32
  }
  func.func @transform_5(%arg0: i32) -> (i32, i32, i32) {
    %c0_i32 = arith.constant 0 : i32
    %c0_i32_0 = arith.constant 0 : i32
    %c0_i32_1 = arith.constant 0 : i32
    %c0_i32_2 = arith.constant 0 : i32
    return %c0_i32, %c0_i32_0, %c0_i32_1 : i32, i32, i32
  }
  func.func @transform_6(%arg0: i32) -> (i32, i32) {
    %c0_i32 = arith.constant 0 : i32
    %c0_i32_0 = arith.constant 0 : i32
    %c0_i32_1 = arith.constant 0 : i32
    return %c0_i32, %c0_i32_0 : i32, i32
  }
  func.func @transform_7(%arg0: i32) -> (i32, i32) {
    %c0_i32 = arith.constant 0 : i32
    %c0_i32_0 = arith.constant 0 : i32
    %c0_i32_1 = arith.constant 0 : i32
    return %c0_i32, %c0_i32_0 : i32, i32
  }
  func.func @transform_8(%arg0: i32) -> (i32, i32) {
    %c0_i32 = arith.constant 0 : i32
    %c0_i32_0 = arith.constant 0 : i32
    %c0_i32_1 = arith.constant 0 : i32
    return %c0_i32, %c0_i32_0 : i32, i32
  }
  func.func @transform_9(%arg0: i32) -> (i32, i32) {
    %c0_i32 = arith.constant 0 : i32
    %c0_i32_0 = arith.constant 0 : i32
    return %arg0, %c0_i32 : i32, i32
  }
}

</mosaic_0001>

<bundles_post_ra>
// kernel: lenet_forward.1
= control target key start
LH: loop header
LB: loop body
LE: loop exit
PB: predicated region body
PF: predicated region fallthrough
CT: control target
= control target key end

     0   :  { %14 = vsyncpa [#allocation3], 0  ;;  %s6809_s30 = smov [#allocation2]   ;;  %s9370_s0 = inlined_call_operand.vmem [shape: f32[8,28,32], index: 0, kind: input, shape index: {}]   ;;  %s9371_s1 = inlined_call_operand.vmem [shape: bf16[5,32,256], index: 1, kind: input, shape index: {}]   ;;  %s9372_s2 = inlined_call_operand.vmem [shape: f32[1,128], index: 2, kind: input, shape index: {}]   ;;  %s9373_s3 = inlined_call_operand.hbm [shape: bf16[5,128,256], index: 3, kind: input, shape index: {}]   ;;  %s9374_s4 = inlined_call_operand.vmem [shape: f32[1,128], index: 4, kind: input, shape index: {}]   ;;  %s9375_s5 = inlined_call_operand.vmem [shape: bf16[4,128,128], index: 5, kind: input, shape index: {}]   ;;  %s9376_s6 = inlined_call_operand.vmem [shape: f32[1,128], index: 6, kind: input, shape index: {}]   ;;  %s9377_s7 = inlined_call_operand.vmem [shape: bf16[128,128], index: 7, kind: input, shape index: {}]   ;;  %s9378_s8 = inlined_call_operand.vmem [shape: f32[1,128], index: 8, kind: input, shape index: {}]   ;;  %s9379_s9 = inlined_call_operand.vmem [shape: f32[8,128], index: 9, kind: output, shape index: {}]  }
   0x1   :  { %s26_s10 = sshll.u32 %s6809_s30, 4  ;;  %s6785_s13 = scalar_lea.hbm %s9373_s3, 10240  ;;  %s27_s10 = int_to_ptr.vmem [resolvable:$true] %s26_s10 }
   0x2   :  { %p6786_p0 = scmp.ne.s32.totalorder %s9373_s3, %s6785_s13  ;;  %p6789_p1 = scmp.lt.u32.totalorder %s6785_s13, %s9373_s3 }
   0x4   :  { %p6791_p2 = pnand %p6789_p1, %p6786_p0 }
   0x6   :  { %6794 = shalt.err (!%p6791_p2)
}
   0x7   :  { %s6795_s18 = scalar_lea.vmem %s27_s10, 10240  ;;  %p6800_p4 = scmp.lt.s32.totalorder %s27_s10, %s27_s10 }
   0x8   :  { %p6796_p3 = scmp.ne.s32.totalorder %s27_s10, %s6795_s18  ;;  %p6801_p5 = scmp.lt.s32.totalorder %s6795_s18, %s6795_s18 }
   0xa   :  { %p6802_p6 = por %p6801_p5, %p6800_p4 }
   0xc   :  { %p6803_p7 = pnand %p6802_p6, %p6796_p3 }
   0xe   :  { %6806 = shalt.err (!%p6803_p7)
}
   0xf   :  { %s6810_s19 = smov 128   ;;  %s6811_s20 = smov 8  }
  0x10   :  { %32 = dma.hbm_to_vmem [thread:$0]  %s9373_s3, 10240, %s27_s10, [#allocation3], %s6810_s19, %s6810_s19, %s6811_s20  }
  0x11   :  { %6807 = dma.done.wait [#allocation3], 10240  }
  0x12   :  { %6808 = vsyncadd [#allocation3], 4294957056  ;;  %v9380_v0 = vmov 0   ;;  %v6587_v1 = vld [vmem:[%s9371_s1 + $0x4] ss:$8 sps:$4 sm:$0xff]   ;;  %vm245_vm0 = vcmask 261120  }
  0x13   :  { %523 = vmatprep.mubr.bf16.mxu0 %v9380_v0  ;;  %314 = vmatprep.mubr.bf16.mxu1 %v9380_v0  ;;  %v6589_v2 = vld [vmem:[%s9371_s1] ss:$8 sps:$4 sm:$0xff]   ;;  %v6590_v3 = vld [vmem:[%s9371_s1 + $0x14] ss:$8 sps:$4 sm:$0xff]   ;;  %v6592_v4 = vld [vmem:[%s9371_s1 + $0x10] ss:$8 sps:$4 sm:$0xff]  }
  0x14   :  { %491 = vmatprep.subr.bf16.mxu0 %v6587_v1  ;;  %v6895_v5 = vld [vmem:[%s9370_s0] sm:$0xff]  ;;  %v6900_v6 = vld [vmem:[%s9370_s0 + $0x8] sm:$0xff]  ;;  %v6598_v10 = vld [vmem:[%s9371_s1 + $0x54] ss:$8 sps:$4 sm:$0xff]   ;;  %vm644_vm1 = vcmask 1045504   ;;  %vm127_vm2 = vcmask 1046528  }
  0x15   :  { %492 = vmatpush1.bf16.msra.mxu0 %v6589_v2  ;;  %v6595_v7 = vld [vmem:[%s9371_s1 + $0x44] ss:$8 sps:$4 sm:$0xff]   ;;  %v79_v8 = vpack.c.bf16 %v6900_v6, %v6895_v5  ;;  %v6593_v9 = vld [vmem:[%s9371_s1 + $0x40] ss:$8 sps:$4 sm:$0xff]   ;;  %v6918_v11 = vld [vmem:[%s9370_s0 + $0x10] sm:$0xff]  ;;  %v645_v46 = vrot.slane %v6895_v5, 2 }
  0x16   :  { %493 = vmatprep.subr.bf16.mxu0 %v6590_v3  ;;  %v6923_v12 = vld [vmem:[%s9370_s0 + $0x20] sm:$0xff]  ;;  %v6596_v13 = vld [vmem:[%s9371_s1 + $0x50] ss:$8 sps:$4 sm:$0xff]   ;;  %v6936_v16 = vld [vmem:[%s9370_s0 + $0x28] sm:$0xff]  ;;  %v646_v47 = vrot.slane %v6900_v6, 2  ;;  %v648_v48 = vrot.slane %v6918_v11, 2 }
  0x17   :  { %v80_v14 = vpack.c.bf16 %v6923_v12, %v6918_v11  ;;  %v6601_v15 = vld [vmem:[%s9371_s1 + $0x64] ss:$8 sps:$4 sm:$0xff]   ;;  %v6941_v17 = vld [vmem:[%s9370_s0 + $0x30] sm:$0xff]  ;;  %v7083_v51 = vld [vmem:[%s9370_s0 + $0x18] sm:$0xf]  ;;  %v652_v55 = vrot.slane %v6923_v12, 2 }
  0x18   :  { %v81_v18 = vpack.c.bf16 %v6941_v17, %v6936_v16  ;;  %v6951_v19 = vld [vmem:[%s9370_s0 + $0x40] sm:$0xff]  ;;  %v6957_v20 = vld [vmem:[%s9370_s0 + $0x48] sm:$0xff]  ;;  %v6964_v22 = vld [vmem:[%s9370_s0 + $0x50] sm:$0xff]  ;;  %v647_v49 = vsel %vm644_vm1, %v645_v46, %v646_v47  ;;  %v649_v50 = vsel %vm644_vm1, %v646_v47, %v648_v48  ;;  %v650_v54 = vrot.slane %v7083_v51, 2 }
  0x19   :  { %494 = vmatpush1.bf16.msra.mxu0 %v6592_v4  ;;  %v82_v21 = vpack.c.bf16 %v6957_v20, %v6951_v19  ;;  %v6971_v23 = vld [vmem:[%s9370_s0 + $0x60] sm:$0xff]  ;;  %v6978_v25 = vld [vmem:[%s9370_s0 + $0x68] sm:$0xff]  ;;  %v6983_v26 = vld [vmem:[%s9370_s0 + $0x70] sm:$0xff]  ;;  %v725_v52 = vpack.c.bf16 %v649_v50, %v647_v49  ;;  %v653_v56 = vrot.slane %v6936_v16, 2  ;;  %v655_v1 = vrot.slane %v6941_v17, 2 }
  0x1a   :  { %798 = vmatprep.subr.bf16.mxu0 %v6595_v7  ;;  %v83_v24 = vpack.c.bf16 %v6971_v23, %v6964_v22  ;;  %v84_v27 = vpack.c.bf16 %v6983_v26, %v6978_v25  ;;  %v6994_v28 = vld [vmem:[%s9370_s0 + $0x80] sm:$0xff]  ;;  %v6999_v29 = vld [vmem:[%s9370_s0 + $0x88] sm:$0xff]  ;;  %v7008_v31 = vld [vmem:[%s9370_s0 + $0x90] sm:$0xff]  ;;  %v651_v58 = vsel %vm644_vm1, %v648_v48, %v650_v54  ;;  %vm999_vm3 = vcmask 1044480  }
  0x1b   :  { %v85_v30 = vpack.c.bf16 %v6999_v29, %v6994_v28  ;;  %v7013_v32 = vld [vmem:[%s9370_s0 + $0xa0] sm:$0xff]  ;;  %v7020_v34 = vld [vmem:[%s9370_s0 + $0xa8] sm:$0xff]  ;;  %v7027_v35 = vld [vmem:[%s9370_s0 + $0xb0] sm:$0xff]  ;;  %v654_v59 = vsel %vm644_vm1, %v652_v55, %v653_v56  ;;  %v656_v3 = vsel %vm644_vm1, %v653_v56, %v655_v1  ;;  %v673_v49 = vrot.slane %v6994_v28, 2 }
  0x1c   :  { %5807 = vmatmul.mubr.msk.bf16.vlgmr.msra.gmra.mrb[0].mxu0 %vm245_vm0, %v79_v8  ;;  %v86_v33 = vpack.c.bf16 %v7013_v32, %v7008_v31  ;;  %v87_v36 = vpack.c.bf16 %v7027_v35, %v7020_v34  ;;  %v7036_v37 = vld [vmem:[%s9370_s0 + $0xc0] sm:$0xff]  ;;  %v7041_v38 = vld [vmem:[%s9370_s0 + $0xc8] sm:$0xff]  ;;  %v7050_v40 = vld [vmem:[%s9370_s0 + $0xd0] sm:$0xff]  ;;  %v726_v63 = vpack.c.bf16 %v654_v59, %v651_v58  ;;  %v659_v8 = vrot.slane %v6951_v19, 2 }
  0x1d   :  { %799 = vmatpush1.bf16.msra.mxu0 %v6593_v9  ;;  %533 = vmatprep.mubr.bf16.mxu0 %v9380_v0  ;;  %v88_v39 = vpack.c.bf16 %v7041_v38, %v7036_v37  ;;  %v7055_v41 = vld [vmem:[%s9370_s0 + $0xe0] sm:$0xff]  ;;  %v7064_v43 = vld [vmem:[%s9370_s0 + $0xe8] sm:$0xff]  ;;  %v7069_v44 = vld [vmem:[%s9370_s0 + $0xf0] sm:$0xff]  ;;  %v660_v9 = vrot.slane %v6957_v20, 2  ;;  %v674_v50 = vrot.slane %v6999_v29, 2  ;;  %v680_v58 = vrot.slane %v7013_v32, 2 }
  0x1e   :  { %800 = vmatprep.subr.bf16.mxu0 %v6598_v10  ;;  %v89_v42 = vpack.c.bf16 %v7055_v41, %v7050_v40  ;;  %v90_v45 = vpack.c.bf16 %v7069_v44, %v7064_v43  ;;  %v6599_v53 = vld [vmem:[%s9371_s1 + $0x60] ss:$8 sps:$4 sm:$0xff]   ;;  %v6604_v57 = vld [vmem:[%s9371_s1 + $0x74] ss:$8 sps:$4 sm:$0xff]   ;;  %v6602_v60 = vld [vmem:[%s9371_s1 + $0x70] ss:$8 sps:$4 sm:$0xff]  }
  0x1f   :  { %v7104_v61 = vld [vmem:[%s9370_s0 + $0x38] sm:$0xf]  ;;  %v6607_v62 = vld [vmem:[%s9371_s1 + $0x84] ss:$8 sps:$4 sm:$0xff]   ;;  %v662_v10 = vrot.slane %v6964_v22, 2  ;;  %v681_v59 = vrot.slane %v7020_v34, 2 }
  0x20   :  { %v657_v2 = vrot.slane %v7104_v61, 2  ;;  %v7155_v55 = vld [vmem:[%s9370_s0 + $0x98] sm:$0xf]  ;;  %vm1354_vm4 = vcmask 1043456   ;;  %vm3106_vm5 = vcmask 1041409   ;;  %vm3109_vm6 = vcmask 1042434  }
  0x21   :  { %801 = vmatpush1.bf16.msra.mxu0 %v6596_v13  ;;  %v661_v13 = vsel %vm644_vm1, %v659_v8, %v660_v9  ;;  %v6614_v8 = vld [vmem:[%s9371_s1 + $0x34] ss:$8 sps:$4 sm:$0xff]   ;;  %vm3112_vm7 = vcmask 1043459   ;;  %vm3115_vm8 = vcmask 1044484   ;;  %vm3118_vm9 = vcmask 1045509  }
  0x22   :  { %1153 = vmatprep.subr.bf16.mxu0 %v6601_v15  ;;  %v658_v4 = vsel %vm644_vm1, %v655_v1, %v657_v2  ;;  %v7125_v15 = vld [vmem:[%s9370_s0 + $0x58] sm:$0xf]  ;;  %v682_v1 = vsel %vm644_vm1, %v680_v58, %v681_v59  ;;  %vm3121_vm10 = vcmask 1046534   ;;  %vm3124_vm11 = vcmask 1047559  }
  0x23   :  { %v727_v7 = vpack.c.bf16 %v658_v4, %v656_v3  ;;  %v7173_v2 = vld [vmem:[%s9370_s0 + $0xb8] sm:$0xf]  ;;  %v683_v4 = vrot.slane %v7027_v35, 2  ;;  %vm6815_vm12 = vmmov 0  }
  0x24   :  { %5808 = vmatmul.mubr.msk.bf16.gmra.mrb[4].mxu0 %vm245_vm0, %v80_v14  ;;  %v663_v14 = vsel %vm644_vm1, %v660_v9, %v662_v10  ;;  %v6616_v9 = vld [vmem:[%s9371_s1 + $0x30] ss:$8 sps:$4 sm:$0xff]  }
  0x25   :  { %543 = vmatprep.mubr.bf16.mxu0 %v9380_v0 }
  0x2c   :  { %5809 = vmatmul.mubr.msk.bf16.gmra.mrb[8].mxu0 %vm245_vm0, %v81_v18  ;;  %v728_v18 = vpack.c.bf16 %v663_v14, %v661_v13  ;;  %v129_v13 = vrot.slane %v6900_v6, 1  ;;  %v131_v14 = vrot.slane %v6918_v11, 1 }
  0x2d   :  { %553 = vmatprep.mubr.bf16.mxu0 %v9380_v0 }
  0x34   :  { %5810 = vmatmul.mubr.msk.bf16.gmra.mrb[12].mxu0 %vm245_vm0, %v82_v21  ;;  %v664_v21 = vrot.slane %v7125_v15, 2 }
  0x35   :  { %563 = vmatprep.mubr.bf16.mxu0 %v9380_v0 }
  0x3c   :  { %5811 = vmatmul.mubr.msk.bf16.gmra.mrb[16].mxu0 %vm245_vm0, %v83_v24  ;;  %v666_v24 = vrot.slane %v6971_v23, 2 }
  0x3d   :  { %573 = vmatprep.mubr.bf16.mxu0 %v9380_v0 }
  0x44   :  { %5812 = vmatmul.mubr.msk.bf16.gmra.mrb[20].mxu0 %vm245_vm0, %v84_v27  ;;  %v667_v27 = vrot.slane %v6978_v25, 2 }
  0x45   :  { %583 = vmatprep.mubr.bf16.mxu0 %v9380_v0 }
  0x4c   :  { %5813 = vmatmul.mubr.msk.bf16.gmra.mrb[24].mxu0 %vm245_vm0, %v85_v30  ;;  %v665_v30 = vsel %vm644_vm1, %v662_v10, %v664_v21  ;;  %v128_v10 = vrot.slane %v6895_v5, 1 }
  0x4d   :  { %593 = vmatprep.mubr.bf16.mxu0 %v9380_v0 }
  0x54   :  { %5814 = vmatmul.mubr.msk.bf16.gmra.mrb[28].mxu0 %vm245_vm0, %v86_v33  ;;  %v668_v33 = vsel %vm644_vm1, %v666_v24, %v667_v27  ;;  %v130_v24 = vsel %vm127_vm2, %v128_v10, %v129_v13 }
  0x55   :  { %603 = vmatprep.mubr.bf16.mxu0 %v9380_v0 }
  0x5c   :  { %5815 = vmatmul.mubr.msk.bf16.gmra.mrb[32].mxu0 %vm245_vm0, %v87_v36  ;;  %v7137_v36 = vld [vmem:[%s9370_s0 + $0x78] sm:$0xf] }
  0x5d   :  { %613 = vmatprep.mubr.bf16.mxu0 %v9380_v0 }
  0x64   :  { %5816 = vmatmul.mubr.msk.bf16.gmra.mrb[36].mxu0 %vm245_vm0, %v88_v39  ;;  %v729_v39 = vpack.c.bf16 %v668_v33, %v665_v30 }
  0x65   :  { %623 = vmatprep.mubr.bf16.mxu0 %v9380_v0 }
  0x6c   :  { %5817 = vmatmul.mubr.msk.bf16.gmra.mrb[40].mxu0 %vm245_vm0, %v89_v42  ;;  %v669_v42 = vrot.slane %v6983_v26, 2 }
  0x6d   :  { %633 = vmatprep.mubr.bf16.mxu0 %v9380_v0 }
  0x6e   :  { %v670_v46 = vsel %vm644_vm1, %v667_v27, %v669_v42  ;;  %v132_v27 = vsel %vm127_vm2, %v129_v13, %v131_v14  ;;  %v697_v13 = vrot.slane %v7069_v44, 2 }
  0x6f   :  { %v208_v30 = vpack.c.bf16 %v132_v27, %v130_v24  ;;  %v145_v24 = vrot.slane %v6964_v22, 1 }
  0x74   :  { %5818 = vmatmul.mubr.msk.bf16.gmra.mrb[44].mxu0 %vm245_vm0, %v90_v45  ;;  %v671_v45 = vrot.slane %v7137_v36, 2 }
  0x75   :  { %830 = vmatprep.mubr.bf16.mxu0 %v9380_v0 }
  0x76   :  { %v672_v47 = vsel %vm644_vm1, %v669_v42, %v671_v45  ;;  %v688_v42 = vrot.slane %v7041_v38, 2  ;;  %v690_v45 = vrot.slane %v7050_v40, 2 }
  0x77   :  { %v730_v48 = vpack.c.bf16 %v672_v47, %v670_v46  ;;  %v133_v46 = vrot.slane %v7083_v51, 1  ;;  %v135_v47 = vrot.slane %v6923_v12, 1 }
  0x7c   :  { %5827 = vmatmul.mubr.msk.bf16.vlgmr.msra.gmra.mrb[0].mxu0 %vm245_vm0, %v725_v52  ;;  %v676_v52 = vrot.slane %v7008_v31, 2 }
  0x7d   :  { %1154 = vmatpush1.bf16.msra.mxu0 %v6599_v53  ;;  %840 = vmatprep.mubr.bf16.mxu0 %v9380_v0  ;;  %v675_v53 = vsel %vm644_vm1, %v673_v49, %v674_v50 }
  0x7e   :  { %1155 = vmatprep.subr.bf16.mxu0 %v6604_v57  ;;  %v677_v54 = vsel %vm644_vm1, %v674_v50, %v676_v52  ;;  %v678_v57 = vrot.slane %v7155_v55, 2  ;;  %v691_v50 = vsel %vm644_vm1, %v688_v42, %v690_v45 }
  0x7f   :  { %v731_v56 = vpack.c.bf16 %v677_v54, %v675_v53  ;;  %v134_v53 = vsel %vm127_vm2, %v131_v14, %v133_v46  ;;  %v1000_v46 = vrot.slane %v6895_v5, 3 }
  0x81   :  { %1156 = vmatpush1.bf16.msra.mxu0 %v6602_v60  ;;  %v6611_v60 = vld [vmem:[%s9371_s1 + $0x24] ss:$8 sps:$4 sm:$0xff]  }
  0x82   :  { %1508 = vmatprep.subr.bf16.mxu0 %v6607_v62  ;;  %v6613_v62 = vld [vmem:[%s9371_s1 + $0x20] ss:$8 sps:$4 sm:$0xff]   ;;  %282 = vmatprep.subr.bf16.mxu1 %v6611_v60  ;;  %v695_v60 = vrot.slane %v7064_v43, 2 }
  0x83   :  { %283 = vmatpush1.bf16.msra.mxu1 %v6613_v62  ;;  %v138_v62 = vrot.slane %v6941_v17, 1 }
  0x84   :  { %5828 = vmatmul.mubr.msk.bf16.gmra.mrb[4].mxu0 %vm245_vm0, %v726_v63  ;;  %v679_v63 = vsel %vm644_vm1, %v676_v52, %v678_v57  ;;  %284 = vmatprep.subr.bf16.mxu1 %v6614_v8  ;;  %v7207_v52 = vld [vmem:[%s9370_s0 + $0xd8] sm:$0xf]  ;;  %v698_v27 = vsel %vm644_vm1, %v695_v60, %v697_v13 }
  0x85   :  { %850 = vmatprep.mubr.bf16.mxu0 %v9380_v0  ;;  %v732_v3 = vpack.c.bf16 %v682_v1, %v679_v63  ;;  %v692_v58 = vrot.slane %v7207_v52, 2  ;;  %v140_v63 = vrot.slane %v7104_v61, 1 }
  0x87   :  { %285 = vmatpush1.bf16.msra.mxu1 %v6616_v9  ;;  %v693_v1 = vsel %vm644_vm1, %v690_v45, %v692_v58  ;;  %v141_v8 = vsel %vm127_vm2, %v138_v62, %v140_v63  ;;  %v6605_v58 = vld [vmem:[%s9371_s1 + $0x80] ss:$8 sps:$4 sm:$0xff]   ;;  %v6610_v63 = vld [vmem:[%s9371_s1 + $0x94] ss:$8 sps:$4 sm:$0xff]  }
  0x8a   :  { %5791 = vmatmul.mubr.msk.bf16.vlgmr.msra.gmra.mrb[0].mxu1 %vm245_vm0, %v208_v30 }
  0x8b   :  { %324 = vmatprep.mubr.bf16.mxu1 %v9380_v0 }
  0x8c   :  { %5829 = vmatmul.mubr.msk.bf16.gmra.mrb[8].mxu0 %vm245_vm0, %v727_v7  ;;  %v685_v7 = vrot.slane %v7173_v2, 2 }
  0x8d   :  { %860 = vmatprep.mubr.bf16.mxu0 %v9380_v0 }
  0x8e   :  { %v686_v21 = vsel %vm644_vm1, %v683_v4, %v685_v7 }
  0x94   :  { %5830 = vmatmul.mubr.msk.bf16.gmra.mrb[12].mxu0 %vm245_vm0, %v728_v18  ;;  %v684_v18 = vsel %vm644_vm1, %v681_v59, %v683_v4  ;;  %v694_v59 = vrot.slane %v7055_v41, 2  ;;  %v7225_v4 = vld [vmem:[%s9370_s0 + $0xf8] sm:$0xf] }
  0x95   :  { %870 = vmatprep.mubr.bf16.mxu0 %v9380_v0  ;;  %v733_v33 = vpack.c.bf16 %v686_v21, %v684_v18  ;;  %v699_v14 = vrot.slane %v7225_v4, 2  ;;  %v142_v18 = vrot.slane %v6951_v19, 1  ;;  %v143_v21 = vrot.slane %v6957_v20, 1 }
  0x97   :  { %v700_v30 = vsel %vm644_vm1, %v697_v13, %v699_v14  ;;  %v1010_v14 = vrot.slane %v6941_v17, 3 }
  0x98   :  { %v736_v45 = vpack.c.bf16 %v700_v30, %v698_v27  ;;  %v159_v27 = vrot.slane %v7008_v31, 1 }
  0x9c   :  { %5831 = vmatmul.mubr.msk.bf16.gmra.mrb[16].mxu0 %vm245_vm0, %v729_v39  ;;  %v687_v39 = vrot.slane %v7036_v37, 2 }
  0x9d   :  { %880 = vmatprep.mubr.bf16.mxu0 %v9380_v0 }
  0x9e   :  { %v689_v49 = vsel %vm644_vm1, %v687_v39, %v688_v42  ;;  %v146_v39 = vsel %vm127_vm2, %v143_v21, %v145_v24 }
  0x9f   :  { %v734_v57 = vpack.c.bf16 %v691_v50, %v689_v49  ;;  %v147_v49 = vrot.slane %v7125_v15, 1  ;;  %v149_v50 = vrot.slane %v6971_v23, 1 }
  0xa4   :  { %5832 = vmatmul.mubr.msk.bf16.gmra.mrb[20].mxu0 %vm245_vm0, %v730_v48  ;;  %v136_v48 = vrot.slane %v6936_v16, 1 }
  0xa5   :  { %890 = vmatprep.mubr.bf16.mxu0 %v9380_v0 }
  0xa6   :  { %v137_v54 = vsel %vm127_vm2, %v135_v47, %v136_v48  ;;  %v139_v7 = vsel %vm127_vm2, %v136_v48, %v138_v62  ;;  %v1001_v47 = vrot.slane %v6900_v6, 3  ;;  %v1003_v48 = vrot.slane %v6918_v11, 3 }
  0xa7   :  { %v210_v9 = vpack.c.bf16 %v141_v8, %v139_v7  ;;  %v148_v11 = vsel %vm127_vm2, %v145_v24, %v147_v49  ;;  %v1008_v62 = vrot.slane %v6936_v16, 3  ;;  %v6608_v7 = vld [vmem:[%s9371_s1 + $0x90] ss:$8 sps:$4 sm:$0xff]   ;;  %v157_v24 = vrot.slane %v6999_v29, 1 }
  0xa8   :  { %v1002_v5 = vsel %vm999_vm3, %v1000_v46, %v1001_v47  ;;  %v1004_v6 = vsel %vm999_vm3, %v1001_v47, %v1003_v48  ;;  %v1014_v46 = vrot.slane %v6951_v19, 3  ;;  %v1015_v47 = vrot.slane %v6957_v20, 3 }
  0xa9   :  { %v1011_v30 = vsel %vm999_vm3, %v1008_v62, %v1010_v14  ;;  %v161_v49 = vrot.slane %v7155_v55, 1 }
  0xaa   :  { %v1016_v19 = vsel %vm999_vm3, %v1014_v46, %v1015_v47  ;;  %v178_v46 = vrot.slane %v7064_v43, 1 }
  0xac   :  { %5833 = vmatmul.mubr.msk.bf16.gmra.mrb[24].mxu0 %vm245_vm0, %v731_v56  ;;  %v209_v56 = vpack.c.bf16 %v137_v54, %v134_v53  ;;  %v150_v53 = vrot.slane %v6978_v25, 1 }
  0xad   :  { %900 = vmatprep.mubr.bf16.mxu0 %v9380_v0 }
  0xae   :  { %5792 = vmatmul.mubr.msk.bf16.gmra.mrb[4].mxu1 %vm245_vm0, %v209_v56  ;;  %v151_v54 = vsel %vm127_vm2, %v149_v50, %v150_v53  ;;  %v163_v50 = vrot.slane %v7013_v32, 1 }
  0xaf   :  { %334 = vmatprep.mubr.bf16.mxu1 %v9380_v0  ;;  %v212_v56 = vpack.c.bf16 %v151_v54, %v148_v11 }
  0xb4   :  { %5834 = vmatmul.mubr.msk.bf16.gmra.mrb[28].mxu0 %vm245_vm0, %v732_v3  ;;  %v696_v3 = vsel %vm644_vm1, %v694_v59, %v695_v60  ;;  %v1005_v59 = vrot.slane %v7083_v51, 3  ;;  %v1007_v60 = vrot.slane %v6923_v12, 3 }
  0xb5   :  { %910 = vmatprep.mubr.bf16.mxu0 %v9380_v0  ;;  %v735_v10 = vpack.c.bf16 %v696_v3, %v693_v1  ;;  %v152_v1 = vrot.slane %v6983_v26, 1  ;;  %v154_v3 = vrot.slane %v7137_v36, 1 }
  0xb6   :  { %5793 = vmatmul.mubr.msk.bf16.gmra.mrb[8].mxu1 %vm245_vm0, %v210_v9  ;;  %v1006_v12 = vsel %vm999_vm3, %v1003_v48, %v1005_v59  ;;  %v1009_v16 = vsel %vm999_vm3, %v1007_v60, %v1008_v62  ;;  %v1017_v48 = vrot.slane %v6964_v22, 3  ;;  %v166_v59 = vrot.slane %v7027_v35, 1 }
  0xb7   :  { %344 = vmatprep.mubr.bf16.mxu1 %v9380_v0  ;;  %v153_v8 = vsel %vm127_vm2, %v150_v53, %v152_v1  ;;  %v155_v9 = vsel %vm127_vm2, %v152_v1, %v154_v3  ;;  %v1081_v13 = vpack.c.bf16 %v1009_v16, %v1006_v12  ;;  %v164_v53 = vrot.slane %v7020_v34, 1 }
  0xb8   :  { %v1018_v20 = vsel %vm999_vm3, %v1015_v47, %v1017_v48  ;;  %v168_v60 = vrot.slane %v7173_v2, 1 }
  0xb9   :  { %v1083_v54 = vpack.c.bf16 %v1018_v20, %v1016_v19  ;;  %v167_v1 = vsel %vm127_vm2, %v164_v53, %v166_v59  ;;  %v1033_v20 = vrot.slane %v7155_v55, 3 }
  0xba   :  { %v169_v3 = vsel %vm127_vm2, %v166_v59, %v168_v60 }
  0xbb   :  { %v216_v12 = vpack.c.bf16 %v169_v3, %v167_v1  ;;  %v1040_v1 = vrot.slane %v7173_v2, 3  ;;  %v6617_v3 = vld [vmem:[#allocation2 + $0x80] ss:$8 sps:$4 sm:$0xff]  }
  0xbc   :  { %5835 = vmatmul.mubr.msk.bf16.gmra.mrb[32].mxu0 %vm245_vm0, %v733_v33  ;;  %v144_v33 = vsel %vm127_vm2, %v142_v18, %v143_v21  ;;  %v1012_v18 = vrot.slane %v7104_v61, 3  ;;  %v156_v21 = vrot.slane %v6994_v28, 1 }
  0xbd   :  { %920 = vmatprep.mubr.bf16.mxu0 %v9380_v0  ;;  %v211_v42 = vpack.c.bf16 %v146_v39, %v144_v33  ;;  %v160_v39 = vsel %vm127_vm2, %v157_v24, %v159_v27 }
  0xbe   :  { %v1013_v17 = vsel %vm999_vm3, %v1010_v14, %v1012_v18  ;;  %v158_v33 = vsel %vm127_vm2, %v156_v21, %v157_v24 }
  0xbf   :  { %5794 = vmatmul.mubr.msk.bf16.gmra.mrb[12].mxu1 %vm245_vm0, %v211_v42  ;;  %v214_v42 = vpack.c.bf16 %v160_v39, %v158_v33  ;;  %v1029_v33 = vrot.slane %v6999_v29, 3  ;;  %v1031_v39 = vrot.slane %v7008_v31, 3 }
  0xc0   :  { %354 = vmatprep.mubr.bf16.mxu1 %v9380_v0 }
  0xc4   :  { %5836 = vmatmul.mubr.msk.bf16.gmra.mrb[36].mxu0 %vm245_vm0, %v734_v57  ;;  %v1080_v57 = vpack.c.bf16 %v1004_v6, %v1002_v5  ;;  %v162_v5 = vsel %vm127_vm2, %v159_v27, %v161_v49  ;;  %v165_v6 = vsel %vm127_vm2, %v163_v50, %v164_v53 }
  0xc5   :  { %930 = vmatprep.mubr.bf16.mxu0 %v9380_v0  ;;  %v215_v11 = vpack.c.bf16 %v165_v6, %v162_v5  ;;  %v1035_v5 = vrot.slane %v7013_v32, 3  ;;  %v1036_v6 = vrot.slane %v7020_v34, 3 }
  0xc7   :  { %5795 = vmatmul.mubr.msk.bf16.gmra.mrb[16].mxu1 %vm245_vm0, %v212_v56  ;;  %v1019_v56 = vrot.slane %v7125_v15, 3 }
  0xc8   :  { %364 = vmatprep.mubr.bf16.mxu1 %v9380_v0 }
  0xc9   :  { %v1020_v62 = vsel %vm999_vm3, %v1017_v48, %v1019_v56  ;;  %v1032_v48 = vsel %vm999_vm3, %v1029_v33, %v1031_v39  ;;  %v1034_v56 = vsel %vm999_vm3, %v1031_v39, %v1033_v20  ;;  %v6779_v20 = vld [vmem:[%s9370_s0 + $0x10] sm:$0xff] }
  0xcc   :  { %5837 = vmatmul.mubr.msk.bf16.gmra.mrb[40].mxu0 %vm245_vm0, %v735_v10  ;;  %v213_v10 = vpack.c.bf16 %v155_v9, %v153_v8  ;;  %v1026_v8 = vrot.slane %v7137_v36, 3  ;;  %v170_v9 = vrot.slane %v7036_v37, 1 }
  0xcd   :  { %940 = vmatprep.mubr.bf16.mxu0 %v9380_v0 }
  0xcf   :  { %5796 = vmatmul.mubr.msk.bf16.gmra.mrb[20].mxu1 %vm245_vm0, %v213_v10  ;;  %v171_v10 = vrot.slane %v7041_v38, 1 }
  0xd0   :  { %374 = vmatprep.mubr.bf16.mxu1 %v9380_v0 }
  0xd1   :  { %v172_v21 = vsel %vm127_vm2, %v170_v9, %v171_v10  ;;  %v1042_v9 = vrot.slane %v7036_v37, 3 }
  0xd4   :  { %5838 = vmatmul.mubr.msk.bf16.gmra.mrb[44].mxu0 %vm245_vm0, %v736_v45  ;;  %v1082_v45 = vpack.c.bf16 %v1013_v17, %v1011_v30  ;;  %v1028_v17 = vrot.slane %v6994_v28, 3 }
  0xd5   :  { %1185 = vmatprep.mubr.bf16.mxu0 %v9380_v0 }
  0xd6   :  { %v1030_v47 = vsel %vm999_vm3, %v1028_v17, %v1029_v33 }
  0xd7   :  { %5797 = vmatmul.mubr.msk.bf16.gmra.mrb[24].mxu1 %vm245_vm0, %v214_v42  ;;  %v175_v42 = vrot.slane %v7207_v52, 1  ;;  %v1086_v19 = vpack.c.bf16 %v1032_v48, %v1030_v47 }
  0xd8   :  { %384 = vmatprep.mubr.bf16.mxu1 %v9380_v0 }
  0xdc   :  { %5847 = vmatmul.mubr.msk.bf16.vlgmr.msra.gmra.mrb[0].mxu0 %vm245_vm0, %v1080_v57  ;;  %v1021_v57 = vrot.slane %v6971_v23, 3 }
  0xdd   :  { %1509 = vmatpush1.bf16.msra.mxu0 %v6605_v58  ;;  %1195 = vmatprep.mubr.bf16.mxu0 %v9380_v0  ;;  %v1022_v58 = vrot.slane %v6978_v25, 3 }
  0xde   :  { %1510 = vmatprep.subr.bf16.mxu0 %v6610_v63 }
  0xdf   :  { %5798 = vmatmul.mubr.msk.bf16.gmra.mrb[28].mxu1 %vm245_vm0, %v215_v11  ;;  %v1023_v63 = vsel %vm999_vm3, %v1021_v57, %v1022_v58  ;;  %v180_v11 = vrot.slane %v7069_v44, 1  ;;  %v1037_v57 = vsel %vm999_vm3, %v1035_v5, %v1036_v6  ;;  %v1358_v5 = vrot.slane %v6779_v20, 4 }
  0xe0   :  { %394 = vmatprep.mubr.bf16.mxu1 %v9380_v0  ;;  %v1084_v16 = vpack.c.bf16 %v1023_v63, %v1020_v62  ;;  %v1087_v62 = vpack.c.bf16 %v1037_v57, %v1034_v56  ;;  %v1038_v63 = vrot.slane %v7027_v35, 3  ;;  %v1360_v56 = vrot.slane %v7083_v51, 4  ;;  %v6780_v57 = vld [vmem:[%s9370_s0 + $0x20] sm:$0xff]  ;;  %v6782_v51 = vld [vmem:[%s9370_s0 + $0x30] sm:$0xff] }
  0xe1   :  { %1511 = vmatpush1.bf16.msra.mxu0 %v6608_v7  ;;  %v1024_v7 = vrot.slane %v6983_v26, 3  ;;  %v1393_v20 = vrot.slane %v7027_v35, 4 }
  0xe3   :  { %v1025_v14 = vsel %vm999_vm3, %v1022_v58, %v1024_v7  ;;  %v1027_v18 = vsel %vm999_vm3, %v1024_v7, %v1026_v8  ;;  %v181_v58 = vsel %vm127_vm2, %v178_v46, %v180_v11  ;;  %v1041_v7 = vsel %vm999_vm3, %v1038_v63, %v1040_v1 }
  0xe4   :  { %5848 = vmatmul.mubr.msk.bf16.gmra.mrb[4].mxu0 %vm245_vm0, %v1081_v13  ;;  %v173_v13 = vrot.slane %v7050_v40, 1  ;;  %v1085_v30 = vpack.c.bf16 %v1027_v18, %v1025_v14 }
  0xe5   :  { %1205 = vmatprep.mubr.bf16.mxu0 %v9380_v0 }
  0xe6   :  { %v174_v24 = vsel %vm127_vm2, %v171_v10, %v173_v13  ;;  %v176_v49 = vsel %vm127_vm2, %v173_v13, %v175_v42  ;;  %v1043_v10 = vrot.slane %v7041_v38, 3  ;;  %v1045_v13 = vrot.slane %v7050_v40, 3 }
  0xe7   :  { %5799 = vmatmul.mubr.msk.bf16.gmra.mrb[32].mxu1 %vm245_vm0, %v216_v12  ;;  %v217_v27 = vpack.c.bf16 %v174_v24, %v172_v21  ;;  %v6619_v12 = vld [vmem:[#allocation2 + $0x84] ss:$8 sps:$4 sm:$0xff]   ;;  %v1047_v24 = vrot.slane %v7207_v52, 3  ;;  %v1052_v42 = vrot.slane %v7069_v44, 3 }
  0xe8   :  { %404 = vmatprep.mubr.bf16.mxu1 %v9380_v0  ;;  %3312 = vmatprep.subr.bf16.mxu1 %v6619_v12  ;;  %v1044_v14 = vsel %vm999_vm3, %v1042_v9, %v1043_v10  ;;  %v1046_v18 = vsel %vm999_vm3, %v1043_v10, %v1045_v13  ;;  %v1367_v12 = vrot.slane %v7104_v61, 4  ;;  %v6783_v9 = vld [vmem:[%s9370_s0 + $0x40] sm:$0xff]  ;;  %v1372_v61 = vrot.slane %v6964_v22, 4 }
  0xe9   :  { %3313 = vmatpush1.bf16.msra.mxu1 %v6617_v3  ;;  %v1089_v21 = vpack.c.bf16 %v1046_v18, %v1044_v14  ;;  %v1048_v17 = vsel %vm999_vm3, %v1045_v13, %v1047_v24  ;;  %v1365_v3 = vrot.slane %v6782_v51, 4  ;;  %v1369_v10 = vrot.slane %v6783_v9, 4  ;;  %v6784_v13 = vld [vmem:[%s9370_s0 + $0x48] sm:$0xff] }
  0xea   :  { %v1370_v14 = vrot.slane %v6784_v13, 4 }
  0xec   :  { %5849 = vmatmul.mubr.msk.bf16.gmra.mrb[8].mxu0 %vm245_vm0, %v1082_v45  ;;  %v177_v45 = vrot.slane %v7055_v41, 1  ;;  %v1371_v18 = vsel %vm1354_vm4, %v1369_v10, %v1370_v14  ;;  %v6620_v10 = vld [vmem:[#allocation2 + $0x90] ss:$8 sps:$4 sm:$0xff]  }
  0xed   :  { %1215 = vmatprep.mubr.bf16.mxu0 %v9380_v0 }
  0xee   :  { %v179_v50 = vsel %vm127_vm2, %v177_v45, %v178_v46  ;;  %v1054_v45 = vrot.slane %v7225_v4, 3 }
  0xef   :  { %5800 = vmatmul.mubr.msk.bf16.gmra.mrb[36].mxu1 %vm245_vm0, %v217_v27  ;;  %v218_v53 = vpack.c.bf16 %v179_v50, %v176_v49  ;;  %v1049_v27 = vrot.slane %v7055_v41, 3  ;;  %v6777_v49 = vld [vmem:[%s9370_s0] sm:$0xff] }
  0xf0   :  { %414 = vmatprep.mubr.bf16.mxu1 %v9380_v0  ;;  %v1055_v47 = vsel %vm999_vm3, %v1052_v42, %v1054_v45  ;;  %v1355_v50 = vrot.slane %v6777_v49, 4  ;;  %v1381_v45 = vrot.slane %v7137_v36, 4 }
  0xf4   :  { %5850 = vmatmul.mubr.msk.bf16.gmra.mrb[12].mxu0 %vm245_vm0, %v1083_v54  ;;  %v182_v54 = vrot.slane %v7225_v4, 1 }
  0xf5   :  { %1225 = vmatprep.mubr.bf16.mxu0 %v9380_v0 }
  0xf6   :  { %v183_v59 = vsel %vm127_vm2, %v180_v11, %v182_v54 }
  0xf7   :  { %5801 = vmatmul.mubr.msk.bf16.gmra.mrb[40].mxu1 %vm245_vm0, %v218_v53  ;;  %v219_v60 = vpack.c.bf16 %v183_v59, %v181_v58  ;;  %v6778_v53 = vld [vmem:[%s9370_s0 + $0x8] sm:$0xff]  ;;  %v1362_v58 = vrot.slane %v6780_v57, 4  ;;  %v1402_v57 = vrot.slane %v7207_v52, 4 }
  0xf8   :  { %424 = vmatprep.mubr.bf16.mxu1 %v9380_v0  ;;  %v6781_v59 = vld [vmem:[%s9370_s0 + $0x28] sm:$0xff] }
  0xfc   :  { %5851 = vmatmul.mubr.msk.bf16.gmra.mrb[16].mxu0 %vm245_vm0, %v1084_v16  ;;  %v1039_v16 = vsel %vm999_vm3, %v1036_v6, %v1038_v63 }
  0xfd   :  { %1235 = vmatprep.mubr.bf16.mxu0 %v9380_v0  ;;  %v1088_v8 = vpack.c.bf16 %v1041_v7, %v1039_v16  ;;  %v1368_v7 = vsel %vm1354_vm4, %v1365_v3, %v1367_v12 }
  0xff   :  { %5802 = vmatmul.mubr.msk.bf16.gmra.mrb[44].mxu1 %vm245_vm0, %v219_v60  ;;  %v1363_v60 = vrot.slane %v6781_v59, 4  ;;  %v1405_v59 = vrot.slane %v7064_v43, 4 }
 0x100   :  { %3344 = vmatprep.mubr.bf16.mxu1 %v9380_v0 }
 0x101   :  { %v1364_v63 = vsel %vm1354_vm4, %v1362_v58, %v1363_v60  ;;  %v1366_v16 = vsel %vm1354_vm4, %v1363_v60, %v1365_v3  ;;  %v1404_v58 = vrot.slane %v7055_v41, 4  ;;  %v1407_v60 = vrot.slane %v7069_v44, 4 }
 0x103   :  { %v1408_v41 = vsel %vm1354_vm4, %v1405_v59, %v1407_v60 }
 0x104   :  { %5852 = vmatmul.mubr.msk.bf16.gmra.mrb[20].mxu0 %vm245_vm0, %v1085_v30  ;;  %v1050_v30 = vrot.slane %v7064_v43, 3 }
 0x105   :  { %1245 = vmatprep.mubr.bf16.mxu0 %v9380_v0 }
 0x106   :  { %v1051_v33 = vsel %vm999_vm3, %v1049_v27, %v1050_v30  ;;  %v1053_v46 = vsel %vm999_vm3, %v1050_v30, %v1052_v42  ;;  %v1374_v27 = vrot.slane %v7125_v15, 4  ;;  %v1376_v30 = vrot.slane %v6971_v23, 4 }
 0x107   :  { %v1090_v39 = vpack.c.bf16 %v1051_v33, %v1048_v17  ;;  %v1091_v48 = vpack.c.bf16 %v1055_v47, %v1053_v46  ;;  %v1377_v17 = vrot.slane %v6978_v25, 4  ;;  %v1379_v42 = vrot.slane %v6983_v26, 4 }
 0x108   :  { %v1375_v22 = vsel %vm1354_vm4, %v1372_v61, %v1374_v27  ;;  %v1383_v46 = vrot.slane %v6994_v28, 4  ;;  %v1384_v47 = vrot.slane %v6999_v29, 4 }
 0x109   :  { %v1378_v33 = vsel %vm1354_vm4, %v1376_v30, %v1377_v17  ;;  %v1380_v23 = vsel %vm1354_vm4, %v1377_v17, %v1379_v42  ;;  %v1382_v25 = vsel %vm1354_vm4, %v1379_v42, %v1381_v45  ;;  %v6628_v17 = vld [vmem:[#allocation2 + $0xb4] ss:$8 sps:$4 sm:$0xff]   ;;  %v6629_v42 = vld [vmem:[#allocation2 + $0xc0] ss:$8 sps:$4 sm:$0xff]  }
 0x10a   :  { %v1440_v15 = vpack.c.bf16 %v1382_v25, %v1380_v23  ;;  %v1385_v26 = vsel %vm1354_vm4, %v1383_v46, %v1384_v47  ;;  %v6632_v46 = vld [vmem:[#allocation2 + $0xd0] ss:$8 sps:$4 sm:$0xff]  }
 0x10c   :  { %5853 = vmatmul.mubr.msk.bf16.gmra.mrb[24].mxu0 %vm245_vm0, %v1086_v19  ;;  %v1356_v19 = vrot.slane %v6778_v53, 4  ;;  %v1390_v53 = vrot.slane %v7013_v32, 4 }
 0x10d   :  { %1255 = vmatprep.mubr.bf16.mxu0 %v9380_v0 }
 0x10e   :  { %v1357_v6 = vsel %vm1354_vm4, %v1355_v50, %v1356_v19  ;;  %v1359_v11 = vsel %vm1354_vm4, %v1356_v19, %v1358_v5  ;;  %v1388_v50 = vrot.slane %v7155_v55, 4  ;;  %v1391_v19 = vrot.slane %v7020_v34, 4 }
 0x10f   :  { %v1435_v54 = vpack.c.bf16 %v1359_v11, %v1357_v6  ;;  %v1397_v6 = vrot.slane %v7036_v37, 4  ;;  %v1398_v11 = vrot.slane %v7041_v38, 4  ;;  %v1406_v38 = vsel %vm1354_vm4, %v1404_v58, %v1405_v59 }
 0x110   :  { %v1392_v29 = vsel %vm1354_vm4, %v1390_v53, %v1391_v19  ;;  %v1394_v32 = vsel %vm1354_vm4, %v1391_v19, %v1393_v20  ;;  %v6640_v53 = vld [vmem:[#allocation2 + $0xf4] ss:$8 sps:$4 sm:$0xff]   ;;  %v6638_v19 = vld [vmem:[#allocation2 + $0xf0] ss:$8 sps:$4 sm:$0xff]  }
 0x111   :  { %v1399_v35 = vsel %vm1354_vm4, %v1397_v6, %v1398_v11 }
 0x114   :  { %5854 = vmatmul.mubr.msk.bf16.gmra.mrb[28].mxu0 %vm245_vm0, %v1087_v62  ;;  %v1361_v62 = vsel %vm1354_vm4, %v1358_v5, %v1360_v56  ;;  %v1395_v5 = vrot.slane %v7173_v2, 4 }
 0x115   :  { %1265 = vmatprep.mubr.bf16.mxu0 %v9380_v0  ;;  %v1436_v1 = vpack.c.bf16 %v1364_v63, %v1361_v62  ;;  %v1409_v62 = vrot.slane %v7225_v4, 4 }
 0x116   :  { %v1396_v34 = vsel %vm1354_vm4, %v1393_v20, %v1395_v5  ;;  %v1761_v20 = vlaneseq }
 0x117   :  { %v1443_v55 = vpack.c.bf16 %v1396_v34, %v1394_v32  ;;  %v1410_v43 = vsel %vm1354_vm4, %v1407_v60, %v1409_v62 }
 0x118   :  { %v1446_v3 = vpack.c.bf16 %v1410_v43, %v1408_v41  ;;  %v1762_v32 = vshrl.u32 %v1761_v20, 7 }
 0x11c   :  { %5855 = vmatmul.mubr.msk.bf16.gmra.mrb[32].mxu0 %vm245_vm0, %v1088_v8  ;;  %v1437_v8 = vpack.c.bf16 %v1368_v7, %v1366_v16 }
 0x11d   :  { %1275 = vmatprep.mubr.bf16.mxu0 %v9380_v0 }
 0x124   :  { %5856 = vmatmul.mubr.msk.bf16.gmra.mrb[36].mxu0 %vm245_vm0, %v1089_v21  ;;  %v1373_v21 = vsel %vm1354_vm4, %v1370_v14, %v1372_v61  ;;  %v6625_v61 = vld [vmem:[#allocation2 + $0xa4] ss:$8 sps:$4 sm:$0xff]  }
 0x125   :  { %1285 = vmatprep.mubr.bf16.mxu0 %v9380_v0  ;;  %v1438_v24 = vpack.c.bf16 %v1373_v21, %v1371_v18  ;;  %v6623_v21 = vld [vmem:[#allocation2 + $0xa0] ss:$8 sps:$4 sm:$0xff]  }
 0x12c   :  { %5857 = vmatmul.mubr.msk.bf16.gmra.mrb[40].mxu0 %vm245_vm0, %v1090_v39  ;;  %v1439_v39 = vpack.c.bf16 %v1378_v33, %v1375_v22  ;;  %v6626_v22 = vld [vmem:[#allocation2 + $0xb0] ss:$8 sps:$4 sm:$0xff]   ;;  %v6631_v33 = vld [vmem:[#allocation2 + $0xc4] ss:$8 sps:$4 sm:$0xff]  }
 0x12d   :  { %1295 = vmatprep.mubr.bf16.mxu0 %v9380_v0 }
 0x134   :  { %5858 = vmatmul.mubr.msk.bf16.gmra.mrb[44].mxu0 %vm245_vm0, %v1091_v48  ;;  %v1386_v48 = vrot.slane %v7008_v31, 4 }
 0x135   :  { %1540 = vmatprep.mubr.bf16.mxu0 %v9380_v0 }
 0x136   :  { %v1387_v36 = vsel %vm1354_vm4, %v1384_v47, %v1386_v48  ;;  %v1389_v28 = vsel %vm1354_vm4, %v1386_v48, %v1388_v50  ;;  %v6637_v47 = vld [vmem:[#allocation2 + $0xe4] ss:$8 sps:$4 sm:$0xff]  }
 0x137   :  { %v1441_v49 = vpack.c.bf16 %v1387_v36, %v1385_v26  ;;  %v1442_v31 = vpack.c.bf16 %v1392_v29, %v1389_v28  ;;  %v6635_v26 = vld [vmem:[#allocation2 + $0xe0] ss:$8 sps:$4 sm:$0xff]   ;;  %v6813_v29 = vmov 1983009808  }
 0x13c   :  { %5867 = vmatmul.mubr.msk.bf16.vlgmr.msra.gmra.mrb[0].mxu0 %vm245_vm0, %v1435_v54  ;;  %v1400_v54 = vrot.slane %v7050_v40, 4 }
 0x13d   :  { %1550 = vmatprep.mubr.bf16.mxu0 %v9380_v0 }
 0x13e   :  { %v1401_v2 = vsel %vm1354_vm4, %v1398_v11, %v1400_v54  ;;  %v1403_v37 = vsel %vm1354_vm4, %v1400_v54, %v1402_v57 }
 0x13f   :  { %v1444_v56 = vpack.c.bf16 %v1401_v2, %v1399_v35  ;;  %v1445_v40 = vpack.c.bf16 %v1406_v38, %v1403_v37 }
 0x144   :  { %5868 = vmatmul.mubr.msk.bf16.gmra.mrb[4].mxu0 %vm245_vm0, %v1436_v1 }
 0x145   :  { %1560 = vmatprep.mubr.bf16.mxu0 %v9380_v0 }
 0x14c   :  { %5869 = vmatmul.mubr.msk.bf16.gmra.mrb[8].mxu0 %vm245_vm0, %v1437_v8  ;;  %v6622_v8 = vld [vmem:[#allocation2 + $0x94] ss:$8 sps:$4 sm:$0xff]  }
 0x14d   :  { %1570 = vmatprep.mubr.bf16.mxu0 %v9380_v0  ;;  %3314 = vmatprep.subr.bf16.mxu1 %v6622_v8 }
 0x14e   :  { %3315 = vmatpush1.bf16.msra.mxu1 %v6620_v10 }
 0x14f   :  { %3316 = vmatprep.subr.bf16.mxu1 %v6625_v61 }
 0x152   :  { %3317 = vmatpush1.bf16.msra.mxu1 %v6623_v21 }
 0x153   :  { %3318 = vmatprep.subr.bf16.mxu1 %v6628_v17 }
 0x154   :  { %5870 = vmatmul.mubr.msk.bf16.gmra.mrb[12].mxu0 %vm245_vm0, %v1438_v24 }
 0x155   :  { %1580 = vmatprep.mubr.bf16.mxu0 %v9380_v0 }
 0x156   :  { %3319 = vmatpush1.bf16.msra.mxu1 %v6626_v22 }
 0x157   :  { %3320 = vmatprep.subr.bf16.mxu1 %v6631_v33 }
 0x15a   :  { %3321 = vmatpush1.bf16.msra.mxu1 %v6629_v42 }
 0x15c   :  { %5871 = vmatmul.mubr.msk.bf16.gmra.mrb[16].mxu0 %vm245_vm0, %v1439_v39 }
 0x15d   :  { %1590 = vmatprep.mubr.bf16.mxu0 %v9380_v0  ;;  %v7479_v52 = vpop.f32.mrb[0].mxu1 }
 0x15e   :  { %v7484_v63 = vpop.f32.mrb[1].mxu1 }
 0x15f   :  { %v7486_v1 = vpop.f32.mrb[2].mxu1 }
 0x160   :  { %v7488_v51 = vpop.f32.mrb[3].mxu1 }
 0x164   :  { %5872 = vmatmul.mubr.msk.bf16.gmra.mrb[20].mxu0 %vm245_vm0, %v1440_v15  ;;  %v6634_v15 = vld [vmem:[#allocation2 + $0xd4] ss:$8 sps:$4 sm:$0xff]  }
 0x165   :  { %1600 = vmatprep.mubr.bf16.mxu0 %v9380_v0  ;;  %3322 = vmatprep.subr.bf16.mxu1 %v6634_v15 }
 0x166   :  { %3323 = vmatpush1.bf16.msra.mxu1 %v6632_v46 }
 0x167   :  { %3324 = vmatprep.subr.bf16.mxu1 %v6637_v47 }
 0x16a   :  { %3325 = vmatpush1.bf16.msra.mxu1 %v6635_v26 }
 0x16b   :  { %3326 = vmatprep.subr.bf16.mxu1 %v6640_v53 }
 0x16c   :  { %5873 = vmatmul.mubr.msk.bf16.gmra.mrb[24].mxu0 %vm245_vm0, %v1441_v49 }
 0x16d   :  { %1610 = vmatprep.mubr.bf16.mxu0 %v9380_v0 }
 0x16e   :  { %3327 = vmatpush1.bf16.msra.mxu1 %v6638_v19 }
 0x174   :  { %5874 = vmatmul.mubr.msk.bf16.gmra.mrb[28].mxu0 %vm245_vm0, %v1442_v31  ;;  %v1759_v31 = vunpack.c.l.s4 %v6813_v29 }
 0x175   :  { %1620 = vmatprep.mubr.bf16.mxu0 %v9380_v0 }
 0x176   :  { %v1760_v5 = vunpack.c.0.s8 %v1759_v31 }
 0x178   :  { %v7542_v54 = vsub.s32 %v1760_v5, %v1762_v32 }
 0x17a   :  { %9484 = vst [vmem:[#allocation9_spill] sm:$0xff] %v7542_v54 }
 0x17c   :  { %5875 = vmatmul.mubr.msk.bf16.gmra.mrb[32].mxu0 %vm245_vm0, %v1443_v55  ;;  %v5975_v55 = vld [vmem:[%s9372_s2] ss:$0 sm:$0xff] }
 0x17d   :  { %1630 = vmatprep.mubr.bf16.mxu0 %v9380_v0  ;;  %v2651_v35 = vcombine.high %v5975_v55, %v5975_v55  ;;  %v7545_v2 = vrot.slane %v5975_v55, %v7542_v54 }
 0x17f   :  { %v7549_v59 = vrot.slane %v2651_v35, %v7542_v54 }
 0x181   :  { %v7491_v44 = vpop.f32.mrb[4].mxu1  ;;  %v7572_v42 = vrot.slane %v7549_v59, 1 }
 0x182   :  { %v7493_v4 = vpop.f32.mrb[5].mxu1 }
 0x183   :  { %v7495_v12 = vpop.f32.mrb[6].mxu1 }
 0x184   :  { %5876 = vmatmul.mubr.msk.bf16.gmra.mrb[36].mxu0 %vm245_vm0, %v1444_v56  ;;  %v7497_v16 = vpop.f32.mrb[7].mxu1 }
 0x185   :  { %1640 = vmatprep.mubr.bf16.mxu0 %v9380_v0 }
 0x189   :  { %v7499_v7 = vpop.f32.mrb[8].mxu1 }
 0x18a   :  { %v7501_v9 = vpop.f32.mrb[9].mxu1 }
 0x18b   :  { %v7503_v13 = vpop.f32.mrb[10].mxu1 }
 0x18c   :  { %5877 = vmatmul.mubr.msk.bf16.gmra.mrb[40].mxu0 %vm245_vm0, %v1445_v40  ;;  %v7505_v14 = vpop.f32.mrb[11].mxu1  ;;  %v7554_v40 = vcombine.high %v7545_v2, %v7545_v2 }
 0x18d   :  { %1650 = vmatprep.mubr.bf16.mxu0 %v9380_v0 }
 0x18e   :  { %9485 = vst [vmem:[#allocation10_spill] sm:$0xff] %v7554_v40  ;;  %v7567_v61 = vrot.slane %v7554_v40, 1 }
 0x190   :  { %9487 = vst [vmem:[#allocation12_spill] sm:$0xff] %v7567_v61 }
 0x192   :  { %v7507_v18 = vpop.f32.mrb[12].mxu1 }
 0x193   :  { %v7509_v24 = vpop.f32.mrb[13].mxu1 }
 0x194   :  { %5878 = vmatmul.mubr.msk.bf16.gmra.mrb[44].mxu0 %vm245_vm0, %v1446_v3  ;;  %v7511_v27 = vpop.f32.mrb[14].mxu1 }
 0x195   :  { %v7513_v30 = vpop.f32.mrb[15].mxu1 }
 0x19a   :  { %v7515_v39 = vpop.f32.mrb[16].mxu1 }
 0x19b   :  { %v7517_v45 = vpop.f32.mrb[17].mxu1 }
 0x19c   :  { %v7519_v23 = vpop.f32.mrb[18].mxu1 }
 0x19d   :  { %v7521_v25 = vpop.f32.mrb[19].mxu1 }
 0x1a2   :  { %v7523_v48 = vpop.f32.mrb[20].mxu1 }
 0x1a3   :  { %v7525_v36 = vpop.f32.mrb[21].mxu1 }
 0x1a4   :  { %v7527_v49 = vpop.f32.mrb[22].mxu1 }
 0x1a5   :  { %v7529_v50 = vpop.f32.mrb[23].mxu1 }
 0x1aa   :  { %v7531_v28 = vpop.f32.mrb[24].mxu1 }
 0x1ab   :  { %9480 = vst [vmem:[#allocation5_spill] sm:$0xff] %v7531_v28  ;;  %v7533_v34 = vpop.f32.mrb[25].mxu1 }
 0x1ac   :  { %9481 = vst [vmem:[#allocation6_spill] sm:$0xff] %v7533_v34  ;;  %v7538_v6 = vpop.f32.mrb[26].mxu1 }
 0x1ad   :  { %9482 = vst [vmem:[#allocation7_spill] sm:$0xff] %v7538_v6  ;;  %v7540_v11 = vpop.f32.mrb[27].mxu1 }
 0x1ae   :  { %9483 = vst [vmem:[#allocation8_spill] sm:$0xff] %v7540_v11 }
 0x1b2   :  { %v7580_v20 = vpop.f32.mrb[28].mxu1 }
 0x1b3   :  { %9489 = vst [vmem:[#allocation14_spill] sm:$0xff] %v7580_v20 }
 0x20f   :  { %v1542_v56 = vpop.f32.mrb[0].mxu0 }
 0x210   :  { %v6324_v57 = vadd.f32 %v1542_v56, %v7479_v52  ;;  %v1544_v58 = vpop.f32.mrb[1].mxu0  ;;  %v7560_v52 = vcombine.high %v7549_v59, %v7549_v59 }
 0x211   :  { %v6325_v37 = vadd.f32 %v1544_v58, %v7484_v63  ;;  %v1546_v38 = vpop.f32.mrb[2].mxu0  ;;  %v7564_v63 = vrot.slane %v7545_v2, 1 }
 0x212   :  { %v6326_v60 = vadd.f32 %v1546_v38, %v7486_v1  ;;  %v1548_v62 = vpop.f32.mrb[3].mxu0  ;;  %9486 = vst [vmem:[#allocation11_spill] sm:$0xff] %v7560_v52  ;;  %v7575_v15 = vrot.slane %v7560_v52, 1 }
 0x213   :  { %v1709_v41 = vmax.f32 %v6324_v57, %v6325_v37  ;;  %v6327_v43 = vadd.f32 %v1548_v62, %v7488_v51  ;;  %v7586_v57 = vpop.f32.mrb[29].mxu1 }
 0x214   :  { %9488 = vst [vmem:[#allocation13_spill] sm:$0xff] %v7575_v15  ;;  %9490 = vst [vmem:[#allocation15_spill] sm:$0xff] %v7586_v57 }
 0x215   :  { %v1757_v3 = vcombine.high %v1709_v41, %v1709_v41  ;;  %v1764_v8 = vrot.slane %v1709_v41, %v7542_v54  ;;  %v1710_v10 = vmax.f32 %v6326_v60, %v6327_v43  ;;  %v7589_v60 = vpop.f32.mrb[30].mxu1 }
 0x216   :  { %9491 = vst [vmem:[#allocation16_spill] sm:$0xff] %v7589_v60 }
 0x217   :  { %v1771_v1 = vrot.slane %v1757_v3, %v7542_v54  ;;  %v1772_v21 = vcombine.high %v1764_v8, %v1764_v8  ;;  %v5879_v17 = vrot.slane %v1764_v8, 9  ;;  %v1774_v22 = vcombine.high %v1710_v10, %v1710_v10  ;;  %v1552_v51 = vpop.f32.mrb[4].mxu0 }
 0x218   :  { %v1781_v33 = vrot.slane %v1710_v10, %v7542_v54  ;;  %v6328_v46 = vadd.f32 %v1552_v51, %v7491_v44  ;;  %v1554_v47 = vpop.f32.mrb[5].mxu0 }
 0x219   :  { %v1773_v26 = vcombine.high %v1771_v1, %v1771_v1  ;;  %v5880_v53 = vrot.slane %v1772_v21, 9  ;;  %v5881_v19 = vrot.slane %v1771_v1, 9  ;;  %v2549_v29 = vmax.f32 %v1764_v8, %v5879_v17  ;;  %v7578_v31 = vpop.f32.mrb[6].mxu0  ;;  %v7591_v8 = vpop.f32.mrb[31].mxu1 }
 0x21a   :  { %v1788_v5 = vrot.slane %v1774_v22, %v7542_v54  ;;  %v1789_v32 = vcombine.high %v1781_v33, %v1781_v33  ;;  %v5883_v55 = vrot.slane %v1781_v33, 9  ;;  %v6329_v35 = vadd.f32 %v1554_v47, %v7493_v4  ;;  %v7584_v56 = vpop.f32.mrb[7].mxu0  ;;  %9492 = vst [vmem:[#allocation17_spill] sm:$0xff] %v7591_v8 }
 0x21b   :  { %v5882_v44 = vrot.slane %v1773_v26, 9  ;;  %v2550_v58 = vmax.f32 %v1772_v21, %v5880_v53  ;;  %v2551_v37 = vmax.f32 %v1771_v1, %v5881_v19  ;;  %v2680_v38 = vadd.f32 %v7545_v2, %v2549_v29 }
 0x21c   :  { %v1790_v62 = vcombine.high %v1788_v5, %v1788_v5  ;;  %v5884_v41 = vrot.slane %v1789_v32, 9  ;;  %v5885_v43 = vrot.slane %v1788_v5, 9  ;;  %v2553_v3 = vmax.f32 %v1781_v33, %v5883_v55 }
 0x21d   :  { %v2552_v10 = vmax.f32 %v1773_v26, %v5882_v44  ;;  %v2681_v4 = vadd.f32 %v7564_v63, %v2550_v58  ;;  %v2682_v17 = vadd.f32 %v7554_v40, %v2551_v37  ;;  %v2776_v22 = vmax.f32 %v2680_v38, 0.0 }
 0x21e   :  { %v5886_v1 = vrot.slane %v1790_v62, 9  ;;  %v2554_v21 = vmax.f32 %v1789_v32, %v5884_v41  ;;  %v2555_v51 = vmax.f32 %v1788_v5, %v5885_v43  ;;  %v2684_v47 = vadd.f32 %v7549_v59, %v2553_v3  ;;  %v7599_v41 = vpop.f32.mrb[32].mxu1 }
 0x21f   :  { %v2683_v53 = vadd.f32 %v7567_v61, %v2552_v10  ;;  %v2777_v19 = vmax.f32 %v2681_v4, 0.0  ;;  %v2778_v29 = vmax.f32 %v2682_v17, 0.0  ;;  %v2872_v33 = vpack.c.bf16 %v2776_v22, %v2776_v22  ;;  %v1562_v55 = vpop.f32.mrb[8].mxu0  ;;  %9493 = vst [vmem:[#allocation18_spill] sm:$0xff] %v7599_v41 }
 0x220   :  { %v2556_v0 = vmax.f32 %v1790_v62, %v5886_v1  ;;  %v2685_v26 = vadd.f32 %v7572_v42, %v2554_v21  ;;  %v2686_v44 = vadd.f32 %v7560_v52, %v2555_v51  ;;  %v2780_v58 = vmax.f32 %v2684_v47, 0.0  ;;  %v1564_v37 = vpop.f32.mrb[9].mxu0  ;;  %v7602_v62 = vpop.f32.mrb[33].mxu1 }
 0x221   :  { %v2779_v38 = vmax.f32 %v2683_v53, 0.0  ;;  %v2873_v8 = vpack.c.bf16 %v2777_v19, %v2777_v19  ;;  %v2874_v60 = vpack.c.bf16 %v2778_v29, %v2778_v29  ;;  %v3393_v32 = vunpack.c.l.b16 %v2872_v33  ;;  %v1566_v5 = vpop.f32.mrb[10].mxu0  ;;  %9494 = vst [vmem:[#allocation19_spill] sm:$0xff] %v7602_v62  ;;  %v7604_v47 = vpop.f32.mrb[34].mxu1 }
 0x222   :  { %v2687_v43 = vadd.f32 %v7575_v15, %v2556_v0  ;;  %v2781_v3 = vmax.f32 %v2685_v26, 0.0  ;;  %v2782_v10 = vmax.f32 %v2686_v44, 0.0  ;;  %v2876_v4 = vpack.c.bf16 %v2780_v58, %v2780_v58  ;;  %v1568_v17 = vpop.f32.mrb[11].mxu0  ;;  %9495 = vst [vmem:[#allocation20_spill] sm:$0xff] %v7604_v47  ;;  %v7608_v41 = vpop.f32.mrb[35].mxu1 }
 0x223   :  { %v2875_v22 = vpack.c.bf16 %v2779_v38, %v2779_v38  ;;  %v3041_v1 = vunpack.c.l.b16 %v2873_v8  ;;  %v3042_v21 = vunpack.c.l.b16 %v2874_v60  ;;  %v1711_v51 = vmax.f32 %v6328_v46, %v6329_v35  ;;  %9497 = vst [vmem:[#allocation22_spill] sm:$0xff] %v7608_v41 }
 0x224   :  { %v2783_v53 = vmax.f32 %v2687_v43, 0.0  ;;  %v2877_v19 = vpack.c.bf16 %v2781_v3, %v2781_v3  ;;  %v2878_v29 = vpack.c.bf16 %v2782_v10, %v2782_v10  ;;  %v7606_v33 = vunpack.c.l.b16 %v2876_v4 }
 0x225   :  { %v7610_v0 = vunpack.c.l.b16 %v2875_v22  ;;  %v3105_v26 = vrot.slane %v3042_v21, 7  ;;  %v3401_v44 = vrot.slane %v3041_v1, 7  ;;  %v3403_v58 = vrot.slane %v3042_v21, 6 }
 0x226   :  { %9496 = vst [vmem:[#allocation21_spill] sm:$0xff] %v7606_v33  ;;  %v2879_v57 = vpack.c.bf16 %v2783_v53, %v2783_v53  ;;  %v7612_v62 = vunpack.c.l.b16 %v2877_v19  ;;  %v7614_v8 = vunpack.c.l.b16 %v2878_v29  ;;  %v1791_v53 = vcombine.high %v1711_v51, %v1711_v51 }
 0x227   :  { %9498 = vst [vmem:[#allocation23_spill] sm:$0xff] %v7610_v0  ;;  %v3107_v35 = vsel %vm3106_vm5, %v3105_v26, %v3041_v1  ;;  %v3108_v60 = vrot.slane %v7610_v0, 6  ;;  %v3402_v38 = vsel %vm3106_vm5, %v3401_v44, %v3393_v32  ;;  %v3405_v43 = vrot.slane %v7610_v0, 5  ;;  %v1572_v3 = vpop.f32.mrb[12].mxu0  ;;  %v7651_v26 = vpop.f32.mrb[36].mxu1 }
 0x228   :  { %9499 = vst [vmem:[#allocation24_spill] sm:$0xff] %v7612_v62  ;;  %9500 = vst [vmem:[#allocation25_spill] sm:$0xff] %v7614_v8  ;;  %v3404_v10 = vsel %vm3109_vm6, %v3403_v58, %v3402_v38  ;;  %v3715_v4 = vrot.slane %v7610_v0, 7  ;;  %v7623_v22 = vunpack.c.l.b16 %v2879_v57  ;;  %v7626_v19 = vpop.f32.mrb[13].mxu0  ;;  %v4375_v57 = vrot.slane %v7612_v62, 7 }
 0x229   :  { %v7629_v29 = vsel %vm3109_vm6, %v3108_v60, %v3107_v35  ;;  %v7632_v1 = vsel %vm3112_vm7, %v3405_v43, %v3404_v10  ;;  %v7636_v44 = vpop.f32.mrb[14].mxu0  ;;  %v1798_v35 = vrot.slane %v1711_v51, %v7542_v54  ;;  %v6330_v60 = vadd.f32 %v7578_v31, %v7495_v12  ;;  %9504 = vst [vmem:[#allocation29_spill] sm:$0xff] %v7651_v26 }
 0x22a   :  { %9501 = vst [vmem:[#allocation26_spill] sm:$0xff] %v7623_v22  ;;  %9502 = vst [vmem:[#allocation27_spill] sm:$0xff] %v7632_v1  ;;  %v7639_v58 = vsel %vm3106_vm5, %v3715_v4, %v3042_v21  ;;  %v7643_v46 = vpop.f32.mrb[15].mxu0  ;;  %v6331_v43 = vadd.f32 %v7584_v56, %v7497_v16  ;;  %v6332_v10 = vadd.f32 %v1562_v55, %v7499_v7 }
 0x22b   :  { %9503 = vst [vmem:[#allocation28_spill] sm:$0xff] %v7639_v58  ;;  %v7655_v21 = vsel %vm3106_vm5, %v4375_v57, %v7606_v33  ;;  %v1805_v4 = vrot.slane %v1791_v53, %v7542_v54  ;;  %v6333_v38 = vadd.f32 %v1564_v37, %v7501_v9  ;;  %v7660_v51 = vadd.f32 %v1566_v5, %v7503_v13 }
 0x22c   :  { %9505 = vst [vmem:[#allocation30_spill] sm:$0xff] %v7655_v21  ;;  %v1806_v32 = vcombine.high %v1798_v35, %v1798_v35  ;;  %v5887_v12 = vrot.slane %v1798_v35, 9  ;;  %v1712_v31 = vmax.f32 %v6330_v60, %v6331_v43  ;;  %v7663_v16 = vadd.f32 %v1568_v17, %v7505_v14 }
 0x22d   :  { %v1807_v7 = vcombine.high %v1805_v4, %v1805_v4  ;;  %v5889_v56 = vrot.slane %v1805_v4, 9  ;;  %v1713_v55 = vmax.f32 %v6332_v10, %v6333_v38  ;;  %v7666_v0 = vadd.f32 %v1572_v3, %v7507_v18 }
 0x22e   :  { %v5888_v57 = vrot.slane %v1806_v32, 9  ;;  %v2557_v21 = vmax.f32 %v1798_v35, %v5887_v12  ;;  %v1808_v53 = vcombine.high %v1712_v31, %v1712_v31  ;;  %v1815_v9 = vrot.slane %v1712_v31, %v7542_v54 }
 0x22f   :  { %v7669_v37 = vpop.f32.mrb[16].mxu0  ;;  %v5890_v13 = vrot.slane %v1807_v7, 9  ;;  %v2559_v5 = vmax.f32 %v1805_v4, %v5889_v56  ;;  %v1825_v58 = vcombine.high %v1713_v55, %v1713_v55  ;;  %v7672_v60 = vrot.slane %v1713_v55, %v7542_v54 }
 0x230   :  { %v7674_v14 = vpop.f32.mrb[17].mxu0  ;;  %v2558_v17 = vmax.f32 %v1806_v32, %v5888_v57  ;;  %v2688_v38 = vadd.f32 %v7545_v2, %v2557_v21  ;;  %v1822_v18 = vrot.slane %v1808_v53, %v7542_v54  ;;  %v1823_v3 = vcombine.high %v1815_v9, %v1815_v9 }
 0x231   :  { %v7678_v35 = vpop.f32.mrb[18].mxu0  ;;  %v2560_v43 = vmax.f32 %v1807_v7, %v5890_v13  ;;  %v2690_v10 = vadd.f32 %v7554_v40, %v2559_v5  ;;  %v5891_v12 = vrot.slane %v1815_v9, 9  ;;  %v7682_v4 = vrot.slane %v1825_v58, %v7542_v54 }
 0x232   :  { %v7684_v31 = vpop.f32.mrb[19].mxu0  ;;  %v2689_v56 = vadd.f32 %v7564_v63, %v2558_v17  ;;  %v2784_v55 = vmax.f32 %v2688_v38, 0.0  ;;  %v1824_v32 = vcombine.high %v1822_v18, %v1822_v18  ;;  %v5892_v57 = vrot.slane %v1823_v3, 9 }
 0x233   :  { %v2691_v21 = vadd.f32 %v7567_v61, %v2560_v43  ;;  %v2786_v53 = vmax.f32 %v2690_v10, 0.0  ;;  %v5893_v1 = vrot.slane %v1822_v18, 9  ;;  %v2561_v26 = vmax.f32 %v1815_v9, %v5891_v12 }
 0x234   :  { %v2785_v41 = vmax.f32 %v2689_v56, 0.0  ;;  %v2952_v7 = vpack.c.bf16 %v2784_v55, %v2784_v55  ;;  %v5894_v13 = vrot.slane %v1824_v32, 9  ;;  %v2562_v5 = vmax.f32 %v1823_v3, %v5892_v57 }
 0x235   :  { %v2787_v47 = vmax.f32 %v2691_v21, 0.0  ;;  %v4004_v20 = vpack.c.bf16 %v2786_v53, %v2786_v53  ;;  %v2563_v58 = vmax.f32 %v1822_v18, %v5893_v1  ;;  %v2692_v11 = vadd.f32 %v7549_v59, %v2561_v26  ;;  %v7719_v26 = vpop.f32.mrb[37].mxu1 }
 0x236   :  { %v7689_v6 = vunpack.c.l.b16 %v2952_v7  ;;  %v3674_v17 = vpack.c.bf16 %v2785_v41, %v2785_v41  ;;  %v2564_v38 = vmax.f32 %v1824_v32, %v5894_v13  ;;  %v2693_v34 = vadd.f32 %v7572_v42, %v2562_v5  ;;  %9511 = vst [vmem:[#allocation36_spill] sm:$0xff] %v7719_v26 }
 0x237   :  { %v7692_v28 = vpop.f32.mrb[20].mxu0  ;;  %v4037_v43 = vunpack.c.l.b16 %v4004_v20  ;;  %v4334_v10 = vpack.c.bf16 %v2787_v47, %v2787_v47  ;;  %v2694_v9 = vadd.f32 %v7560_v52, %v2563_v58  ;;  %v2788_v12 = vmax.f32 %v2692_v11, 0.0 }
 0x238   :  { %9506 = vst [vmem:[#allocation31_spill] sm:$0xff] %v7689_v6  ;;  %v7695_v56 = vpop.f32.mrb[21].mxu0  ;;  %v7697_v3 = vunpack.c.l.b16 %v3674_v17  ;;  %v2695_v41 = vadd.f32 %v7575_v15, %v2564_v38  ;;  %v2789_v47 = vmax.f32 %v2693_v34, 0.0  ;;  %v1840_v17 = vcombine.high %v7672_v60, %v7672_v60 }
 0x239   :  { %v7702_v18 = vpop.f32.mrb[22].mxu0  ;;  %v7704_v55 = vrot.slane %v4037_v43, 1  ;;  %v4367_v32 = vunpack.c.l.b16 %v4334_v10  ;;  %v7706_v20 = vrot.slane %v4037_v43, 2  ;;  %v2790_v53 = vmax.f32 %v2694_v9, 0.0 }
 0x23a   :  { %9507 = vst [vmem:[#allocation32_spill] sm:$0xff] %v7697_v3  ;;  %v7708_v57 = vpop.f32.mrb[23].mxu0  ;;  %v2791_v7 = vmax.f32 %v2695_v41, 0.0  ;;  %v2880_v5 = vpack.c.bf16 %v2788_v12, %v2788_v12  ;;  %v2881_v58 = vpack.c.bf16 %v2789_v47, %v2789_v47  ;;  %v1841_v34 = vcombine.high %v7682_v4, %v7682_v4 }
 0x23b   :  { %9508 = vst [vmem:[#allocation33_spill] sm:$0xff] %v7704_v55  ;;  %9509 = vst [vmem:[#allocation34_spill] sm:$0xff] %v7706_v20  ;;  %v7712_v13 = vrot.slane %v4367_v32, 1  ;;  %v2882_v38 = vpack.c.bf16 %v2790_v53, %v2790_v53  ;;  %v5895_v43 = vrot.slane %v7672_v60, 9  ;;  %v5896_v9 = vrot.slane %v1840_v17, 9  ;;  %v7722_v32 = vpop.f32.mrb[38].mxu1 }
 0x23c   :  { %v2883_v10 = vpack.c.bf16 %v2791_v7, %v2791_v7  ;;  %v3049_v11 = vunpack.c.l.b16 %v2881_v58  ;;  %v3394_v21 = vunpack.c.l.b16 %v2880_v5  ;;  %v5897_v41 = vrot.slane %v7682_v4, 9  ;;  %9512 = vst [vmem:[#allocation37_spill] sm:$0xff] %v7722_v32 }
 0x23d   :  { %9510 = vst [vmem:[#allocation35_spill] sm:$0xff] %v7712_v13  ;;  %v3050_v12 = vunpack.c.l.b16 %v2882_v38  ;;  %v5898_v1 = vrot.slane %v1841_v34, 9  ;;  %v2565_v53 = vmax.f32 %v7672_v60, %v5895_v43  ;;  %v7729_v13 = vpop.f32.mrb[39].mxu1  ;;  %v2566_v55 = vmax.f32 %v1840_v17, %v5896_v9 }
 0x23e   :  { %v7724_v47 = vunpack.c.l.b16 %v2883_v10  ;;  %9515 = vst [vmem:[#allocation40_spill] sm:$0xff] %v7729_v13  ;;  %v3415_v20 = vrot.slane %v3049_v11, 7  ;;  %v2567_v58 = vmax.f32 %v7682_v4, %v5897_v41  ;;  %v1714_v5 = vmax.f32 %v7660_v51, %v7663_v16 }
 0x23f   :  { %v7727_v7 = vpop.f32.mrb[24].mxu0  ;;  %v3126_v32 = vrot.slane %v3050_v12, 7  ;;  %v3417_v10 = vrot.slane %v3050_v12, 6  ;;  %v2568_v17 = vmax.f32 %v1841_v34, %v5898_v1  ;;  %v2696_v4 = vadd.f32 %v7545_v2, %v2565_v53 }
 0x240   :  { %9513 = vst [vmem:[#allocation38_spill] sm:$0xff] %v7724_v47  ;;  %9514 = vst [vmem:[#allocation39_spill] sm:$0xff] %v7727_v7  ;;  %v7734_v3 = vpop.f32.mrb[25].mxu0  ;;  %v3128_v38 = vrot.slane %v7724_v47, 6  ;;  %v3419_v26 = vrot.slane %v7724_v47, 5  ;;  %v3416_v43 = vsel %vm3106_vm5, %v3415_v20, %v3394_v21  ;;  %v3729_v13 = vrot.slane %v7724_v47, 7 }
 0x241   :  { %9516 = vst [vmem:[#allocation41_spill] sm:$0xff] %v7734_v3  ;;  %v7738_v60 = vpop.f32.mrb[26].mxu0  ;;  %v3127_v51 = vsel %vm3106_vm5, %v3126_v32, %v3049_v11  ;;  %v3418_v16 = vsel %vm3109_vm6, %v3417_v10, %v3416_v43  ;;  %v2697_v41 = vadd.f32 %v7564_v63, %v2566_v55  ;;  %v2698_v3 = vadd.f32 %v7554_v40, %v2567_v58 }
 0x242   :  { %v7743_v9 = vpop.f32.mrb[27].mxu0  ;;  %v7750_v7 = vsel %vm3109_vm6, %v3128_v38, %v3127_v51  ;;  %v7753_v20 = vsel %vm3112_vm7, %v3419_v26, %v3418_v16  ;;  %v7756_v1 = vsel %vm3106_vm5, %v3729_v13, %v3050_v12  ;;  %v2699_v21 = vadd.f32 %v7567_v61, %v2568_v17 }
 0x243   :  { %9517 = vst [vmem:[#allocation42_spill] sm:$0xff] %v7753_v20  ;;  %9518 = vst [vmem:[#allocation43_spill] sm:$0xff] %v7756_v1  ;;  %v2792_v34 = vmax.f32 %v2696_v4, 0.0  ;;  %v2793_v53 = vmax.f32 %v2697_v41, 0.0  ;;  %v2794_v11 = vmax.f32 %v2698_v3, 0.0  ;;  %v1842_v32 = vcombine.high %v1714_v5, %v1714_v5  ;;  %v7788_v1 = vpop.f32.mrb[40].mxu1 }
 0x244   :  { %v2795_v10 = vmax.f32 %v2699_v21, 0.0  ;;  %v1849_v55 = vrot.slane %v1714_v5, %v7542_v54  ;;  %v6337_v58 = vadd.f32 %v7626_v19, %v7509_v24  ;;  %v6338_v38 = vadd.f32 %v7636_v44, %v7511_v27  ;;  %9527 = vst [vmem:[#allocation52_spill] sm:$0xff] %v7788_v1 }
 0x245   :  { %v2884_v26 = vpack.c.bf16 %v2792_v34, %v2792_v34  ;;  %v2885_v43 = vpack.c.bf16 %v2793_v53, %v2793_v53  ;;  %v2886_v51 = vpack.c.bf16 %v2794_v11, %v2794_v11  ;;  %v1856_v13 = vrot.slane %v1842_v32, %v7542_v54 }
 0x246   :  { %v2887_v17 = vpack.c.bf16 %v2795_v10, %v2795_v10  ;;  %v1857_v4 = vcombine.high %v1849_v55, %v1849_v55  ;;  %v5899_v3 = vrot.slane %v1849_v55, 9  ;;  %v1715_v16 = vmax.f32 %v7666_v0, %v6337_v58 }
 0x247   :  { %v7765_v12 = vpop.f32.mrb[28].mxu0  ;;  %v7770_v5 = vunpack.c.l.b16 %v2884_v26  ;;  %v7772_v24 = vunpack.c.l.b16 %v2885_v43  ;;  %v7774_v19 = vunpack.c.l.b16 %v2886_v51  ;;  %v1858_v27 = vcombine.high %v1856_v13, %v1856_v13 }
 0x248   :  { %9519 = vst [vmem:[#allocation44_spill] sm:$0xff] %v7765_v12  ;;  %v7768_v41 = vpop.f32.mrb[29].mxu0  ;;  %v7778_v21 = vunpack.c.l.b16 %v2887_v17  ;;  %v5900_v34 = vrot.slane %v1857_v4, 9  ;;  %v5901_v53 = vrot.slane %v1856_v13, 9  ;;  %v2569_v11 = vmax.f32 %v1849_v55, %v5899_v3 }
 0x249   :  { %9520 = vst [vmem:[#allocation45_spill] sm:$0xff] %v7768_v41  ;;  %9521 = vst [vmem:[#allocation46_spill] sm:$0xff] %v7770_v5  ;;  %v7776_v44 = vpop.f32.mrb[30].mxu0  ;;  %v4389_v43 = vrot.slane %v7772_v24, 7  ;;  %v5902_v47 = vrot.slane %v1858_v27, 9  ;;  %v1859_v3 = vcombine.high %v1715_v16, %v1715_v16  ;;  %v1866_v0 = vrot.slane %v1715_v16, %v7542_v54 }
 0x24a   :  { %9522 = vst [vmem:[#allocation47_spill] sm:$0xff] %v7772_v24  ;;  %9523 = vst [vmem:[#allocation48_spill] sm:$0xff] %v7774_v19  ;;  %v7780_v32 = vpop.f32.mrb[31].mxu0  ;;  %v2570_v17 = vmax.f32 %v1857_v4, %v5900_v34  ;;  %v2571_v20 = vmax.f32 %v1856_v13, %v5901_v53  ;;  %v2700_v55 = vadd.f32 %v7549_v59, %v2569_v11 }
 0x24b   :  { %9524 = vst [vmem:[#allocation49_spill] sm:$0xff] %v7776_v44  ;;  %9525 = vst [vmem:[#allocation50_spill] sm:$0xff] %v7778_v21  ;;  %v7796_v58 = vsel %vm3106_vm5, %v4389_v43, %v7770_v5  ;;  %v2572_v26 = vmax.f32 %v1858_v27, %v5902_v47  ;;  %v6339_v4 = vadd.f32 %v7643_v46, %v7513_v30  ;;  %v5903_v27 = vrot.slane %v1866_v0, 9 }
 0x24c   :  { %9526 = vst [vmem:[#allocation51_spill] sm:$0xff] %v7780_v32  ;;  %v7792_v32 = vpop.f32.mrb[41].mxu1  ;;  %9529 = vst [vmem:[#allocation54_spill] sm:$0xff] %v7796_v58  ;;  %v2701_v10 = vadd.f32 %v7572_v42, %v2570_v17  ;;  %v2702_v13 = vadd.f32 %v7560_v52, %v2571_v20  ;;  %v2796_v53 = vmax.f32 %v2700_v55, 0.0  ;;  %v1873_v11 = vrot.slane %v1859_v3, %v7542_v54 }
 0x24d   :  { %9528 = vst [vmem:[#allocation53_spill] sm:$0xff] %v7792_v32  ;;  %v7801_v34 = vpop.f32.mrb[42].mxu1  ;;  %v1874_v16 = vcombine.high %v1866_v0, %v1866_v0  ;;  %v2703_v43 = vadd.f32 %v7575_v15, %v2572_v26  ;;  %v1716_v17 = vmax.f32 %v6338_v38, %v6339_v4  ;;  %v2573_v41 = vmax.f32 %v1866_v0, %v5903_v27 }
 0x24e   :  { %9530 = vst [vmem:[#allocation55_spill] sm:$0xff] %v7801_v34  ;;  %v7807_v32 = vpop.f32.mrb[43].mxu1  ;;  %v2797_v47 = vmax.f32 %v2701_v10, 0.0  ;;  %v2798_v30 = vmax.f32 %v2702_v13, 0.0  ;;  %v2953_v46 = vpack.c.bf16 %v2796_v53, %v2796_v53  ;;  %v1875_v34 = vcombine.high %v1873_v11, %v1873_v11 }
 0x24f   :  { %v7805_v51 = vpop.f32.mrb[32].mxu0  ;;  %9532 = vst [vmem:[#allocation57_spill] sm:$0xff] %v7807_v32  ;;  %v5904_v1 = vrot.slane %v1874_v16, 9  ;;  %v2799_v55 = vmax.f32 %v2703_v43, 0.0  ;;  %v5905_v44 = vrot.slane %v1873_v11, 9  ;;  %v2704_v53 = vadd.f32 %v7545_v2, %v2573_v41 }
 0x250   :  { %9531 = vst [vmem:[#allocation56_spill] sm:$0xff] %v7805_v51  ;;  %v7810_v58 = vpop.f32.mrb[33].mxu0  ;;  %v3675_v3 = vpack.c.bf16 %v2797_v47, %v2797_v47  ;;  %v7816_v32 = vunpack.c.l.b16 %v2953_v46  ;;  %v4005_v26 = vpack.c.bf16 %v2798_v30, %v2798_v30  ;;  %v5906_v10 = vrot.slane %v1875_v34, 9 }
 0x251   :  { %9533 = vst [vmem:[#allocation58_spill] sm:$0xff] %v7810_v58  ;;  %v7812_v20 = vpop.f32.mrb[34].mxu0  ;;  %v2574_v12 = vmax.f32 %v1874_v16, %v5904_v1  ;;  %v4335_v4 = vpack.c.bf16 %v2799_v55, %v2799_v55  ;;  %v2575_v13 = vmax.f32 %v1873_v11, %v5905_v44  ;;  %v7821_v58 = vpop.f32.mrb[44].mxu1  ;;  %v1876_v0 = vcombine.high %v1716_v17, %v1716_v17 }
 0x252   :  { %9534 = vst [vmem:[#allocation59_spill] sm:$0xff] %v7812_v20  ;;  %v7814_v51 = vpop.f32.mrb[35].mxu0  ;;  %9535 = vst [vmem:[#allocation60_spill] sm:$0xff] %v7816_v32  ;;  %v7818_v38 = vunpack.c.l.b16 %v3675_v3  ;;  %v4038_v20 = vunpack.c.l.b16 %v4005_v26  ;;  %v2576_v47 = vmax.f32 %v1875_v34, %v5906_v10  ;;  %v7825_v27 = vpop.f32.mrb[45].mxu1 }
 0x253   :  { %9537 = vst [vmem:[#allocation62_spill] sm:$0xff] %v7821_v58  ;;  %9538 = vst [vmem:[#allocation63_spill] sm:$0xff] %v7825_v27  ;;  %v4368_v46 = vunpack.c.l.b16 %v4335_v4  ;;  %v2705_v16 = vadd.f32 %v7564_v63, %v2574_v12  ;;  %v7830_v44 = vpop.f32.mrb[46].mxu1  ;;  %v2706_v55 = vadd.f32 %v7554_v40, %v2575_v13  ;;  %v2800_v4 = vmax.f32 %v2704_v53, 0.0 }
 0x254   :  { %9536 = vst [vmem:[#allocation61_spill] sm:$0xff] %v7818_v38  ;;  %9539 = vst [vmem:[#allocation64_spill] sm:$0xff] %v7830_v44  ;;  %v7832_v41 = vrot.slane %v4038_v20, 1  ;;  %v7834_v11 = vrot.slane %v4038_v20, 2  ;;  %v2707_v3 = vadd.f32 %v7567_v61, %v2576_v47  ;;  %v7840_v26 = vpop.f32.mrb[47].mxu1  ;;  %v1883_v20 = vrot.slane %v1716_v17, %v7542_v54 }
 0x255   :  { %9542 = vst [vmem:[#allocation67_spill] sm:$0xff] %v7840_v26  ;;  %v7842_v10 = vrot.slane %v4368_v46, 1  ;;  %v2801_v1 = vmax.f32 %v2705_v16, 0.0  ;;  %v2802_v30 = vmax.f32 %v2706_v55, 0.0  ;;  %v6340_v13 = vadd.f32 %v7669_v37, %v7515_v39 }
 0x256   :  { %9540 = vst [vmem:[#allocation65_spill] sm:$0xff] %v7832_v41  ;;  %9541 = vst [vmem:[#allocation66_spill] sm:$0xff] %v7834_v11  ;;  %v2803_v43 = vmax.f32 %v2707_v3, 0.0  ;;  %v2888_v47 = vpack.c.bf16 %v2800_v4, %v2800_v4  ;;  %v1890_v46 = vrot.slane %v1876_v0, %v7542_v54  ;;  %v6341_v53 = vadd.f32 %v7674_v14, %v7517_v45 }
 0x257   :  { %v7838_v34 = vpop.f32.mrb[36].mxu0  ;;  %9543 = vst [vmem:[#allocation68_spill] sm:$0xff] %v7842_v10  ;;  %v7851_v41 = vpack.c.bf16 %v2801_v1, %v2801_v1  ;;  %v2890_v10 = vpack.c.bf16 %v2802_v30, %v2802_v30  ;;  %v1891_v3 = vcombine.high %v1883_v20, %v1883_v20  ;;  %v5907_v38 = vrot.slane %v1883_v20, 9 }
 0x258   :  { %v7844_v12 = vpop.f32.mrb[37].mxu0  ;;  %v2891_v55 = vpack.c.bf16 %v2803_v43, %v2803_v43  ;;  %v3395_v26 = vunpack.c.l.b16 %v2888_v47  ;;  %v1892_v39 = vcombine.high %v1890_v46, %v1890_v46  ;;  %v5909_v37 = vrot.slane %v1890_v46, 9 }
 0x259   :  { %v7849_v11 = vpop.f32.mrb[38].mxu0  ;;  %v9388_v17 = vunpack.c.l.b16 %v7851_v41  ;;  %v7859_v44 = vunpack.c.l.b16 %v2890_v10  ;;  %v5908_v4 = vrot.slane %v1891_v3, 9  ;;  %v2577_v0 = vmax.f32 %v1883_v20, %v5907_v38 }
 0x25a   :  { %9544 = vst [vmem:[#allocation69_spill] sm:$0xff] %v7849_v11  ;;  %v7856_v16 = vpop.f32.mrb[39].mxu0  ;;  %v7861_v1 = vunpack.c.l.b16 %v2891_v55  ;;  %v5910_v14 = vrot.slane %v1892_v39, 9  ;;  %v2579_v27 = vmax.f32 %v1890_v46, %v5909_v37  ;;  %v1717_v30 = vmax.f32 %v6340_v13, %v6341_v53 }
 0x25b   :  { %9545 = vst [vmem:[#allocation70_spill] sm:$0xff] %v7856_v16  ;;  %v3429_v45 = vrot.slane %v9388_v17, 7  ;;  %v2578_v16 = vmax.f32 %v1891_v3, %v5908_v4  ;;  %v2708_v47 = vadd.f32 %v7549_v59, %v2577_v0  ;;  %v6342_v3 = vadd.f32 %v7678_v35, %v7519_v23 }
 0x25c   :  { %9546 = vst [vmem:[#allocation71_spill] sm:$0xff] %v7861_v1  ;;  %v2580_v55 = vmax.f32 %v1892_v39, %v5910_v14  ;;  %v2710_v38 = vadd.f32 %v7560_v52, %v2579_v27  ;;  %v1893_v20 = vcombine.high %v1717_v30, %v1717_v30  ;;  %v1900_v53 = vrot.slane %v1717_v30, %v7542_v54 }
 0x25d   :  { %v7871_v10 = vsel %vm3106_vm5, %v3429_v45, %v3395_v26  ;;  %v2709_v13 = vadd.f32 %v7572_v42, %v2578_v16  ;;  %v2804_v46 = vmax.f32 %v2708_v47, 0.0  ;;  %v6343_v27 = vadd.f32 %v7684_v31, %v7521_v25 }
 0x25e   :  { %9547 = vst [vmem:[#allocation72_spill] sm:$0xff] %v7871_v10  ;;  %v2711_v4 = vadd.f32 %v7575_v15, %v2580_v55  ;;  %v2806_v26 = vmax.f32 %v2710_v38, 0.0  ;;  %v1907_v39 = vrot.slane %v1893_v20, %v7542_v54  ;;  %v1908_v14 = vcombine.high %v1900_v53, %v1900_v53 }
 0x25f   :  { %v7868_v11 = vpop.f32.mrb[40].mxu0  ;;  %v2805_v45 = vmax.f32 %v2709_v13, 0.0  ;;  %v2892_v16 = vpack.c.bf16 %v2804_v46, %v2804_v46  ;;  %v5911_v47 = vrot.slane %v1900_v53, 9 }
 0x260   :  { %v7874_v17 = vpop.f32.mrb[41].mxu0  ;;  %v2807_v30 = vmax.f32 %v2711_v4, 0.0  ;;  %v2894_v58 = vpack.c.bf16 %v2806_v26, %v2806_v26  ;;  %v1909_v43 = vcombine.high %v1907_v39, %v1907_v39  ;;  %v5913_v23 = vrot.slane %v1907_v39, 9 }
 0x261   :  { %9548 = vst [vmem:[#allocation73_spill] sm:$0xff] %v7874_v17  ;;  %v7880_v37 = vpop.f32.mrb[42].mxu0  ;;  %v2893_v35 = vpack.c.bf16 %v2805_v45, %v2805_v45  ;;  %v7888_v10 = vunpack.c.l.b16 %v2892_v16  ;;  %v5912_v55 = vrot.slane %v1908_v14, 9  ;;  %v2581_v38 = vmax.f32 %v1900_v53, %v5911_v47 }
 0x262   :  { %9549 = vst [vmem:[#allocation74_spill] sm:$0xff] %v7880_v37  ;;  %v7886_v0 = vpop.f32.mrb[43].mxu0  ;;  %v2895_v37 = vpack.c.bf16 %v2807_v30, %v2807_v30  ;;  %v7890_v20 = vunpack.c.l.b16 %v2894_v58  ;;  %v5914_v17 = vrot.slane %v1909_v43, 9  ;;  %v7892_v25 = vmax.f32 %v1907_v39, %v5913_v23 }
 0x263   :  { %9550 = vst [vmem:[#allocation75_spill] sm:$0xff] %v7886_v0  ;;  %9551 = vst [vmem:[#allocation76_spill] sm:$0xff] %v7888_v10  ;;  %v7894_v31 = vunpack.c.l.b16 %v2893_v35  ;;  %v2582_v13 = vmax.f32 %v1908_v14, %v5912_v55  ;;  %v2712_v46 = vadd.f32 %v7545_v2, %v2581_v38  ;;  %v1718_v4 = vmax.f32 %v6342_v3, %v6343_v27 }
 0x264   :  { %9552 = vst [vmem:[#allocation77_spill] sm:$0xff] %v7890_v20  ;;  %9553 = vst [vmem:[#allocation78_spill] sm:$0xff] %v7892_v25  ;;  %v7899_v0 = vunpack.c.l.b16 %v2895_v37  ;;  %v7901_v45 = vmax.f32 %v1909_v43, %v5914_v17  ;;  %v6344_v53 = vadd.f32 %v7692_v28, %v7523_v48  ;;  %v6345_v58 = vadd.f32 %v7695_v56, %v7525_v36 }
 0x265   :  { %v2713_v16 = vadd.f32 %v7564_v63, %v2582_v13  ;;  %v2808_v14 = vmax.f32 %v2712_v46, 0.0  ;;  %v1910_v47 = vcombine.high %v1718_v4, %v1718_v4  ;;  %v1917_v3 = vrot.slane %v1718_v4, %v7542_v54 }
 0x266   :  { %9555 = vst [vmem:[#allocation80_spill] sm:$0xff] %v7899_v0  ;;  %9556 = vst [vmem:[#allocation81_spill] sm:$0xff] %v7901_v45  ;;  %v1719_v37 = vmax.f32 %v6344_v53, %v6345_v58  ;;  %v6346_v17 = vadd.f32 %v7702_v18, %v7527_v49  ;;  %v6347_v48 = vadd.f32 %v7708_v57, %v7529_v50  ;;  %v9559_v36 = vrot.slane %v7606_v33, 5 }
 0x267   :  { %v7897_v26 = vpop.f32.mrb[44].mxu0  ;;  %v2809_v43 = vmax.f32 %v2713_v16, 0.0  ;;  %v2954_v30 = vpack.c.bf16 %v2808_v14, %v2808_v14  ;;  %v1924_v23 = vrot.slane %v1910_v47, %v7542_v54  ;;  %v1925_v35 = vcombine.high %v1917_v3, %v1917_v3 }
 0x268   :  { %9554 = vst [vmem:[#allocation79_spill] sm:$0xff] %v7897_v26  ;;  %v7907_v39 = vpop.f32.mrb[45].mxu0  ;;  %v7921_v28 = vsel %vm3112_vm7, %v9559_v36, %v7629_v29  ;;  %v5915_v55 = vrot.slane %v1917_v3, 9  ;;  %v1927_v38 = vcombine.high %v1719_v37, %v1719_v37  ;;  %v1934_v49 = vrot.slane %v1719_v37, %v7542_v54 }
 0x269   :  { %9557 = vst [vmem:[#allocation82_spill] sm:$0xff] %v7907_v39  ;;  %v7911_v27 = vpop.f32.mrb[46].mxu0  ;;  %v7927_v18 = vmax.f32 %v6346_v17, %v6347_v48  ;;  %v7929_v50 = vunpack.c.l.b16 %v2954_v30  ;;  %v7931_v57 = vpack.c.bf16 %v2809_v43, %v2809_v43  ;;  %v1926_v13 = vcombine.high %v1924_v23, %v1924_v23 }
 0x26a   :  { %9558 = vst [vmem:[#allocation83_spill] sm:$0xff] %v7911_v27  ;;  %v7923_v56 = vpop.f32.mrb[47].mxu0  ;;  %v5916_v29 = vrot.slane %v1925_v35, 9  ;;  %v5917_v46 = vrot.slane %v1924_v23, 9  ;;  %v2585_v4 = vmax.f32 %v1917_v3, %v5915_v55  ;;  %v1941_v53 = vrot.slane %v1927_v38, %v7542_v54  ;;  %v6643_v3 = vld [vmem:[#allocation2 + $0x4] ss:$8 sps:$4 sm:$0xff]  }
 0x26b   :  { %9560 = vst [vmem:[#allocation84_spill] sm:$0xff] %v7923_v56  ;;  %9561 = vst [vmem:[#allocation85_spill] sm:$0xff] %v7929_v50  ;;  %v1942_v58 = vcombine.high %v1934_v49, %v1934_v49  ;;  %v5918_v16 = vrot.slane %v1926_v13, 9  ;;  %v5919_v47 = vrot.slane %v1934_v49, 9  ;;  %v1944_v36 = vcombine.high %v7927_v18, %v7927_v18  ;;  %3601 = vmatprep.subr.bf16.mxu1 %v6643_v3 }
 0x26c   :  { %9562 = vst [vmem:[#allocation86_spill] sm:$0xff] %v7931_v57  ;;  %v2586_v14 = vmax.f32 %v1925_v35, %v5916_v29  ;;  %v2587_v37 = vmax.f32 %v1924_v23, %v5917_v46  ;;  %v2716_v17 = vadd.f32 %v7549_v59, %v2585_v4  ;;  %v1943_v48 = vcombine.high %v1941_v53, %v1941_v53 }
 0x26d   :  { %v5920_v30 = vrot.slane %v1942_v58, 9  ;;  %v2588_v43 = vmax.f32 %v1926_v13, %v5918_v16  ;;  %v5921_v25 = vrot.slane %v1941_v53, 9  ;;  %v2589_v57 = vmax.f32 %v1934_v49, %v5919_v47 }
 0x26e   :  { %v2717_v45 = vadd.f32 %v7572_v42, %v2586_v14  ;;  %v2718_v55 = vadd.f32 %v7560_v52, %v2587_v37  ;;  %v2812_v38 = vmax.f32 %v2716_v17, 0.0  ;;  %v5922_v33 = vrot.slane %v1943_v48, 9 }
 0x26f   :  { %v2590_v35 = vmax.f32 %v1942_v58, %v5920_v30  ;;  %v2719_v29 = vadd.f32 %v7575_v15, %v2588_v43  ;;  %v2591_v27 = vmax.f32 %v1941_v53, %v5921_v25  ;;  %v2720_v23 = vadd.f32 %v7545_v2, %v2589_v57 }
 0x270   :  { %v2813_v56 = vmax.f32 %v2717_v45, 0.0  ;;  %v2814_v46 = vmax.f32 %v2718_v55, 0.0  ;;  %v2896_v13 = vpack.c.bf16 %v2812_v38, %v2812_v38  ;;  %v2592_v4 = vmax.f32 %v1943_v48, %v5922_v33 }
 0x271   :  { %v2721_v16 = vadd.f32 %v7564_v63, %v2590_v35  ;;  %v2815_v49 = vmax.f32 %v2719_v29, 0.0  ;;  %v2722_v47 = vadd.f32 %v7554_v40, %v2591_v27  ;;  %v2816_v58 = vmax.f32 %v2720_v23, 0.0 }
 0x272   :  { %v7942_v14 = vpack.c.bf16 %v2813_v56, %v2813_v56  ;;  %v2898_v37 = vpack.c.bf16 %v2814_v46, %v2814_v46  ;;  %v3396_v45 = vunpack.c.l.b16 %v2896_v13  ;;  %v2723_v25 = vadd.f32 %v7567_v61, %v2592_v4 }
 0x273   :  { %v2817_v57 = vmax.f32 %v2721_v16, 0.0  ;;  %v2899_v53 = vpack.c.bf16 %v2815_v49, %v2815_v49  ;;  %v2818_v33 = vmax.f32 %v2722_v47, 0.0  ;;  %v2900_v48 = vpack.c.bf16 %v2816_v58, %v2816_v58 }
 0x274   :  { %v9391_v17 = vunpack.c.l.b16 %v7942_v14  ;;  %v7947_v30 = vunpack.c.l.b16 %v2898_v37  ;;  %v2819_v43 = vmax.f32 %v2723_v25, 0.0  ;;  %v1951_v27 = vrot.slane %v7927_v18, %v7542_v54 }
 0x275   :  { %v2901_v56 = vpack.c.bf16 %v2817_v57, %v2817_v57  ;;  %v7951_v3 = vunpack.c.l.b16 %v2899_v53  ;;  %v2902_v38 = vpack.c.bf16 %v2818_v33, %v2818_v33  ;;  %v7955_v35 = vunpack.c.l.b16 %v2900_v48 }
 0x276   :  { %9563 = vst [vmem:[#allocation87_spill] sm:$0xff] %v7947_v30  ;;  %v3443_v55 = vrot.slane %v9391_v17, 7  ;;  %v2903_v46 = vpack.c.bf16 %v2819_v43, %v2819_v43  ;;  %v1958_v18 = vrot.slane %v1944_v36, %v7542_v54  ;;  %v1959_v49 = vcombine.high %v1951_v27, %v1951_v27 }
 0x277   :  { %9564 = vst [vmem:[#allocation88_spill] sm:$0xff] %v7951_v3  ;;  %9565 = vst [vmem:[#allocation89_spill] sm:$0xff] %v7955_v35  ;;  %v7959_v13 = vunpack.c.l.b16 %v2901_v56  ;;  %v7964_v16 = vunpack.c.l.b16 %v2902_v38  ;;  %v5923_v58 = vrot.slane %v1951_v27, 9  ;;  %v3114_v37 = vrot.slane %v7612_v62, 4 }
 0x278   :  { %v7962_v4 = vsel %vm3106_vm5, %v3443_v55, %v3396_v45  ;;  %v7967_v47 = vunpack.c.l.b16 %v2903_v46  ;;  %v3117_v25 = vrot.slane %v7614_v8, 3  ;;  %v1960_v57 = vcombine.high %v1958_v18, %v1958_v18  ;;  %v6647_v8 = vld [vmem:[#allocation2 + $0x20] ss:$8 sps:$4 sm:$0xff]  }
 0x279   :  { %9566 = vst [vmem:[#allocation90_spill] sm:$0xff] %v7959_v13  ;;  %9567 = vst [vmem:[#allocation91_spill] sm:$0xff] %v7962_v4  ;;  %v5924_v53 = vrot.slane %v1959_v49, 9  ;;  %v5925_v33 = vrot.slane %v1958_v18, 9  ;;  %v3120_v48 = vrot.slane %v7623_v22, 2  ;;  %v2593_v43 = vmax.f32 %v1951_v27, %v5923_v58 }
 0x27a   :  { %9568 = vst [vmem:[#allocation92_spill] sm:$0xff] %v7964_v16  ;;  %9569 = vst [vmem:[#allocation93_spill] sm:$0xff] %v7967_v47  ;;  %v3116_v45 = vsel %vm3115_vm8, %v3114_v37, %v7921_v28  ;;  %v3123_v56 = vrot.slane %v7689_v6, 1  ;;  %v9570_v36 = vrot.slane %v7770_v5, 5  ;;  %v5926_v38 = vrot.slane %v1960_v57, 9 }
 0x27b   :  { %v2594_v46 = vmax.f32 %v1959_v49, %v5924_v53  ;;  %v7979_v23 = vmax.f32 %v1958_v18, %v5925_v33  ;;  %v3119_v29 = vsel %vm3118_vm9, %v3117_v25, %v3116_v45  ;;  %v2724_v17 = vadd.f32 %v7549_v59, %v2593_v43  ;;  %v9573_v33 = vld [vmem:[#allocation5_spill] sm:$0xff]  ;;  %v9574_v43 = vld [vmem:[#allocation39_spill] sm:$0xff] }
 0x27c   :  { %v3131_v55 = vsel %vm3112_vm7, %v9570_v36, %v7750_v7  ;;  %v3122_v27 = vsel %vm3121_vm10, %v3120_v48, %v3119_v29  ;;  %v3132_v58 = vrot.slane %v7772_v24, 4  ;;  %v3134_v28 = vrot.slane %v7774_v19, 3  ;;  %v9575_v36 = vld [vmem:[#allocation6_spill] sm:$0xff] }
 0x27d   :  { %9571 = vst [vmem:[#allocation94_spill] sm:$0xff] %v7979_v23  ;;  %v7986_v37 = vmax.f32 %v1960_v57, %v5926_v38  ;;  %v2725_v6 = vadd.f32 %v7572_v42, %v2594_v46  ;;  %v3125_v7 = vsel %vm3124_vm11, %v3123_v56, %v3122_v27  ;;  %v3136_v49 = vrot.slane %v7778_v21, 2  ;;  %v9576_v57 = vld [vmem:[#allocation41_spill] sm:$0xff]  ;;  %v9580_v23 = vld [vmem:[#allocation44_spill] sm:$0xff] }
 0x27e   :  { %v2820_v18 = vmax.f32 %v2724_v17, 0.0  ;;  %v3133_v53 = vsel %vm3115_vm8, %v3132_v58, %v3131_v55  ;;  %v3138_v25 = vrot.slane %v7816_v32, 1  ;;  %v6348_v29 = vadd.f32 %v9574_v43, %v9573_v33  ;;  %v9578_v17 = vld [vmem:[#allocation8_spill] sm:$0xff]  ;;  %v9579_v58 = vld [vmem:[#allocation14_spill] sm:$0xff]  ;;  %v9583_v33 = vld [vmem:[#allocation45_spill] sm:$0xff] }
 0x27f   :  { %9572 = vst [vmem:[#allocation95_spill] sm:$0xff] %v7986_v37  ;;  %v2821_v48 = vmax.f32 %v2725_v6, 0.0  ;;  %v3135_v45 = vsel %vm3118_vm9, %v3134_v28, %v3133_v53  ;;  %v6349_v38 = vadd.f32 %v9576_v57, %v9575_v36  ;;  %v9577_v37 = vld [vmem:[#allocation7_spill] sm:$0xff]  ;;  %v6351_v55 = vadd.f32 %v7743_v9, %v9578_v17  ;;  %v6641_v36 = vld [vmem:[#allocation2] ss:$8 sps:$4 sm:$0xff]  }
 0x280   :  { %v6350_v46 = vadd.f32 %v7738_v60, %v9577_v37  ;;  %v2955_v56 = vpack.c.bf16 %v2820_v18, %v2820_v18  ;;  %v3137_v27 = vsel %vm3121_vm10, %v3136_v49, %v3135_v45  ;;  %v6352_v32 = vadd.f32 %v9580_v23, %v9579_v58  ;;  %v9582_v53 = vld [vmem:[#allocation15_spill] sm:$0xff]  ;;  %v9585_v49 = vld [vmem:[#allocation16_spill] sm:$0xff]  ;;  %v9586_v18 = vld [vmem:[#allocation49_spill] sm:$0xff] }
 0x281   :  { %v8005_v4 = vpack.c.bf16 %v2821_v48, %v2821_v48  ;;  %v3139_v6 = vsel %vm3124_vm11, %v3138_v25, %v3137_v27  ;;  %v1721_v28 = vmax.f32 %v6348_v29, %v6349_v38  ;;  %v6353_v43 = vadd.f32 %v9583_v33, %v9582_v53  ;;  %v6646_v9 = vld [vmem:[#allocation2 + $0x14] ss:$8 sps:$4 sm:$0xff]   ;;  %v9587_v25 = vld [vmem:[#allocation17_spill] sm:$0xff] }
 0x282   :  { %v8010_v57 = vunpack.c.l.b16 %v2955_v56  ;;  %v3224_v60 = vpack.c.b16 %v3139_v6, %v3125_v7  ;;  %v1722_v37 = vmax.f32 %v6350_v46, %v6351_v55  ;;  %v8014_v45 = vadd.f32 %v9586_v18, %v9585_v49  ;;  %v9588_v29 = vld [vmem:[#allocation51_spill] sm:$0xff]  ;;  %v9589_v7 = vld [vmem:[#allocation18_spill] sm:$0xff]  ;;  %v9590_v46 = vld [vmem:[#allocation56_spill] sm:$0xff] }
 0x283   :  { %9581 = vst [vmem:[#allocation5_spill] sm:$0xff] %v8005_v4  ;;  %v1961_v17 = vcombine.high %v1721_v28, %v1721_v28  ;;  %v1968_v23 = vrot.slane %v1721_v28, %v7542_v54  ;;  %v8017_v48 = vmax.f32 %v6352_v32, %v6353_v43  ;;  %v8021_v38 = vadd.f32 %v9588_v29, %v9587_v25  ;;  %v9591_v58 = vld [vmem:[#allocation19_spill] sm:$0xff]  ;;  %v9592_v6 = vld [vmem:[#allocation58_spill] sm:$0xff] }
 0x284   :  { %9584 = vst [vmem:[#allocation39_spill] sm:$0xff] %v8010_v57  ;;  %3345 = vmatmul.mubr.bf16.vlgmr.msra.gmra.mrb[48].mxu1 %v3224_v60  ;;  %v1978_v27 = vcombine.high %v1722_v37, %v1722_v37  ;;  %v1985_v56 = vrot.slane %v1722_v37, %v7542_v54  ;;  %v8026_v55 = vadd.f32 %v9590_v46, %v9589_v7  ;;  %v9593_v49 = vmov 0   ;;  %v6644_v60 = vld [vmem:[#allocation2 + $0x10] ss:$8 sps:$4 sm:$0xff]   ;;  %v6649_v7 = vld [vmem:[#allocation2 + $0x24] ss:$8 sps:$4 sm:$0xff]  }
 0x285   :  { %v8030_v53 = vadd.f32 %v9592_v6, %v9591_v58  ;;  %v1975_v28 = vrot.slane %v1961_v17, %v7542_v54  ;;  %v1976_v32 = vcombine.high %v1968_v23, %v1968_v23  ;;  %v5927_v33 = vrot.slane %v1968_v23, 9  ;;  %3354 = vmatprep.mubr.bf16.mxu1 %v9593_v49  ;;  %3602 = vmatpush1.bf16.msra.mxu1 %v6641_v36  ;;  %v6652_v49 = vld [vmem:[#allocation2 + $0x34] ss:$8 sps:$4 sm:$0xff]  }
 0x286   :  { %v1995_v43 = vcombine.high %v8017_v48, %v8017_v48  ;;  %v1992_v37 = vrot.slane %v1978_v27, %v7542_v54  ;;  %v1993_v18 = vcombine.high %v1985_v56, %v1985_v56  ;;  %v5931_v25 = vrot.slane %v1985_v56, 9  ;;  %3603 = vmatprep.subr.bf16.mxu1 %v6646_v9 }
 0x287   :  { %v8039_v29 = vrot.slane %v8017_v48, %v7542_v54  ;;  %v1977_v17 = vcombine.high %v1975_v28, %v1975_v28  ;;  %v5928_v46 = vrot.slane %v1976_v32, 9  ;;  %v5929_v58 = vrot.slane %v1975_v28, 9 }
 0x288   :  { %v2597_v6 = vmax.f32 %v1968_v23, %v5927_v33  ;;  %v1994_v4 = vcombine.high %v1992_v37, %v1992_v37  ;;  %v5932_v21 = vrot.slane %v1993_v18, 9  ;;  %v5933_v19 = vrot.slane %v1992_v37, 9 }
 0x289   :  { %v2601_v24 = vmax.f32 %v1985_v56, %v5931_v25  ;;  %v5930_v36 = vrot.slane %v1977_v17, 9  ;;  %v2598_v5 = vmax.f32 %v1976_v32, %v5928_v46  ;;  %v2599_v22 = vmax.f32 %v1975_v28, %v5929_v58  ;;  %3604 = vmatpush1.bf16.msra.mxu1 %v6644_v60 }
 0x28a   :  { %v2728_v27 = vadd.f32 %v7545_v2, %v2597_v6  ;;  %v5934_v62 = vrot.slane %v1994_v4, 9  ;;  %v2602_v48 = vmax.f32 %v1993_v18, %v5932_v21  ;;  %v2603_v39 = vmax.f32 %v1992_v37, %v5933_v19  ;;  %3605 = vmatprep.subr.bf16.mxu1 %v6649_v7 }
 0x28b   :  { %v2732_v9 = vadd.f32 %v7549_v59, %v2601_v24  ;;  %v2600_v26 = vmax.f32 %v1977_v17, %v5930_v36  ;;  %v2729_v23 = vadd.f32 %v7564_v63, %v2598_v5  ;;  %v2730_v33 = vadd.f32 %v7554_v40, %v2599_v22  ;;  %v6650_v24 = vld [vmem:[#allocation2 + $0x30] ss:$8 sps:$4 sm:$0xff]   ;;  %v6655_v22 = vld [vmem:[#allocation2 + $0x44] ss:$8 sps:$4 sm:$0xff]  }
 0x28c   :  { %v2824_v56 = vmax.f32 %v2728_v27, 0.0  ;;  %v2604_v25 = vmax.f32 %v1994_v4, %v5934_v62  ;;  %v2733_v28 = vadd.f32 %v7572_v42, %v2602_v48  ;;  %v2734_v32 = vadd.f32 %v7560_v52, %v2603_v39 }
 0x28d   :  { %v2828_v60 = vmax.f32 %v2732_v9, 0.0  ;;  %v2731_v46 = vadd.f32 %v7567_v61, %v2600_v26  ;;  %v2825_v21 = vmax.f32 %v2729_v23, 0.0  ;;  %v2826_v19 = vmax.f32 %v2730_v33, 0.0  ;;  %3606 = vmatpush1.bf16.msra.mxu1 %v6647_v8 }
 0x28e   :  { %v2904_v37 = vpack.c.bf16 %v2824_v56, %v2824_v56  ;;  %v2735_v18 = vadd.f32 %v7575_v15, %v2604_v25  ;;  %v2829_v7 = vmax.f32 %v2733_v28, 0.0  ;;  %v2830_v5 = vmax.f32 %v2734_v32, 0.0  ;;  %3607 = vmatprep.subr.bf16.mxu1 %v6652_v49  ;;  %v6653_v49 = vld [vmem:[#allocation2 + $0x40] ss:$8 sps:$4 sm:$0xff]   ;;  %v6658_v32 = vld [vmem:[#allocation2 + $0x54] ss:$8 sps:$4 sm:$0xff]  }
 0x28f   :  { %v2908_v17 = vpack.c.bf16 %v2828_v60, %v2828_v60  ;;  %v2827_v62 = vmax.f32 %v2731_v46, 0.0  ;;  %v8049_v4 = vpack.c.bf16 %v2825_v21, %v2825_v21  ;;  %v2906_v58 = vpack.c.bf16 %v2826_v19, %v2826_v19 }
 0x290   :  { %v3397_v39 = vunpack.c.l.b16 %v2904_v37  ;;  %v2831_v6 = vmax.f32 %v2735_v18, 0.0  ;;  %v2909_v36 = vpack.c.bf16 %v2829_v7, %v2829_v7  ;;  %v2910_v26 = vpack.c.bf16 %v2830_v5, %v2830_v5 }
 0x291   :  { %v8051_v27 = vunpack.c.l.b16 %v2908_v17  ;;  %v2907_v48 = vpack.c.bf16 %v2827_v62, %v2827_v62  ;;  %v9410_v8 = vunpack.c.l.b16 %v8049_v4  ;;  %v8054_v9 = vunpack.c.l.b16 %v2906_v58  ;;  %3608 = vmatpush1.bf16.msra.mxu1 %v6650_v24  ;;  %v6656_v62 = vld [vmem:[#allocation2 + $0x50] ss:$8 sps:$4 sm:$0xff]  }
 0x292   :  { %v2009_v23 = vrot.slane %v1995_v43, %v7542_v54  ;;  %v2911_v33 = vpack.c.bf16 %v2831_v6, %v2831_v6  ;;  %v8057_v56 = vunpack.c.l.b16 %v2909_v36  ;;  %v8059_v25 = vunpack.c.l.b16 %v2910_v26  ;;  %3609 = vmatprep.subr.bf16.mxu1 %v6655_v22  ;;  %v9601_v26 = vld [vmem:[#allocation20_spill] sm:$0xff] }
 0x293   :  { %9594 = vst [vmem:[#allocation6_spill] sm:$0xff] %v8051_v27  ;;  %9595 = vst [vmem:[#allocation41_spill] sm:$0xff] %v8054_v9  ;;  %v2010_v28 = vcombine.high %v8039_v29, %v8039_v29  ;;  %v8063_v60 = vunpack.c.l.b16 %v2907_v48  ;;  %v3457_v21 = vrot.slane %v9410_v8, 7  ;;  %v5935_v24 = vrot.slane %v8039_v29, 9  ;;  %v9602_v48 = vld [vmem:[#allocation59_spill] sm:$0xff] }
 0x294   :  { %9596 = vst [vmem:[#allocation7_spill] sm:$0xff] %v8057_v56  ;;  %9597 = vst [vmem:[#allocation8_spill] sm:$0xff] %v8059_v25  ;;  %v8069_v19 = vunpack.c.l.b16 %v2911_v33  ;;  %v2011_v37 = vcombine.high %v2009_v23, %v2009_v23  ;;  %v5937_v5 = vrot.slane %v2009_v23, 9  ;;  %v1724_v17 = vmax.f32 %v8014_v45, %v8021_v38  ;;  %v6667_v56 = vld [vmem:[#allocation2 + $0x104] ss:$8 sps:$4 sm:$0xff]  }
 0x295   :  { %9598 = vst [vmem:[#allocation14_spill] sm:$0xff] %v8063_v60  ;;  %v5936_v18 = vrot.slane %v2010_v28, 9  ;;  %v8073_v7 = vsel %vm3106_vm5, %v3457_v21, %v3397_v39  ;;  %v1725_v22 = vmax.f32 %v8026_v55, %v8030_v53  ;;  %3610 = vmatpush1.bf16.msra.mxu1 %v6653_v49  ;;  %v2605_v6 = vmax.f32 %v8039_v29, %v5935_v24  ;;  %v6661_v39 = vld [vmem:[#allocation2 + $0x64] ss:$8 sps:$4 sm:$0xff]  }
 0x296   :  { %9599 = vst [vmem:[#allocation44_spill] sm:$0xff] %v8069_v19  ;;  %9600 = vst [vmem:[#allocation15_spill] sm:$0xff] %v8073_v7  ;;  %v5938_v58 = vrot.slane %v2011_v37, 9  ;;  %v8082_v33 = vadd.f32 %v9602_v48, %v9601_v26  ;;  %3611 = vmatprep.subr.bf16.mxu1 %v6658_v32  ;;  %v8084_v21 = vmax.f32 %v2009_v23, %v5937_v5  ;;  %v6659_v23 = vld [vmem:[#allocation2 + $0x60] ss:$8 sps:$4 sm:$0xff]  }
 0x297   :  { %v2606_v36 = vmax.f32 %v2010_v28, %v5936_v18  ;;  %v2012_v43 = vcombine.high %v1724_v17, %v1724_v17  ;;  %v2019_v45 = vrot.slane %v1724_v17, %v7542_v54  ;;  %v2029_v38 = vcombine.high %v1725_v22, %v1725_v22 }
 0x298   :  { %9603 = vst [vmem:[#allocation45_spill] sm:$0xff] %v8084_v21  ;;  %v8087_v46 = vmax.f32 %v2011_v37, %v5938_v58  ;;  %v2736_v55 = vadd.f32 %v7545_v2, %v2605_v6  ;;  %v2036_v29 = vrot.slane %v1725_v22, %v7542_v54  ;;  %v6664_v37 = vld [vmem:[#allocation2 + $0x74] ss:$8 sps:$4 sm:$0xff]  }
 0x299   :  { %v2737_v53 = vadd.f32 %v7564_v63, %v2606_v36  ;;  %v2026_v49 = vrot.slane %v2012_v43, %v7542_v54  ;;  %v2027_v28 = vcombine.high %v2019_v45, %v2019_v45  ;;  %v5939_v24 = vrot.slane %v2019_v45, 9  ;;  %3612 = vmatpush1.bf16.msra.mxu1 %v6656_v62 }
 0x29a   :  { %9604 = vst [vmem:[#allocation16_spill] sm:$0xff] %v8087_v46  ;;  %v2043_v32 = vrot.slane %v2029_v38, %v7542_v54  ;;  %v2832_v18 = vmax.f32 %v2736_v55, 0.0  ;;  %v2044_v17 = vcombine.high %v2036_v29, %v2036_v29  ;;  %v5943_v26 = vrot.slane %v2036_v29, 9  ;;  %3613 = vmatprep.subr.bf16.mxu1 %v6661_v39  ;;  %v6662_v55 = vld [vmem:[#allocation2 + $0x70] ss:$8 sps:$4 sm:$0xff]  }
 0x29b   :  { %v2833_v5 = vmax.f32 %v2737_v53, 0.0  ;;  %v2028_v58 = vcombine.high %v2026_v49, %v2026_v49  ;;  %v5940_v6 = vrot.slane %v2027_v28, 9  ;;  %v5941_v48 = vrot.slane %v2026_v49, 9 }
 0x29c   :  { %v2609_v36 = vmax.f32 %v2019_v45, %v5939_v24  ;;  %v2956_v8 = vpack.c.bf16 %v2832_v18, %v2832_v18  ;;  %v2045_v43 = vcombine.high %v2043_v32, %v2043_v32  ;;  %v5944_v46 = vrot.slane %v2044_v17, 9 }
 0x29d   :  { %v8094_v22 = vpack.c.bf16 %v2833_v5, %v2833_v5  ;;  %v5942_v21 = vrot.slane %v2028_v58, 9  ;;  %v2610_v7 = vmax.f32 %v2027_v28, %v5940_v6  ;;  %v2611_v38 = vmax.f32 %v2026_v49, %v5941_v48  ;;  %3614 = vmatpush1.bf16.msra.mxu1 %v6659_v23 }
 0x29e   :  { %v2740_v62 = vadd.f32 %v7549_v59, %v2609_v36  ;;  %v8097_v53 = vunpack.c.l.b16 %v2956_v8  ;;  %v5945_v39 = vrot.slane %v2043_v32, 9  ;;  %v5946_v19 = vrot.slane %v2045_v43, 9  ;;  %3615 = vmatprep.subr.bf16.mxu1 %v6664_v37 }
 0x29f   :  { %9605 = vst [vmem:[#allocation49_spill] sm:$0xff] %v8094_v22  ;;  %v2613_v25 = vmax.f32 %v2036_v29, %v5943_v26  ;;  %v2612_v45 = vmax.f32 %v2028_v58, %v5942_v21  ;;  %v2741_v24 = vadd.f32 %v7572_v42, %v2610_v7  ;;  %v2742_v18 = vadd.f32 %v7560_v52, %v2611_v38 }
 0x2a0   :  { %9606 = vst [vmem:[#allocation17_spill] sm:$0xff] %v8097_v53  ;;  %v2836_v5 = vmax.f32 %v2740_v62, 0.0  ;;  %v2614_v22 = vmax.f32 %v2044_v17, %v5944_v46  ;;  %v2615_v28 = vmax.f32 %v2043_v32, %v5945_v39  ;;  %v2616_v49 = vmax.f32 %v2045_v43, %v5946_v19 }
 0x2a1   :  { %v2744_v6 = vadd.f32 %v7545_v2, %v2613_v25  ;;  %v2743_v23 = vadd.f32 %v7575_v15, %v2612_v45  ;;  %v2837_v8 = vmax.f32 %v2741_v24, 0.0  ;;  %v2838_v48 = vmax.f32 %v2742_v18, 0.0  ;;  %3616 = vmatpush1.bf16.msra.mxu1 %v6662_v55 }
 0x2a2   :  { %v2912_v36 = vpack.c.bf16 %v2836_v5, %v2836_v5  ;;  %v2745_v29 = vadd.f32 %v7564_v63, %v2614_v22  ;;  %v2746_v21 = vadd.f32 %v7554_v40, %v2615_v28  ;;  %v2747_v7 = vadd.f32 %v7567_v61, %v2616_v49  ;;  %3915 = vmatprep.subr.bf16.mxu1 %v6667_v56  ;;  %v9607_v22 = vld [vmem:[#allocation22_spill] sm:$0xff] }
 0x2a3   :  { %v2840_v26 = vmax.f32 %v2744_v6, 0.0  ;;  %v2839_v37 = vmax.f32 %v2743_v23, 0.0  ;;  %v8106_v46 = vpack.c.bf16 %v2837_v8, %v2837_v8  ;;  %v2914_v19 = vpack.c.bf16 %v2838_v48, %v2838_v48 }
 0x2a4   :  { %v3398_v32 = vunpack.c.l.b16 %v2912_v36  ;;  %v2841_v25 = vmax.f32 %v2745_v29, 0.0  ;;  %v2842_v17 = vmax.f32 %v2746_v21, 0.0  ;;  %v2843_v58 = vmax.f32 %v2747_v7, 0.0 }
 0x2a5   :  { %v2916_v43 = vpack.c.bf16 %v2840_v26, %v2840_v26  ;;  %v2915_v38 = vpack.c.bf16 %v2839_v37, %v2839_v37  ;;  %v9414_v62 = vunpack.c.l.b16 %v8106_v46  ;;  %v8109_v55 = vunpack.c.l.b16 %v2914_v19 }
 0x2a6   :  { %v6359_v39 = vadd.f32 %v7814_v51, %v9607_v22  ;;  %v2917_v45 = vpack.c.bf16 %v2841_v25, %v2841_v25  ;;  %v2918_v24 = vpack.c.bf16 %v2842_v17, %v2842_v17  ;;  %v2919_v56 = vpack.c.bf16 %v2843_v58, %v2843_v58 }
 0x2a7   :  { %v8113_v18 = vunpack.c.l.b16 %v2916_v43  ;;  %v8115_v5 = vunpack.c.l.b16 %v2915_v38  ;;  %v3471_v49 = vrot.slane %v9414_v62, 7  ;;  %v9612_v29 = vunpack.c.l.b16 %v7851_v41 }
 0x2a8   :  { %v8121_v23 = vunpack.c.l.b16 %v2917_v45  ;;  %v8123_v8 = vunpack.c.l.b16 %v2918_v24  ;;  %v8125_v48 = vunpack.c.l.b16 %v2919_v56  ;;  %v1726_v51 = vmax.f32 %v8082_v33, %v6359_v39 }
 0x2a9   :  { %9608 = vst [vmem:[#allocation51_spill] sm:$0xff] %v8115_v5  ;;  %v8129_v36 = vsel %vm3106_vm5, %v3471_v49, %v3398_v32  ;;  %v9613_v21 = vrot.slane %v7859_v44, 7  ;;  %v3142_v26 = vrot.slane %v7861_v1, 6  ;;  %v3144_v37 = vrot.slane %v7888_v10, 5 }
 0x2aa   :  { %9609 = vst [vmem:[#allocation18_spill] sm:$0xff] %v8121_v23  ;;  %9610 = vst [vmem:[#allocation56_spill] sm:$0xff] %v8123_v8  ;;  %v2046_v19 = vcombine.high %v1726_v51, %v1726_v51  ;;  %v2053_v25 = vrot.slane %v1726_v51, %v7542_v54  ;;  %v3146_v17 = vrot.slane %v7894_v31, 4  ;;  %v3148_v33 = vrot.slane %v7890_v20, 3 }
 0x2ab   :  { %9611 = vst [vmem:[#allocation19_spill] sm:$0xff] %v8129_v36  ;;  %v3141_v7 = vsel %vm3106_vm5, %v9613_v21, %v9612_v29  ;;  %v3150_v58 = vrot.slane %v7899_v0, 2  ;;  %v3152_v41 = vrot.slane %v7929_v50, 1  ;;  %v9614_v43 = vunpack.c.l.b16 %v7942_v14 }
 0x2ac   :  { %v3143_v32 = vsel %vm3109_vm6, %v3142_v26, %v3141_v7  ;;  %v9615_v38 = vrot.slane %v7947_v30, 7  ;;  %v2060_v39 = vrot.slane %v2046_v19, %v7542_v54  ;;  %v2061_v45 = vcombine.high %v2053_v25, %v2053_v25 }
 0x2ad   :  { %v5947_v24 = vrot.slane %v2053_v25, 9  ;;  %v3145_v56 = vsel %vm3112_vm7, %v3144_v37, %v3143_v32  ;;  %v3156_v51 = vrot.slane %v7951_v3, 6  ;;  %v3158_v29 = vrot.slane %v7955_v35, 5 }
 0x2ae   :  { %v3155_v22 = vsel %vm3106_vm5, %v9615_v38, %v9614_v43  ;;  %v3147_v49 = vsel %vm3115_vm8, %v3146_v17, %v3145_v56  ;;  %v3160_v21 = vrot.slane %v7959_v13, 4  ;;  %v2062_v7 = vcombine.high %v2060_v39, %v2060_v39 }
 0x2af   :  { %v5948_v14 = vrot.slane %v2061_v45, 9  ;;  %v5949_v26 = vrot.slane %v2060_v39, 9  ;;  %v2617_v6 = vmax.f32 %v2053_v25, %v5947_v24  ;;  %v3149_v43 = vsel %vm3118_vm9, %v3148_v33, %v3147_v49  ;;  %v9617_v24 = vld [vmem:[#allocation29_spill] sm:$0xff] }
 0x2b0   :  { %v3157_v19 = vsel %vm3109_vm6, %v3156_v51, %v3155_v22  ;;  %v3162_v38 = vrot.slane %v7964_v16, 3  ;;  %v3164_v37 = vrot.slane %v7967_v47, 2  ;;  %v5950_v32 = vrot.slane %v2062_v7, 9 }
 0x2b1   :  { %v2618_v17 = vmax.f32 %v2061_v45, %v5948_v14  ;;  %v8159_v56 = vmax.f32 %v2060_v39, %v5949_v26  ;;  %v2748_v28 = vadd.f32 %v7549_v59, %v2617_v6  ;;  %v3151_v62 = vsel %vm3121_vm10, %v3150_v58, %v3149_v43  ;;  %v9619_v14 = vld [vmem:[#allocation36_spill] sm:$0xff]  ;;  %v9620_v58 = vld [vmem:[#allocation37_spill] sm:$0xff] }
 0x2b2   :  { %v3159_v50 = vsel %vm3112_vm7, %v3158_v29, %v3157_v19  ;;  %v3166_v25 = vrot.slane %v8010_v57, 1  ;;  %v6360_v33 = vadd.f32 %v7838_v34, %v9617_v24  ;;  %v8167_v22 = vmax.f32 %v2062_v7, %v5950_v32  ;;  %v9621_v26 = vld [vmem:[#allocation69_spill] sm:$0xff]  ;;  %v9622_v43 = vld [vmem:[#allocation40_spill] sm:$0xff]  ;;  %v9623_v19 = vld [vmem:[#allocation70_spill] sm:$0xff] }
 0x2b3   :  { %9616 = vst [vmem:[#allocation58_spill] sm:$0xff] %v8159_v56  ;;  %v2749_v49 = vadd.f32 %v7572_v42, %v2618_v17  ;;  %v2844_v51 = vmax.f32 %v2748_v28, 0.0  ;;  %v3153_v45 = vsel %vm3124_vm11, %v3152_v41, %v3151_v62  ;;  %v3161_v39 = vsel %vm3115_vm8, %v3160_v21, %v3159_v50  ;;  %v9624_v32 = vld [vmem:[#allocation52_spill] sm:$0xff]  ;;  %v9625_v21 = vld [vmem:[#allocation53_spill] sm:$0xff] }
 0x2b4   :  { %9618 = vst [vmem:[#allocation20_spill] sm:$0xff] %v8167_v22  ;;  %v6361_v6 = vadd.f32 %v7844_v12, %v9619_v14  ;;  %v6362_v29 = vadd.f32 %v9621_v26, %v9620_v58  ;;  %v6363_v56 = vadd.f32 %v9623_v19, %v9622_v43  ;;  %v3163_v7 = vsel %vm3118_vm9, %v3162_v38, %v3161_v39  ;;  %v9626_v17 = vld [vmem:[#allocation73_spill] sm:$0xff]  ;;  %v9634_v19 = vld [vmem:[#allocation79_spill] sm:$0xff] }
 0x2b5   :  { %v2845_v57 = vmax.f32 %v2749_v49, 0.0  ;;  %v2957_v34 = vpack.c.bf16 %v2844_v51, %v2844_v51  ;;  %v6364_v28 = vadd.f32 %v7868_v11, %v9624_v32  ;;  %v3165_v62 = vsel %vm3121_vm10, %v3164_v37, %v3163_v7  ;;  %v9629_v49 = vld [vmem:[#allocation55_spill] sm:$0xff]  ;;  %v9630_v51 = vld [vmem:[#allocation74_spill] sm:$0xff] }
 0x2b6   :  { %v1727_v41 = vmax.f32 %v6360_v33, %v6361_v6  ;;  %v1728_v50 = vmax.f32 %v6362_v29, %v6363_v56  ;;  %v6365_v12 = vadd.f32 %v9626_v17, %v9625_v21  ;;  %v3167_v58 = vsel %vm3124_vm11, %v3166_v25, %v3165_v62  ;;  %v9631_v6 = vld [vmem:[#allocation57_spill] sm:$0xff]  ;;  %v9632_v29 = vld [vmem:[#allocation75_spill] sm:$0xff] }
 0x2b7   :  { %v8184_v24 = vunpack.c.l.b16 %v2957_v34  ;;  %v8186_v14 = vpack.c.bf16 %v2845_v57, %v2845_v57  ;;  %v8191_v26 = vadd.f32 %v9630_v51, %v9629_v49  ;;  %v3225_v38 = vpack.c.b16 %v3167_v58, %v3153_v45  ;;  %v9633_v57 = vld [vmem:[#allocation62_spill] sm:$0xff] }
 0x2b8   :  { %v2063_v39 = vcombine.high %v1727_v41, %v1727_v41  ;;  %v2070_v11 = vrot.slane %v1727_v41, %v7542_v54  ;;  %v2080_v37 = vcombine.high %v1728_v50, %v1728_v50  ;;  %v2087_v56 = vrot.slane %v1728_v50, %v7542_v54 }
 0x2b9   :  { %9627 = vst [vmem:[#allocation59_spill] sm:$0xff] %v8184_v24  ;;  %9628 = vst [vmem:[#allocation22_spill] sm:$0xff] %v8186_v14  ;;  %v1729_v33 = vmax.f32 %v6364_v28, %v6365_v12  ;;  %v8197_v43 = vadd.f32 %v9632_v29, %v9631_v6  ;;  %v8201_v34 = vadd.f32 %v9634_v19, %v9633_v57  ;;  %3355 = vmatmul.mubr.bf16.gmra.mrb[52].mxu1 %v3225_v38  ;;  %v9635_v50 = vmov 0  }
 0x2ba   :  { %v2077_v25 = vrot.slane %v2063_v39, %v7542_v54  ;;  %v2078_v7 = vcombine.high %v2070_v11, %v2070_v11  ;;  %v5951_v45 = vrot.slane %v2070_v11, 9  ;;  %v2094_v32 = vrot.slane %v2080_v37, %v7542_v54  ;;  %3364 = vmatprep.mubr.bf16.mxu1 %v9635_v50 }
 0x2bb   :  { %v2095_v62 = vcombine.high %v2087_v56, %v2087_v56  ;;  %v5955_v41 = vrot.slane %v2087_v56, 9  ;;  %v2097_v21 = vcombine.high %v1729_v33, %v1729_v33  ;;  %v8206_v28 = vrot.slane %v1729_v33, %v7542_v54 }
 0x2bc   :  { %v2079_v17 = vcombine.high %v2077_v25, %v2077_v25  ;;  %v5952_v12 = vrot.slane %v2078_v7, 9  ;;  %v5953_v58 = vrot.slane %v2077_v25, 9  ;;  %v2621_v49 = vmax.f32 %v2070_v11, %v5951_v45 }
 0x2bd   :  { %v2096_v51 = vcombine.high %v2094_v32, %v2094_v32  ;;  %v5956_v38 = vrot.slane %v2095_v62, 9  ;;  %v5957_v6 = vrot.slane %v2094_v32, 9  ;;  %v2625_v39 = vmax.f32 %v2087_v56, %v5955_v41 }
 0x2be   :  { %v5954_v29 = vrot.slane %v2079_v17, 9  ;;  %v2622_v57 = vmax.f32 %v2078_v7, %v5952_v12  ;;  %v2623_v19 = vmax.f32 %v2077_v25, %v5953_v58  ;;  %v2752_v37 = vadd.f32 %v7545_v2, %v2621_v49 }
 0x2bf   :  { %v5958_v22 = vrot.slane %v2096_v51, 9  ;;  %v2626_v14 = vmax.f32 %v2095_v62, %v5956_v38  ;;  %v2627_v36 = vmax.f32 %v2094_v32, %v5957_v6  ;;  %v2756_v33 = vadd.f32 %v7549_v59, %v2625_v39 }
 0x2c0   :  { %v2624_v47 = vmax.f32 %v2079_v17, %v5954_v29  ;;  %v2753_v16 = vadd.f32 %v7564_v63, %v2622_v57  ;;  %v2754_v13 = vadd.f32 %v7554_v40, %v2623_v19  ;;  %v2848_v11 = vmax.f32 %v2752_v37, 0.0 }
 0x2c1   :  { %v2628_v45 = vmax.f32 %v2096_v51, %v5958_v22  ;;  %v2757_v35 = vadd.f32 %v7572_v42, %v2626_v14  ;;  %v2758_v56 = vadd.f32 %v7560_v52, %v2627_v36  ;;  %v2852_v7 = vmax.f32 %v2756_v33, 0.0 }
 0x2c2   :  { %v2755_v25 = vadd.f32 %v7567_v61, %v2624_v47  ;;  %v2849_v41 = vmax.f32 %v2753_v16, 0.0  ;;  %v2850_v12 = vmax.f32 %v2754_v13, 0.0  ;;  %v2920_v62 = vpack.c.bf16 %v2848_v11, %v2848_v11 }
 0x2c3   :  { %v2759_v32 = vadd.f32 %v7575_v15, %v2628_v45  ;;  %v2853_v58 = vmax.f32 %v2757_v35, 0.0  ;;  %v2854_v17 = vmax.f32 %v2758_v56, 0.0  ;;  %v2924_v49 = vpack.c.bf16 %v2852_v7, %v2852_v7 }
 0x2c4   :  { %v2851_v38 = vmax.f32 %v2755_v25, 0.0  ;;  %v8217_v6 = vpack.c.bf16 %v2849_v41, %v2849_v41  ;;  %v2922_v39 = vpack.c.bf16 %v2850_v12, %v2850_v12  ;;  %v3399_v22 = vunpack.c.l.b16 %v2920_v62 }
 0x2c5   :  { %v2855_v51 = vmax.f32 %v2759_v32, 0.0  ;;  %v2925_v14 = vpack.c.bf16 %v2853_v58, %v2853_v58  ;;  %v2926_v29 = vpack.c.bf16 %v2854_v17, %v2854_v17  ;;  %v8219_v36 = vunpack.c.l.b16 %v2924_v49  ;;  %v9637_v17 = vld [vmem:[#allocation63_spill] sm:$0xff]  ;;  %v9638_v49 = vld [vmem:[#allocation82_spill] sm:$0xff] }
 0x2c6   :  { %v2923_v57 = vpack.c.bf16 %v2851_v38, %v2851_v38  ;;  %v9427_v16 = vunpack.c.l.b16 %v8217_v6  ;;  %v8222_v13 = vunpack.c.l.b16 %v2922_v39  ;;  %v2111_v47 = vrot.slane %v2097_v21, %v7542_v54 }
 0x2c7   :  { %v2927_v35 = vpack.c.bf16 %v2855_v51, %v2855_v51  ;;  %v8225_v19 = vunpack.c.l.b16 %v2925_v14  ;;  %v8227_v37 = vunpack.c.l.b16 %v2926_v29  ;;  %v2112_v33 = vcombine.high %v8206_v28, %v8206_v28  ;;  %v9639_v29 = vld [vmem:[#allocation64_spill] sm:$0xff] }
 0x2c8   :  { %v8231_v11 = vunpack.c.l.b16 %v2923_v57  ;;  %v3485_v56 = vrot.slane %v9427_v16, 7  ;;  %v2113_v21 = vcombine.high %v2111_v47, %v2111_v47  ;;  %v5959_v41 = vrot.slane %v8206_v28, 9  ;;  %v9640_v57 = vld [vmem:[#allocation83_spill] sm:$0xff] }
 0x2c9   :  { %v8237_v25 = vunpack.c.l.b16 %v2927_v35  ;;  %v5960_v12 = vrot.slane %v2112_v33, 9  ;;  %v5961_v32 = vrot.slane %v2111_v47, 9  ;;  %v1730_v58 = vmax.f32 %v8191_v26, %v8197_v43 }
 0x2ca   :  { %v8241_v62 = vsel %vm3106_vm5, %v3485_v56, %v3399_v22  ;;  %v6369_v38 = vadd.f32 %v9638_v49, %v9637_v17  ;;  %v5962_v39 = vrot.slane %v2113_v21, 9  ;;  %v2629_v51 = vmax.f32 %v8206_v28, %v5959_v41  ;;  %v9643_v17 = vld [vmem:[#allocation67_spill] sm:$0xff]  ;;  %v9644_v49 = vld [vmem:[#allocation84_spill] sm:$0xff] }
 0x2cb   :  { %9636 = vst [vmem:[#allocation29_spill] sm:$0xff] %v8241_v62  ;;  %v2630_v14 = vmax.f32 %v2112_v33, %v5960_v12  ;;  %v6370_v35 = vadd.f32 %v9640_v57, %v9639_v29  ;;  %v8250_v7 = vmax.f32 %v2111_v47, %v5961_v32  ;;  %v2114_v45 = vcombine.high %v1730_v58, %v1730_v58 }
 0x2cc   :  { %v2121_v22 = vrot.slane %v1730_v58, %v7542_v54  ;;  %v1731_v56 = vmax.f32 %v8201_v34, %v6369_v38  ;;  %v8254_v16 = vmax.f32 %v2113_v21, %v5962_v39  ;;  %v2760_v26 = vadd.f32 %v7545_v2, %v2629_v51 }
 0x2cd   :  { %9641 = vst [vmem:[#allocation36_spill] sm:$0xff] %v8250_v7  ;;  %v2761_v43 = vadd.f32 %v7564_v63, %v2630_v14  ;;  %v6371_v28 = vadd.f32 %v9644_v49, %v9643_v17  ;;  %v2128_v33 = vrot.slane %v2114_v45, %v7542_v54 }
 0x2ce   :  { %9642 = vst [vmem:[#allocation37_spill] sm:$0xff] %v8254_v16  ;;  %v2129_v41 = vcombine.high %v2121_v22, %v2121_v22  ;;  %v5963_v12 = vrot.slane %v2121_v22, 9  ;;  %v2131_v47 = vcombine.high %v1731_v56, %v1731_v56  ;;  %v2856_v32 = vmax.f32 %v2760_v26, 0.0 }
 0x2cf   :  { %v2857_v29 = vmax.f32 %v2761_v43, 0.0  ;;  %v2138_v58 = vrot.slane %v1731_v56, %v7542_v54  ;;  %v1732_v57 = vmax.f32 %v6370_v35, %v6371_v28  ;;  %v2130_v34 = vcombine.high %v2128_v33, %v2128_v33 }
 0x2d0   :  { %v5964_v21 = vrot.slane %v2129_v41, 9  ;;  %v5965_v38 = vrot.slane %v2128_v33, 9  ;;  %v2633_v39 = vmax.f32 %v2121_v22, %v5963_v12  ;;  %v2958_v51 = vpack.c.bf16 %v2856_v32, %v2856_v32 }
 0x2d1   :  { %v8262_v16 = vpack.c.bf16 %v2857_v29, %v2857_v29  ;;  %v2145_v14 = vrot.slane %v2131_v47, %v7542_v54  ;;  %v2146_v17 = vcombine.high %v2138_v58, %v2138_v58  ;;  %v5966_v49 = vrot.slane %v2130_v34, 9 }
 0x2d2   :  { %v2634_v45 = vmax.f32 %v2129_v41, %v5964_v21  ;;  %v2635_v7 = vmax.f32 %v2128_v33, %v5965_v38  ;;  %v2764_v62 = vadd.f32 %v7549_v59, %v2633_v39  ;;  %v8266_v26 = vunpack.c.l.b16 %v2958_v51 }
 0x2d3   :  { %9645 = vst [vmem:[#allocation69_spill] sm:$0xff] %v8262_v16  ;;  %v2147_v43 = vcombine.high %v2145_v14, %v2145_v14  ;;  %v5967_v56 = vrot.slane %v2138_v58, 9  ;;  %v5968_v35 = vrot.slane %v2146_v17, 9  ;;  %v2636_v28 = vmax.f32 %v2130_v34, %v5966_v49 }
 0x2d4   :  { %9646 = vst [vmem:[#allocation40_spill] sm:$0xff] %v8266_v26  ;;  %v2765_v3 = vadd.f32 %v7572_v42, %v2634_v45  ;;  %v2766_v22 = vadd.f32 %v7560_v52, %v2635_v7  ;;  %v2860_v12 = vmax.f32 %v2764_v62, 0.0  ;;  %v5969_v32 = vrot.slane %v2145_v14, 9 }
 0x2d5   :  { %v5970_v29 = vrot.slane %v2147_v43, 9  ;;  %v2637_v47 = vmax.f32 %v2138_v58, %v5967_v56  ;;  %v2638_v16 = vmax.f32 %v2146_v17, %v5968_v35  ;;  %v2767_v41 = vadd.f32 %v7575_v15, %v2636_v28 }
 0x2d6   :  { %v2861_v33 = vmax.f32 %v2765_v3, 0.0  ;;  %v2862_v21 = vmax.f32 %v2766_v22, 0.0  ;;  %v2928_v38 = vpack.c.bf16 %v2860_v12, %v2860_v12  ;;  %v2639_v39 = vmax.f32 %v2145_v14, %v5969_v32 }
 0x2d7   :  { %v2640_v51 = vmax.f32 %v2147_v43, %v5970_v29  ;;  %v2768_v30 = vadd.f32 %v7545_v2, %v2637_v47  ;;  %v2769_v34 = vadd.f32 %v7564_v63, %v2638_v16  ;;  %v2863_v49 = vmax.f32 %v2767_v41, 0.0 }
 0x2d8   :  { %v8273_v45 = vpack.c.bf16 %v2861_v33, %v2861_v33  ;;  %v2930_v7 = vpack.c.bf16 %v2862_v21, %v2862_v21  ;;  %v3400_v62 = vunpack.c.l.b16 %v2928_v38  ;;  %v2770_v52 = vadd.f32 %v7554_v40, %v2639_v39 }
 0x2d9   :  { %v2771_v58 = vadd.f32 %v7567_v61, %v2640_v51  ;;  %v2864_v17 = vmax.f32 %v2768_v30, 0.0  ;;  %v2865_v56 = vmax.f32 %v2769_v34, 0.0  ;;  %v2931_v3 = vpack.c.bf16 %v2863_v49, %v2863_v49 }
 0x2da   :  { %v9434_v35 = vunpack.c.l.b16 %v8273_v45  ;;  %v8278_v14 = vunpack.c.l.b16 %v2930_v7  ;;  %v2148_v43 = vcombine.high %v1732_v57, %v1732_v57  ;;  %v2866_v2 = vmax.f32 %v2770_v52, 0.0 }
 0x2db   :  { %v2867_v28 = vmax.f32 %v2771_v58, 0.0  ;;  %v2932_v63 = vpack.c.bf16 %v2864_v17, %v2864_v17  ;;  %v2933_v16 = vpack.c.bf16 %v2865_v56, %v2865_v56  ;;  %v8280_v22 = vunpack.c.l.b16 %v2931_v3 }
 0x2dc   :  { %v3499_v32 = vrot.slane %v9434_v35, 7  ;;  %v2934_v29 = vpack.c.bf16 %v2866_v2, %v2866_v2  ;;  %v2155_v21 = vrot.slane %v1732_v57, %v7542_v54  ;;  %v2162_v38 = vrot.slane %v2148_v43, %v7542_v54  ;;  %v9649_v2 = vld [vmem:[#allocation7_spill] sm:$0xff] }
 0x2dd   :  { %v2935_v47 = vpack.c.bf16 %v2867_v28, %v2867_v28  ;;  %v8286_v41 = vunpack.c.l.b16 %v2932_v63  ;;  %v8288_v33 = vunpack.c.l.b16 %v2933_v16  ;;  %v9647_v39 = vunpack.c.l.b16 %v8049_v4  ;;  %v9650_v28 = vld [vmem:[#allocation8_spill] sm:$0xff] }
 0x2de   :  { %v8291_v52 = vsel %vm3106_vm5, %v3499_v32, %v3400_v62  ;;  %v9648_v51 = vrot.slane %v8054_v9, 7  ;;  %v8300_v49 = vunpack.c.l.b16 %v2934_v29  ;;  %v3170_v58 = vrot.slane %v8063_v60, 6  ;;  %v9651_v16 = vld [vmem:[#allocation44_spill] sm:$0xff] }
 0x2df   :  { %v8302_v7 = vunpack.c.l.b16 %v2935_v47  ;;  %v3172_v17 = vrot.slane %v8051_v27, 5  ;;  %v2163_v62 = vcombine.high %v2155_v21, %v2155_v21  ;;  %v2164_v56 = vcombine.high %v2162_v38, %v2162_v38 }
 0x2e0   :  { %v3169_v34 = vsel %vm3106_vm5, %v9648_v51, %v9647_v39  ;;  %v5971_v3 = vrot.slane %v2155_v21, 9  ;;  %v5973_v57 = vrot.slane %v2162_v38, 9  ;;  %v3174_v4 = vrot.slane %v9649_v2, 4 }
 0x2e1   :  { %v3171_v43 = vsel %vm3109_vm6, %v3170_v58, %v3169_v34  ;;  %v3176_v63 = vrot.slane %v9650_v28, 3  ;;  %v3178_v32 = vrot.slane %v9651_v16, 2  ;;  %v5972_v29 = vrot.slane %v2163_v62, 9 }
 0x2e2   :  { %v5974_v39 = vrot.slane %v2164_v56, 9  ;;  %v2641_v47 = vmax.f32 %v2155_v21, %v5971_v3  ;;  %v8310_v51 = vmax.f32 %v2162_v38, %v5973_v57  ;;  %v3173_v30 = vsel %vm3112_vm7, %v3172_v17, %v3171_v43 }
 0x2e3   :  { %v3180_v12 = vrot.slane %v8097_v53, 1  ;;  %v9653_v35 = vunpack.c.l.b16 %v8106_v46  ;;  %v9654_v54 = vrot.slane %v8109_v55, 7  ;;  %v3184_v58 = vrot.slane %v8115_v5, 6 }
 0x2e4   :  { %9652 = vst [vmem:[#allocation70_spill] sm:$0xff] %v8310_v51  ;;  %v2642_v15 = vmax.f32 %v2163_v62, %v5972_v29  ;;  %v8320_v61 = vmax.f32 %v2164_v56, %v5974_v39  ;;  %v2772_v40 = vadd.f32 %v7549_v59, %v2641_v47  ;;  %v3175_v21 = vsel %vm3115_vm8, %v3174_v4, %v3173_v30 }
 0x2e5   :  { %v3183_v34 = vsel %vm3106_vm5, %v9654_v54, %v9653_v35  ;;  %v3177_v38 = vsel %vm3118_vm9, %v3176_v63, %v3175_v21  ;;  %v3186_v3 = vrot.slane %v8113_v18, 5  ;;  %v3188_v46 = vrot.slane %v8121_v23, 4 }
 0x2e6   :  { %9655 = vst [vmem:[#allocation52_spill] sm:$0xff] %v8320_v61  ;;  %v3185_v17 = vsel %vm3109_vm6, %v3184_v58, %v3183_v34  ;;  %v2773_v57 = vadd.f32 %v7572_v42, %v2642_v15  ;;  %v2868_v54 = vmax.f32 %v2772_v40, 0.0  ;;  %v3179_v35 = vsel %vm3121_vm10, %v3178_v32, %v3177_v38 }
 0x2e7   :  { %v3190_v62 = vrot.slane %v8123_v8, 3  ;;  %v3181_v56 = vsel %vm3124_vm11, %v3180_v12, %v3179_v35  ;;  %v3187_v59 = vsel %vm3112_vm7, %v3186_v3, %v3185_v17  ;;  %v3192_v30 = vrot.slane %v8125_v48, 2 }
 0x2e8   :  { %v3194_v43 = vrot.slane %v8184_v24, 1  ;;  %v2869_v4 = vmax.f32 %v2773_v57, 0.0  ;;  %v2959_v63 = vpack.c.bf16 %v2868_v54, %v2868_v54  ;;  %v3189_v29 = vsel %vm3115_vm8, %v3188_v46, %v3187_v59  ;;  %v9681_v24 = vld [vmem:[#allocation93_spill] sm:$0xff] }
 0x2e9   :  { %v9656_v39 = vunpack.c.l.b16 %v8217_v6  ;;  %v9657_v40 = vrot.slane %v8222_v13, 7  ;;  %v3191_v15 = vsel %vm3118_vm9, %v3190_v62, %v3189_v29  ;;  %v3198_v12 = vrot.slane %v8231_v11, 6 }
 0x2ea   :  { %v3200_v32 = vrot.slane %v8219_v36, 5  ;;  %v3202_v47 = vrot.slane %v8225_v19, 4  ;;  %v8345_v34 = vunpack.c.l.b16 %v2959_v63  ;;  %v8347_v58 = vpack.c.bf16 %v2869_v4, %v2869_v4 }
 0x2eb   :  { %v3197_v42 = vsel %vm3106_vm5, %v9657_v40, %v9656_v39  ;;  %v3193_v21 = vsel %vm3121_vm10, %v3192_v30, %v3191_v15  ;;  %v3204_v6 = vrot.slane %v8227_v37, 3  ;;  %v3206_v3 = vrot.slane %v8237_v25, 2 }
 0x2ec   :  { %9658 = vst [vmem:[#allocation53_spill] sm:$0xff] %v8345_v34  ;;  %9659 = vst [vmem:[#allocation73_spill] sm:$0xff] %v8347_v58  ;;  %v3195_v38 = vsel %vm3124_vm11, %v3194_v43, %v3193_v21  ;;  %v3199_v17 = vsel %vm3109_vm6, %v3198_v12, %v3197_v42  ;;  %v3208_v46 = vrot.slane %v8266_v26, 1  ;;  %v9660_v35 = vunpack.c.l.b16 %v8273_v45  ;;  %v9662_v12 = vld [vmem:[#allocation21_spill] sm:$0xff] }
 0x2ed   :  { %v3226_v57 = vpack.c.b16 %v3195_v38, %v3181_v56  ;;  %v3201_v54 = vsel %vm3112_vm7, %v3200_v32, %v3199_v17  ;;  %v9661_v62 = vrot.slane %v8278_v14, 7  ;;  %v3212_v30 = vrot.slane %v8280_v22, 6  ;;  %v9664_v17 = vld [vmem:[#allocation25_spill] sm:$0xff] }
 0x2ee   :  { %v3203_v4 = vsel %vm3115_vm8, %v3202_v47, %v3201_v54  ;;  %v3214_v43 = vrot.slane %v8286_v41, 5  ;;  %v3216_v63 = vrot.slane %v8288_v33, 4  ;;  %v3218_v29 = vrot.slane %v8300_v49, 3  ;;  %v9663_v47 = vld [vmem:[#allocation24_spill] sm:$0xff]  ;;  %v9665_v54 = vld [vmem:[#allocation26_spill] sm:$0xff] }
 0x2ef   :  { %v3211_v59 = vsel %vm3106_vm5, %v9661_v62, %v9660_v35  ;;  %3365 = vmatmul.mubr.bf16.gmra.mrb[56].mxu1 %v3226_v57  ;;  %v3205_v56 = vsel %vm3118_vm9, %v3204_v6, %v3203_v4  ;;  %v3220_v45 = vrot.slane %v8302_v7, 2  ;;  %v3222_v40 = vrot.slane %v8345_v34, 1 }
 0x2f0   :  { %v3213_v39 = vsel %vm3109_vm6, %v3212_v30, %v3211_v59  ;;  %3374 = vmatprep.mubr.bf16.mxu1 %v9635_v50  ;;  %v3207_v42 = vsel %vm3121_vm10, %v3206_v3, %v3205_v56  ;;  %v3407_v32 = vrot.slane %v9662_v12, 4  ;;  %v3409_v21 = vrot.slane %v9663_v47, 3  ;;  %v9666_v59 = vld [vmem:[#allocation27_spill] sm:$0xff]  ;;  %v9667_v3 = vld [vmem:[#allocation46_spill] sm:$0xff] }
 0x2f1   :  { %v3215_v15 = vsel %vm3112_vm7, %v3214_v43, %v3213_v39  ;;  %v3209_v38 = vsel %vm3124_vm11, %v3208_v46, %v3207_v42  ;;  %v3411_v57 = vrot.slane %v9664_v17, 2  ;;  %v3413_v35 = vrot.slane %v9665_v54, 1  ;;  %v9668_v43 = vld [vmem:[#allocation47_spill] sm:$0xff]  ;;  %v9669_v46 = vld [vmem:[#allocation48_spill] sm:$0xff] }
 0x2f2   :  { %v3217_v6 = vsel %vm3115_vm8, %v3216_v63, %v3215_v15  ;;  %v3408_v30 = vsel %vm3115_vm8, %v3407_v32, %v9666_v59  ;;  %v3421_v4 = vrot.slane %v9667_v3, 4  ;;  %v3423_v56 = vrot.slane %v9668_v43, 3  ;;  %v9670_v63 = vld [vmem:[#allocation50_spill] sm:$0xff]  ;;  %v9672_v32 = vld [vmem:[#allocation72_spill] sm:$0xff] }
 0x2f3   :  { %v3219_v62 = vsel %vm3118_vm9, %v3218_v29, %v3217_v6  ;;  %v3410_v61 = vsel %vm3118_vm9, %v3409_v21, %v3408_v30  ;;  %v3425_v42 = vrot.slane %v9669_v46, 2  ;;  %v3427_v15 = vrot.slane %v9670_v63, 1  ;;  %v9671_v29 = vld [vmem:[#allocation42_spill] sm:$0xff] }
 0x2f4   :  { %v3221_v39 = vsel %vm3121_vm10, %v3220_v45, %v3219_v62  ;;  %v3412_v34 = vsel %vm3121_vm10, %v3411_v57, %v3410_v61  ;;  %v3422_v6 = vsel %vm3115_vm8, %v3421_v4, %v9671_v29  ;;  %v9673_v59 = vrot.slane %v7859_v44, 6 }
 0x2f5   :  { %v3223_v51 = vsel %vm3124_vm11, %v3222_v40, %v3221_v39  ;;  %v3414_v45 = vsel %vm3124_vm11, %v3413_v35, %v3412_v34  ;;  %v3424_v21 = vsel %vm3118_vm9, %v3423_v56, %v3422_v6  ;;  %v3433_v62 = vrot.slane %v7861_v1, 5  ;;  %v9674_v34 = vld [vmem:[#allocation91_spill] sm:$0xff]  ;;  %v9677_v6 = vld [vmem:[#allocation88_spill] sm:$0xff] }
 0x2f6   :  { %v3432_v26 = vsel %vm3109_vm6, %v9673_v59, %v9672_v32  ;;  %v3227_v58 = vpack.c.b16 %v3223_v51, %v3209_v38  ;;  %v3426_v30 = vsel %vm3121_vm10, %v3425_v42, %v3424_v21  ;;  %v3435_v40 = vrot.slane %v7888_v10, 4  ;;  %v9675_v38 = vld [vmem:[#allocation87_spill] sm:$0xff]  ;;  %v9678_v59 = vld [vmem:[#allocation89_spill] sm:$0xff]  ;;  %v9679_v21 = vld [vmem:[#allocation90_spill] sm:$0xff] }
 0x2f7   :  { %v3437_v61 = vrot.slane %v7894_v31, 3  ;;  %v3439_v57 = vrot.slane %v7890_v20, 2  ;;  %v3428_v4 = vsel %vm3124_vm11, %v3427_v15, %v3426_v30  ;;  %v3434_v39 = vsel %vm3112_vm7, %v3433_v62, %v3432_v26  ;;  %v9680_v62 = vld [vmem:[#allocation92_spill] sm:$0xff] }
 0x2f8   :  { %3375 = vmatmul.mubr.bf16.gmra.mrb[60].mxu1 %v3227_v58  ;;  %v3441_v51 = vrot.slane %v7899_v0, 1  ;;  %v9676_v35 = vrot.slane %v9675_v38, 6  ;;  %v3513_v42 = vpack.c.b16 %v3428_v4, %v3414_v45  ;;  %v3436_v29 = vsel %vm3115_vm8, %v3435_v40, %v3434_v39 }
 0x2f9   :  { %3633 = vmatprep.mubr.bf16.mxu1 %v9635_v50  ;;  %v3447_v32 = vrot.slane %v9677_v6, 5  ;;  %v3449_v58 = vrot.slane %v9678_v59, 4  ;;  %v3438_v15 = vsel %vm3118_vm9, %v3437_v61, %v3436_v29  ;;  %v3451_v26 = vrot.slane %v9679_v21, 3 }
 0x2fa   :  { %v3446_v56 = vsel %vm3109_vm6, %v9676_v35, %v9674_v34  ;;  %v3453_v30 = vrot.slane %v9680_v62, 2  ;;  %v3455_v53 = vrot.slane %v9681_v24, 1  ;;  %v3440_v38 = vsel %vm3121_vm10, %v3439_v57, %v3438_v15  ;;  %v9682_v35 = vld [vmem:[#allocation15_spill] sm:$0xff]  ;;  %v6665_v24 = vld [vmem:[#allocation2 + $0x100] ss:$8 sps:$4 sm:$0xff]  }
 0x2fb   :  { %v3448_v34 = vsel %vm3112_vm7, %v3447_v32, %v3446_v56  ;;  %v9683_v45 = vrot.slane %v8054_v9, 6  ;;  %v3461_v4 = vrot.slane %v8063_v60, 5  ;;  %v3442_v39 = vsel %vm3124_vm11, %v3441_v51, %v3440_v38  ;;  %v9684_v38 = vld [vmem:[#allocation19_spill] sm:$0xff] }
 0x2fc   :  { %v3450_v61 = vsel %vm3115_vm8, %v3449_v58, %v3448_v34  ;;  %v3463_v29 = vrot.slane %v8051_v27, 4  ;;  %v3465_v62 = vrot.slane %v9649_v2, 3  ;;  %v3467_v32 = vrot.slane %v9650_v28, 2 }
 0x2fd   :  { %v3460_v40 = vsel %vm3109_vm6, %v9683_v45, %v9682_v35  ;;  %v3452_v57 = vsel %vm3118_vm9, %v3451_v26, %v3450_v61  ;;  %v3469_v15 = vrot.slane %v9651_v16, 1  ;;  %v6670_v35 = vld [vmem:[#allocation2 + $0x114] ss:$8 sps:$4 sm:$0xff]   ;;  %v9685_v58 = vrot.slane %v8109_v55, 6 }
 0x2fe   :  { %v3462_v56 = vsel %vm3112_vm7, %v3461_v4, %v3460_v40  ;;  %v3454_v45 = vsel %vm3121_vm10, %v3453_v30, %v3452_v57  ;;  %v3475_v9 = vrot.slane %v8115_v5, 5  ;;  %v3477_v4 = vrot.slane %v8113_v18, 4 }
 0x2ff   :  { %v3464_v51 = vsel %vm3115_vm8, %v3463_v29, %v3462_v56  ;;  %v3474_v34 = vsel %vm3109_vm6, %v9685_v58, %v9684_v38  ;;  %v3456_v26 = vsel %vm3124_vm11, %v3455_v53, %v3454_v45  ;;  %v3479_v61 = vrot.slane %v8121_v23, 3  ;;  %v6668_v56 = vld [vmem:[#allocation2 + $0x110] ss:$8 sps:$4 sm:$0xff]  }
 0x300   :  { %v3466_v40 = vsel %vm3118_vm9, %v3465_v62, %v3464_v51  ;;  %3634 = vmatmul.mubr.bf16.vlgmr.msra.gmra.mrb[48].mxu1 %v3513_v42  ;;  %v3514_v16 = vpack.c.b16 %v3456_v26, %v3442_v39  ;;  %v3476_v29 = vsel %vm3112_vm7, %v3475_v9, %v3474_v34  ;;  %v3481_v57 = vrot.slane %v8123_v8, 2  ;;  %v9686_v51 = vld [vmem:[#allocation29_spill] sm:$0xff] }
 0x301   :  { %v3468_v30 = vsel %vm3121_vm10, %v3467_v32, %v3466_v40  ;;  %3916 = vmatpush1.bf16.msra.mxu1 %v6665_v24  ;;  %3643 = vmatprep.mubr.bf16.mxu1 %v9635_v50  ;;  %v3478_v62 = vsel %vm3115_vm8, %v3477_v4, %v3476_v29  ;;  %v3483_v45 = vrot.slane %v8125_v48, 1  ;;  %v9687_v42 = vrot.slane %v8222_v13, 6  ;;  %v6673_v9 = vld [vmem:[#allocation2 + $0x124] ss:$8 sps:$4 sm:$0xff]  }
 0x302   :  { %v8449_v53 = vsel %vm3124_vm11, %v3469_v15, %v3468_v30  ;;  %3917 = vmatprep.subr.bf16.mxu1 %v6670_v35  ;;  %v3480_v32 = vsel %vm3118_vm9, %v3479_v61, %v3478_v62  ;;  %v3489_v24 = vrot.slane %v8231_v11, 5  ;;  %v3491_v38 = vrot.slane %v8219_v36, 4  ;;  %v6671_v62 = vld [vmem:[#allocation2 + $0x120] ss:$8 sps:$4 sm:$0xff]  }
 0x303   :  { %v3488_v39 = vsel %vm3109_vm6, %v9687_v42, %v9686_v51  ;;  %v3493_v15 = vrot.slane %v8225_v19, 3  ;;  %v3482_v58 = vsel %vm3121_vm10, %v3481_v57, %v3480_v32  ;;  %v3495_v34 = vrot.slane %v8227_v37, 2 }
 0x304   :  { %v3497_v26 = vrot.slane %v8237_v25, 1  ;;  %v9688_v40 = vrot.slane %v8278_v14, 6  ;;  %v3484_v4 = vsel %vm3124_vm11, %v3483_v45, %v3482_v58  ;;  %v3490_v61 = vsel %vm3112_vm7, %v3489_v24, %v3488_v39  ;;  %v9689_v58 = vld [vmem:[#allocation28_spill] sm:$0xff] }
 0x305   :  { %v3503_v30 = vrot.slane %v8280_v22, 5  ;;  %v3505_v29 = vrot.slane %v8286_v41, 4  ;;  %3918 = vmatpush1.bf16.msra.mxu1 %v6668_v56  ;;  %v3515_v57 = vpack.c.b16 %v3484_v4, %v8449_v53  ;;  %v3492_v51 = vsel %vm3115_vm8, %v3491_v38, %v3490_v61 }
 0x306   :  { %v3502_v35 = vsel %vm3109_vm6, %v9688_v40, %v8291_v52  ;;  %v3507_v42 = vrot.slane %v8288_v33, 3  ;;  %v3509_v32 = vrot.slane %v8300_v49, 2  ;;  %3919 = vmatprep.subr.bf16.mxu1 %v6673_v9  ;;  %v6676_v52 = vld [vmem:[#allocation2 + $0x134] ss:$8 sps:$4 sm:$0xff]   ;;  %v3494_v45 = vsel %vm3118_vm9, %v3493_v15, %v3492_v51 }
 0x307   :  { %v3504_v39 = vsel %vm3112_vm7, %v3503_v30, %v3502_v35  ;;  %v3511_v24 = vrot.slane %v8302_v7, 1  ;;  %v9690_v56 = vrot.slane %v9662_v12, 6  ;;  %v3496_v53 = vsel %vm3121_vm10, %v3495_v34, %v3494_v45  ;;  %v9691_v30 = vld [vmem:[#allocation31_spill] sm:$0xff]  ;;  %v9692_v45 = vld [vmem:[#allocation32_spill] sm:$0xff] }
 0x308   :  { %v3506_v38 = vsel %vm3115_vm8, %v3505_v29, %v3504_v39  ;;  %v3719_v4 = vrot.slane %v9663_v47, 5  ;;  %v3721_v9 = vrot.slane %v9664_v17, 4  ;;  %3644 = vmatmul.mubr.bf16.gmra.mrb[52].mxu1 %v3514_v16  ;;  %v8488_v15 = vsel %vm3124_vm11, %v3497_v26, %v3496_v53  ;;  %v9693_v16 = vld [vmem:[#allocation43_spill] sm:$0xff] }
 0x309   :  { %v3718_v40 = vsel %vm3109_vm6, %v9690_v56, %v9689_v58  ;;  %v3508_v35 = vsel %vm3118_vm9, %v3507_v42, %v3506_v38  ;;  %v3723_v61 = vrot.slane %v9665_v54, 3  ;;  %v3725_v51 = vrot.slane %v9691_v30, 2  ;;  %3920 = vmatpush1.bf16.msra.mxu1 %v6671_v62  ;;  %v6674_v58 = vld [vmem:[#allocation2 + $0x130] ss:$8 sps:$4 sm:$0xff]   ;;  %3653 = vmatprep.mubr.bf16.mxu1 %v9635_v50  ;;  %v6679_v42 = vld [vmem:[#allocation2 + $0x144] ss:$8 sps:$4 sm:$0xff]  }
 0x30a   :  { %v3510_v34 = vsel %vm3121_vm10, %v3509_v32, %v3508_v35  ;;  %v3720_v29 = vsel %vm3112_vm7, %v3719_v4, %v3718_v40  ;;  %v3727_v39 = vrot.slane %v9692_v45, 1  ;;  %v9694_v26 = vrot.slane %v9667_v3, 6  ;;  %3921 = vmatprep.subr.bf16.mxu1 %v6676_v52  ;;  %v9695_v45 = vld [vmem:[#allocation60_spill] sm:$0xff]  ;;  %v6677_v30 = vld [vmem:[#allocation2 + $0x140] ss:$8 sps:$4 sm:$0xff]  }
 0x30b   :  { %v8502_v53 = vsel %vm3124_vm11, %v3511_v24, %v3510_v34  ;;  %v3722_v62 = vsel %vm3115_vm8, %v3721_v9, %v3720_v29  ;;  %v3733_v38 = vrot.slane %v9668_v43, 5  ;;  %v3735_v32 = vrot.slane %v9669_v46, 4  ;;  %v9696_v34 = vld [vmem:[#allocation61_spill] sm:$0xff]  ;;  %v9697_v9 = vld [vmem:[#allocation86_spill] sm:$0xff] }
 0x30c   :  { %v3732_v56 = vsel %vm3109_vm6, %v9694_v26, %v9693_v16  ;;  %v3724_v4 = vsel %vm3118_vm9, %v3723_v61, %v3722_v62  ;;  %v3737_v35 = vrot.slane %v9670_v63, 3  ;;  %v3739_v16 = vrot.slane %v9695_v45, 2  ;;  %v9699_v62 = vld [vmem:[#allocation5_spill] sm:$0xff] }
 0x30d   :  { %v3726_v52 = vsel %vm3121_vm10, %v3725_v51, %v3724_v4  ;;  %v3734_v24 = vsel %vm3112_vm7, %v3733_v38, %v3732_v56  ;;  %v3741_v26 = vrot.slane %v9696_v34, 1  ;;  %v8516_v29 = vunpack.c.l.b16 %v9697_v9  ;;  %3922 = vmatpush1.bf16.msra.mxu1 %v6674_v58  ;;  %v6682_v51 = vld [vmem:[#allocation2 + $0x154] ss:$8 sps:$4 sm:$0xff]  }
 0x30e   :  { %v8519_v43 = vsel %vm3124_vm11, %v3727_v39, %v3726_v52  ;;  %v3736_v61 = vsel %vm3115_vm8, %v3735_v32, %v3734_v24  ;;  %v8523_v40 = vunpack.c.l.b16 %v9699_v62  ;;  %v3743_v45 = vrot.slane %v7861_v1, 7  ;;  %3923 = vmatprep.subr.bf16.mxu1 %v6679_v42  ;;  %v9701_v24 = vld [vmem:[#allocation85_spill] sm:$0xff]  ;;  %v6680_v1 = vld [vmem:[#allocation2 + $0x150] ss:$8 sps:$4 sm:$0xff]  }
 0x30f   :  { %9698 = vst [vmem:[#allocation55_spill] sm:$0xff] %v8516_v29  ;;  %v3738_v56 = vsel %vm3118_vm9, %v3737_v35, %v3736_v61  ;;  %v3745_v38 = vrot.slane %v7888_v10, 6  ;;  %v3747_v4 = vrot.slane %v7894_v31, 5  ;;  %v3749_v58 = vrot.slane %v7890_v20, 4 }
 0x310   :  { %9700 = vst [vmem:[#allocation74_spill] sm:$0xff] %v8523_v40  ;;  %v3740_v39 = vsel %vm3121_vm10, %v3739_v16, %v3738_v56  ;;  %v3744_v32 = vsel %vm3106_vm5, %v3743_v45, %v7859_v44  ;;  %v3751_v52 = vrot.slane %v7899_v0, 3  ;;  %v3753_v9 = vrot.slane %v9701_v24, 2  ;;  %3654 = vmatmul.mubr.bf16.gmra.mrb[56].mxu1 %v3515_v57 }
 0x311   :  { %v8536_v42 = vsel %vm3124_vm11, %v3741_v26, %v3740_v39  ;;  %v3746_v35 = vsel %vm3109_vm6, %v3745_v38, %v3744_v32  ;;  %v3755_v61 = vrot.slane %v8516_v29, 1  ;;  %v3757_v62 = vrot.slane %v9677_v6, 7  ;;  %3924 = vmatpush1.bf16.msra.mxu1 %v6677_v30  ;;  %3663 = vmatprep.mubr.bf16.mxu1 %v9635_v50  ;;  %v6685_v26 = vld [vmem:[#allocation2 + $0x164] ss:$8 sps:$4 sm:$0xff]   ;;  %v9702_v38 = vld [vmem:[#allocation87_spill] sm:$0xff]  ;;  %v9703_v30 = vld [vmem:[#allocation92_spill] sm:$0xff] }
 0x312   :  { %v3748_v45 = vsel %vm3112_vm7, %v3747_v4, %v3746_v35  ;;  %v3759_v57 = vrot.slane %v9678_v59, 6  ;;  %v3761_v16 = vrot.slane %v9679_v21, 5  ;;  %3925 = vmatprep.subr.bf16.mxu1 %v6682_v51  ;;  %v3763_v32 = vrot.slane %v9703_v30, 4  ;;  %v9704_v6 = vld [vmem:[#allocation93_spill] sm:$0xff]  ;;  %v9705_v4 = vld [vmem:[#allocation39_spill] sm:$0xff] }
 0x313   :  { %v3750_v56 = vsel %vm3115_vm8, %v3749_v58, %v3748_v45  ;;  %v3758_v39 = vsel %vm3106_vm5, %v3757_v62, %v9702_v38  ;;  %v3765_v29 = vrot.slane %v9704_v6, 3  ;;  %v3767_v35 = vrot.slane %v9705_v4, 2  ;;  %v9706_v58 = vld [vmem:[#allocation49_spill] sm:$0xff]  ;;  %v9707_v62 = vld [vmem:[#allocation22_spill] sm:$0xff] }
 0x314   :  { %v3752_v24 = vsel %vm3118_vm9, %v3751_v52, %v3750_v56  ;;  %v3760_v44 = vsel %vm3109_vm6, %v3759_v57, %v3758_v39  ;;  %v3769_v59 = vrot.slane %v8523_v40, 1  ;;  %v8559_v45 = vunpack.c.l.b16 %v9706_v58  ;;  %v6683_v6 = vld [vmem:[#allocation2 + $0x160] ss:$8 sps:$4 sm:$0xff]   ;;  %v9709_v58 = vld [vmem:[#allocation44_spill] sm:$0xff] }
 0x315   :  { %v3754_v51 = vsel %vm3121_vm10, %v3753_v9, %v3752_v24  ;;  %v3762_v21 = vsel %vm3112_vm7, %v3761_v16, %v3760_v44  ;;  %v8562_v38 = vunpack.c.l.b16 %v9707_v62  ;;  %3926 = vmatpush1.bf16.msra.mxu1 %v6680_v1  ;;  %v3771_v56 = vrot.slane %v8063_v60, 7  ;;  %v6688_v24 = vld [vmem:[#allocation2 + $0x174] ss:$8 sps:$4 sm:$0xff]  }
 0x316   :  { %v8565_v52 = vsel %vm3124_vm11, %v3755_v61, %v3754_v51  ;;  %v3764_v57 = vsel %vm3115_vm8, %v3763_v32, %v3762_v21  ;;  %v3773_v39 = vrot.slane %v8051_v27, 6  ;;  %3927 = vmatprep.subr.bf16.mxu1 %v6685_v26  ;;  %v3775_v44 = vrot.slane %v9649_v2, 5  ;;  %v9710_v61 = vld [vmem:[#allocation41_spill] sm:$0xff] }
 0x317   :  { %9708 = vst [vmem:[#allocation57_spill] sm:$0xff] %v8562_v38  ;;  %v3766_v9 = vsel %vm3118_vm9, %v3765_v29, %v3764_v57  ;;  %v3777_v16 = vrot.slane %v9650_v28, 4  ;;  %v3779_v1 = vrot.slane %v9709_v58, 3  ;;  %v3772_v51 = vsel %vm3106_vm5, %v3771_v56, %v9710_v61  ;;  %v9711_v21 = vld [vmem:[#allocation17_spill] sm:$0xff] }
 0x318   :  { %v3768_v62 = vsel %vm3121_vm10, %v3767_v35, %v3766_v9  ;;  %v3781_v32 = vrot.slane %v9711_v21, 2  ;;  %v3783_v60 = vrot.slane %v8559_v45, 1  ;;  %v9712_v26 = vpack.c.b16 %v8502_v53, %v8488_v15  ;;  %v6686_v9 = vld [vmem:[#allocation2 + $0x170] ss:$8 sps:$4 sm:$0xff]   ;;  %v6691_v53 = vld [vmem:[#allocation2 + $0x184] ss:$8 sps:$4 sm:$0xff]  }
 0x319   :  { %v8583_v29 = vsel %vm3124_vm11, %v3769_v59, %v3768_v62  ;;  %v3774_v57 = vsel %vm3109_vm6, %v3773_v39, %v3772_v51  ;;  %v3785_v58 = vrot.slane %v8115_v5, 7  ;;  %v3787_v35 = vrot.slane %v8113_v18, 6  ;;  %3928 = vmatpush1.bf16.msra.mxu1 %v6683_v6  ;;  %v9713_v51 = vld [vmem:[#allocation59_spill] sm:$0xff] }
 0x31a   :  { %3664 = vmatmul.mubr.bf16.gmra.mrb[60].mxu1 %v9712_v26  ;;  %v3776_v61 = vsel %vm3112_vm7, %v3775_v44, %v3774_v57  ;;  %v3789_v15 = vrot.slane %v8121_v23, 5  ;;  %v3791_v59 = vrot.slane %v8123_v8, 4  ;;  %3929 = vmatprep.subr.bf16.mxu1 %v6688_v24  ;;  %v3793_v6 = vrot.slane %v8125_v48, 3  ;;  %v9714_v57 = vld [vmem:[#allocation69_spill] sm:$0xff] }
 0x31b   :  { %3947 = vmatprep.mubr.bf16.mxu1 %v9635_v50  ;;  %v3778_v39 = vsel %vm3115_vm8, %v3777_v16, %v3776_v61  ;;  %v3786_v62 = vsel %vm3106_vm5, %v3785_v58, %v8109_v55  ;;  %v3795_v26 = vrot.slane %v9713_v51, 2  ;;  %v3797_v44 = vrot.slane %v8562_v38, 1  ;;  %v9715_v61 = vld [vmem:[#allocation73_spill] sm:$0xff] }
 0x31c   :  { %v3780_v5 = vsel %vm3118_vm9, %v3779_v1, %v3778_v39  ;;  %v3788_v56 = vsel %vm3109_vm6, %v3787_v35, %v3786_v62  ;;  %v8603_v23 = vunpack.c.l.b16 %v9714_v57  ;;  %v8608_v8 = vunpack.c.l.b16 %v9715_v61  ;;  %v6689_v58 = vld [vmem:[#allocation2 + $0x180] ss:$8 sps:$4 sm:$0xff]  }
 0x31d   :  { %v3782_v24 = vsel %vm3121_vm10, %v3781_v32, %v3780_v5  ;;  %v3790_v16 = vsel %vm3112_vm7, %v3789_v15, %v3788_v56  ;;  %v3799_v55 = vrot.slane %v8231_v11, 7  ;;  %3930 = vmatpush1.bf16.msra.mxu1 %v6686_v9  ;;  %v3801_v39 = vrot.slane %v8219_v36, 6  ;;  %v6694_v5 = vld [vmem:[#allocation2 + $0x194] ss:$8 sps:$4 sm:$0xff]  }
 0x31e   :  { %v8612_v1 = vsel %vm3124_vm11, %v3783_v60, %v3782_v24  ;;  %v3792_v35 = vsel %vm3115_vm8, %v3791_v59, %v3790_v16  ;;  %v3803_v62 = vrot.slane %v8225_v19, 5  ;;  %4245 = vmatprep.subr.bf16.mxu1 %v6691_v53  ;;  %v3805_v15 = vrot.slane %v8227_v37, 4  ;;  %v9716_v59 = vld [vmem:[#allocation40_spill] sm:$0xff] }
 0x31f   :  { %v3794_v32 = vsel %vm3118_vm9, %v3793_v6, %v3792_v35  ;;  %v3800_v56 = vsel %vm3106_vm5, %v3799_v55, %v8222_v13  ;;  %v3807_v9 = vrot.slane %v8237_v25, 3  ;;  %v3809_v24 = vrot.slane %v9716_v59, 2 }
 0x320   :  { %v3796_v60 = vsel %vm3121_vm10, %v3795_v26, %v3794_v32  ;;  %v3802_v57 = vsel %vm3109_vm6, %v3801_v39, %v3800_v56  ;;  %v3811_v16 = vrot.slane %v8603_v23, 1  ;;  %v9717_v53 = vpack.c.b16 %v8536_v42, %v8519_v43  ;;  %v6692_v26 = vld [vmem:[#allocation2 + $0x190] ss:$8 sps:$4 sm:$0xff]   ;;  %v9718_v56 = vld [vmem:[#allocation53_spill] sm:$0xff] }
 0x321   :  { %v8630_v6 = vsel %vm3124_vm11, %v3797_v44, %v3796_v60  ;;  %v3804_v13 = vsel %vm3112_vm7, %v3803_v62, %v3802_v57  ;;  %v3813_v61 = vrot.slane %v8280_v22, 7  ;;  %v3815_v55 = vrot.slane %v8286_v41, 6  ;;  %v6697_v44 = vld [vmem:[#allocation2 + $0x1a4] ss:$8 sps:$4 sm:$0xff]  }
 0x322   :  { %3948 = vmatmul.mubr.bf16.vlgmr.msra.gmra.mrb[48].mxu1 %v9717_v53  ;;  %v3806_v39 = vsel %vm3115_vm8, %v3805_v15, %v3804_v13  ;;  %v3817_v43 = vrot.slane %v8288_v33, 5  ;;  %v3819_v42 = vrot.slane %v8300_v49, 4  ;;  %v3823_v60 = vrot.slane %v9718_v56, 2  ;;  %v9719_v13 = vld [vmem:[#allocation23_spill] sm:$0xff] }
 0x323   :  { %4246 = vmatpush1.bf16.msra.mxu1 %v6689_v58  ;;  %3957 = vmatprep.mubr.bf16.mxu1 %v9635_v50  ;;  %v3808_v62 = vsel %vm3118_vm9, %v3807_v9, %v3806_v39  ;;  %v3814_v32 = vsel %vm3106_vm5, %v3813_v61, %v8278_v14  ;;  %v3821_v58 = vrot.slane %v8302_v7, 3  ;;  %v3825_v15 = vrot.slane %v8608_v8, 1 }
 0x324   :  { %4247 = vmatprep.subr.bf16.mxu1 %v6694_v5  ;;  %v3810_v57 = vsel %vm3121_vm10, %v3809_v24, %v3808_v62  ;;  %v3816_v53 = vsel %vm3109_vm6, %v3815_v55, %v3814_v32  ;;  %v9720_v35 = vrot.slane %v9662_v12, 7  ;;  %v9721_v61 = vrot.slane %v9663_v47, 6  ;;  %v6695_v55 = vld [vmem:[#allocation2 + $0x1a0] ss:$8 sps:$4 sm:$0xff]  }
 0x325   :  { %v8654_v9 = vsel %vm3124_vm11, %v3811_v16, %v3810_v57  ;;  %v3818_v14 = vsel %vm3112_vm7, %v3817_v43, %v3816_v53  ;;  %v4049_v24 = vrot.slane %v9664_v17, 5  ;;  %v4051_v32 = vrot.slane %v9665_v54, 4  ;;  %v9722_v12 = vld [vmem:[#allocation38_spill] sm:$0xff]  ;;  %v6700_v43 = vld [vmem:[#allocation2 + $0x1b4] ss:$8 sps:$4 sm:$0xff]  }
 0x326   :  { %v4046_v5 = vsel %vm3106_vm5, %v9720_v35, %v9719_v13  ;;  %v3820_v62 = vsel %vm3115_vm8, %v3819_v42, %v3818_v14  ;;  %v9723_v35 = vrot.slane %v9667_v3, 7  ;;  %v4063_v57 = vrot.slane %v9669_v46, 5  ;;  %v9724_v13 = vld [vmem:[#allocation47_spill] sm:$0xff] }
 0x327   :  { %v4048_v39 = vsel %vm3109_vm6, %v9721_v61, %v4046_v5  ;;  %4248 = vmatpush1.bf16.msra.mxu1 %v6692_v26  ;;  %v3822_v47 = vsel %vm3118_vm9, %v3821_v58, %v3820_v62  ;;  %v9725_v26 = vrot.slane %v9724_v13, 6  ;;  %v4065_v42 = vrot.slane %v9670_v63, 4 }
 0x328   :  { %v4060_v16 = vsel %vm3106_vm5, %v9723_v35, %v9722_v12  ;;  %4249 = vmatprep.subr.bf16.mxu1 %v6697_v44  ;;  %v4050_v53 = vsel %vm3112_vm7, %v4049_v24, %v4048_v39  ;;  %v3824_v14 = vsel %vm3121_vm10, %v3823_v60, %v3822_v47  ;;  %v9726_v12 = vld [vmem:[#allocation78_spill] sm:$0xff]  ;;  %v9728_v58 = vpack.c.b16 %v8583_v29, %v8565_v52  ;;  %v9729_v24 = vld [vmem:[#allocation31_spill] sm:$0xff]  ;;  %v9733_v29 = vld [vmem:[#allocation32_spill] sm:$0xff] }
 0x329   :  { %v4062_v5 = vsel %vm3109_vm6, %v9725_v26, %v4060_v16  ;;  %v4052_v3 = vsel %vm3115_vm8, %v4051_v32, %v4050_v53  ;;  %v9727_v35 = vld [vmem:[#allocation10_spill] sm:$0xff]  ;;  %v8683_v39 = vsel %vm3124_vm11, %v3825_v15, %v3824_v14  ;;  %v9730_v62 = vrot.slane %v9729_v24, 3  ;;  %v9732_v32 = vld [vmem:[#allocation11_spill] sm:$0xff]  ;;  %v9735_v26 = vld [vmem:[#allocation60_spill] sm:$0xff] }
 0x32a   :  { %v4064_v61 = vsel %vm3112_vm7, %v4063_v57, %v4062_v5  ;;  %v2714_v44 = vadd.f32 %v9727_v35, %v9726_v12  ;;  %3958 = vmatmul.mubr.bf16.gmra.mrb[52].mxu1 %v9728_v58  ;;  %v9731_v47 = vld [vmem:[#allocation94_spill] sm:$0xff]  ;;  %v6698_v57 = vld [vmem:[#allocation2 + $0x1b0] ss:$8 sps:$4 sm:$0xff]   ;;  %v9734_v13 = vrot.slane %v9733_v29, 2  ;;  %v9736_v5 = vrot.slane %v9735_v26, 3  ;;  %v9739_v52 = vld [vmem:[#allocation65_spill] sm:$0xff] }
 0x32b   :  { %v4054_v16 = vsel %vm3118_vm9, %v9730_v62, %v4052_v3  ;;  %v4066_v60 = vsel %vm3115_vm8, %v4065_v42, %v4064_v61  ;;  %v2726_v53 = vadd.f32 %v9732_v32, %v9731_v47  ;;  %4250 = vmatpush1.bf16.msra.mxu1 %v6695_v55  ;;  %3967 = vmatprep.mubr.bf16.mxu1 %v9635_v50  ;;  %v6703_v42 = vld [vmem:[#allocation2 + $0x1c4] ss:$8 sps:$4 sm:$0xff]   ;;  %v9738_v12 = vrot.slane %v9696_v34, 2  ;;  %v6706_v34 = vld [vmem:[#allocation2 + $0x1d4] ss:$8 sps:$4 sm:$0xff]  }
 0x32c   :  { %v4056_v15 = vsel %vm3121_vm10, %v9734_v13, %v4054_v16  ;;  %v4068_v14 = vsel %vm3118_vm9, %v9736_v5, %v4066_v60  ;;  %v2810_v3 = vmax.f32 %v2714_v44, 0.0  ;;  %4251 = vmatprep.subr.bf16.mxu1 %v6700_v43  ;;  %v9737_v61 = vld [vmem:[#allocation33_spill] sm:$0xff]  ;;  %v4073_v47 = vrot.slane %v7888_v10, 7  ;;  %v9741_v5 = vld [vmem:[#allocation71_spill] sm:$0xff] }
 0x32d   :  { %v8702_v55 = vsel %vm3124_vm11, %v9737_v61, %v4056_v15  ;;  %v4070_v58 = vsel %vm3121_vm10, %v9738_v12, %v4068_v14  ;;  %v2822_v62 = vmax.f32 %v2726_v53, 0.0  ;;  %v4075_v43 = vrot.slane %v7894_v31, 6  ;;  %v6701_v61 = vld [vmem:[#allocation2 + $0x1c0] ss:$8 sps:$4 sm:$0xff]   ;;  %v9743_v10 = vld [vmem:[#allocation55_spill] sm:$0xff] }
 0x32e   :  { %v8710_v16 = vsel %vm3124_vm11, %v9739_v52, %v4070_v58  ;;  %v8712_v13 = vpack.c.bf16 %v2810_v3, %v2810_v3  ;;  %v4077_v44 = vrot.slane %v7890_v20, 5  ;;  %v4074_v53 = vsel %vm3106_vm5, %v4073_v47, %v9741_v5  ;;  %v9742_v12 = vld [vmem:[#allocation85_spill] sm:$0xff]  ;;  %v9745_v5 = vld [vmem:[#allocation90_spill] sm:$0xff] }
 0x32f   :  { %v8718_v15 = vpack.c.bf16 %v2822_v62, %v2822_v62  ;;  %v4079_v14 = vrot.slane %v7899_v0, 4  ;;  %4252 = vmatpush1.bf16.msra.mxu1 %v6698_v57  ;;  %v4076_v3 = vsel %vm3109_vm6, %v4075_v43, %v4074_v53  ;;  %v4081_v58 = vrot.slane %v9742_v12, 3  ;;  %v9744_v26 = vld [vmem:[#allocation89_spill] sm:$0xff] }
 0x330   :  { %v9470_v52 = vunpack.c.l.b16 %v8712_v13  ;;  %v4083_v20 = vrot.slane %v9743_v10, 2  ;;  %4253 = vmatprep.subr.bf16.mxu1 %v6703_v42  ;;  %v4078_v60 = vsel %vm3112_vm7, %v4077_v44, %v4076_v3  ;;  %v4087_v47 = vrot.slane %v9744_v26, 7  ;;  %v9746_v53 = vld [vmem:[#allocation93_spill] sm:$0xff]  ;;  %v9748_v44 = vld [vmem:[#allocation88_spill] sm:$0xff] }
 0x331   :  { %9740 = vst [vmem:[#allocation75_spill] sm:$0xff] %v8718_v15  ;;  %v4089_v0 = vrot.slane %v9745_v5, 6  ;;  %v4080_v57 = vsel %vm3115_vm8, %v4079_v14, %v4078_v60  ;;  %v4091_v43 = vrot.slane %v9703_v30, 5  ;;  %v4093_v12 = vrot.slane %v9746_v53, 4  ;;  %v6704_v14 = vld [vmem:[#allocation2 + $0x1d0] ss:$8 sps:$4 sm:$0xff]  }
 0x332   :  { %v4085_v29 = vrot.slane %v9470_v52, 1  ;;  %v9747_v42 = vpack.c.b16 %v8630_v6, %v8612_v1  ;;  %v4082_v62 = vsel %vm3118_vm9, %v4081_v58, %v4080_v57  ;;  %v4088_v3 = vsel %vm3106_vm5, %v4087_v47, %v9748_v44  ;;  %v6709_v47 = vld [vmem:[#allocation2 + $0x1e4] ss:$8 sps:$4 sm:$0xff]  }
 0x333   :  { %v4095_v26 = vrot.slane %v9705_v4, 3  ;;  %v4097_v60 = vrot.slane %v8523_v40, 2  ;;  %4254 = vmatpush1.bf16.msra.mxu1 %v6701_v61  ;;  %v4084_v52 = vsel %vm3121_vm10, %v4083_v20, %v4082_v62  ;;  %v4090_v53 = vsel %vm3109_vm6, %v4089_v0, %v4088_v3  ;;  %v9751_v44 = vld [vmem:[#allocation58_spill] sm:$0xff] }
 0x334   :  { %3968 = vmatmul.mubr.bf16.gmra.mrb[56].mxu1 %v9747_v42  ;;  %v9749_v1 = vunpack.c.l.b16 %v8718_v15  ;;  %v9750_v42 = vld [vmem:[#allocation45_spill] sm:$0xff]  ;;  %4255 = vmatprep.subr.bf16.mxu1 %v6706_v34  ;;  %v8752_v57 = vsel %vm3124_vm11, %v4085_v29, %v4084_v52  ;;  %v4092_v61 = vsel %vm3112_vm7, %v4091_v43, %v4090_v53  ;;  %v2750_v40 = vadd.f32 %v9732_v32, %v9751_v44  ;;  %v9752_v15 = vld [vmem:[#allocation14_spill] sm:$0xff]  ;;  %v9753_v52 = vld [vmem:[#allocation44_spill] sm:$0xff] }
 0x335   :  { %3977 = vmatprep.mubr.bf16.mxu1 %v9635_v50  ;;  %v2738_v58 = vadd.f32 %v9727_v35, %v9750_v42  ;;  %v4101_v20 = vrot.slane %v8051_v27, 7  ;;  %v4094_v0 = vsel %vm3115_vm8, %v4093_v12, %v4092_v61  ;;  %v4103_v3 = vrot.slane %v9649_v2, 6  ;;  %v6707_v53 = vld [vmem:[#allocation2 + $0x1e0] ss:$8 sps:$4 sm:$0xff]   ;;  %v6712_v61 = vld [vmem:[#allocation2 + $0x1f4] ss:$8 sps:$4 sm:$0xff]  }
 0x336   :  { %v4099_v6 = vrot.slane %v9749_v1, 1  ;;  %v4105_v1 = vrot.slane %v9650_v28, 5  ;;  %v4096_v34 = vsel %vm3118_vm9, %v4095_v26, %v4094_v0  ;;  %v2846_v42 = vmax.f32 %v2750_v40, 0.0 }
 0x337   :  { %v2834_v62 = vmax.f32 %v2738_v58, 0.0  ;;  %v4102_v29 = vsel %vm3106_vm5, %v4101_v20, %v9752_v15  ;;  %v4107_v43 = vrot.slane %v9753_v52, 4  ;;  %4256 = vmatpush1.bf16.msra.mxu1 %v6704_v14  ;;  %v4098_v44 = vsel %vm3121_vm10, %v4097_v60, %v4096_v34 }
 0x338   :  { %v4104_v12 = vsel %vm3109_vm6, %v4103_v3, %v4102_v29  ;;  %v4109_v58 = vrot.slane %v9711_v21, 3  ;;  %4257 = vmatprep.subr.bf16.mxu1 %v6709_v47  ;;  %v8771_v26 = vsel %vm3124_vm11, %v4099_v6, %v4098_v44  ;;  %v8773_v40 = vpack.c.bf16 %v2846_v42, %v2846_v42  ;;  %v9757_v42 = vld [vmem:[#allocation56_spill] sm:$0xff] }
 0x339   :  { %v8766_v27 = vpack.c.bf16 %v2834_v62, %v2834_v62  ;;  %v4106_v15 = vsel %vm3112_vm7, %v4105_v1, %v4104_v12  ;;  %v4111_v14 = vrot.slane %v8559_v45, 2  ;;  %v4115_v62 = vrot.slane %v8113_v18, 7  ;;  %v9756_v1 = vld [vmem:[#allocation18_spill] sm:$0xff]  ;;  %v6710_v44 = vld [vmem:[#allocation2 + $0x1f0] ss:$8 sps:$4 sm:$0xff]  }
 0x33a   :  { %9754 = vst [vmem:[#allocation62_spill] sm:$0xff] %v8773_v40  ;;  %v4108_v0 = vsel %vm3115_vm8, %v4107_v43, %v4106_v15  ;;  %v9755_v47 = vpack.c.b16 %v8683_v39, %v8654_v9  ;;  %v9477_v6 = vunpack.c.l.b16 %v8773_v40  ;;  %v4117_v34 = vrot.slane %v9756_v1, 6  ;;  %v9758_v15 = vld [vmem:[#allocation51_spill] sm:$0xff] }
 0x33b   :  { %v9474_v20 = vunpack.c.l.b16 %v8766_v27  ;;  %v4110_v3 = vsel %vm3118_vm9, %v4109_v58, %v4108_v0  ;;  %v4119_v29 = vrot.slane %v9757_v42, 5  ;;  %4258 = vmatpush1.bf16.msra.mxu1 %v6707_v53  ;;  %v4116_v9 = vsel %vm3106_vm5, %v4115_v62, %v9758_v15  ;;  %v6715_v58 = vld [vmem:[#allocation2 + $0x204] ss:$8 sps:$4 sm:$0xff]  }
 0x33c   :  { %3978 = vmatmul.mubr.bf16.gmra.mrb[60].mxu1 %v9755_v47  ;;  %v4112_v43 = vsel %vm3121_vm10, %v4111_v14, %v4110_v3  ;;  %v4121_v39 = vrot.slane %v8125_v48, 4  ;;  %4259 = vmatprep.subr.bf16.mxu1 %v6712_v61  ;;  %v4118_v0 = vsel %vm3109_vm6, %v4117_v34, %v4116_v9  ;;  %v4123_v47 = vrot.slane %v9713_v51, 3  ;;  %v9760_v15 = vld [vmem:[#allocation70_spill] sm:$0xff] }
 0x33d   :  { %4277 = vmatprep.mubr.bf16.mxu1 %v9635_v50  ;;  %v4113_v12 = vrot.slane %v9474_v20, 1  ;;  %v4125_v53 = vrot.slane %v8562_v38, 2  ;;  %v4127_v60 = vrot.slane %v9477_v6, 1  ;;  %v4120_v3 = vsel %vm3112_vm7, %v4119_v29, %v4118_v0  ;;  %v9759_v20 = vld [vmem:[#allocation36_spill] sm:$0xff]  ;;  %v6713_v6 = vld [vmem:[#allocation2 + $0x200] ss:$8 sps:$4 sm:$0xff]  }
 0x33e   :  { %v2762_v62 = vadd.f32 %v9727_v35, %v9759_v20  ;;  %v2774_v61 = vadd.f32 %v9732_v32, %v9760_v15  ;;  %v4122_v34 = vsel %vm3115_vm8, %v4121_v39, %v4120_v3  ;;  %v4129_v9 = vrot.slane %v8219_v36, 7  ;;  %v6718_v35 = vld [vmem:[#allocation2 + $0x214] ss:$8 sps:$4 sm:$0xff]  }
 0x33f   :  { %v8802_v14 = vsel %vm3124_vm11, %v4113_v12, %v4112_v43  ;;  %v4131_v38 = vrot.slane %v8225_v19, 6  ;;  %v4133_v40 = vrot.slane %v8227_v37, 5  ;;  %4260 = vmatpush1.bf16.msra.mxu1 %v6710_v44  ;;  %v4124_v43 = vsel %vm3118_vm9, %v4123_v47, %v4122_v34  ;;  %v6716_v34 = vld [vmem:[#allocation2 + $0x210] ss:$8 sps:$4 sm:$0xff]  }
 0x340   :  { %v2858_v12 = vmax.f32 %v2762_v62, 0.0  ;;  %v2870_v29 = vmax.f32 %v2774_v61, 0.0  ;;  %v4135_v0 = vrot.slane %v8237_v25, 4  ;;  %4575 = vmatprep.subr.bf16.mxu1 %v6715_v58  ;;  %v4126_v32 = vsel %vm3121_vm10, %v4125_v53, %v4124_v43  ;;  %v6721_v43 = vld [vmem:[#allocation2 + $0x224] ss:$8 sps:$4 sm:$0xff]  }
 0x341   :  { %v4130_v20 = vsel %vm3106_vm5, %v4129_v9, %v8231_v11  ;;  %v4137_v39 = vrot.slane %v9716_v59, 3  ;;  %v4139_v3 = vrot.slane %v8603_v23, 2  ;;  %v8821_v44 = vsel %vm3124_vm11, %v4127_v60, %v4126_v32 }
 0x342   :  { %v8823_v15 = vpack.c.bf16 %v2858_v12, %v2858_v12  ;;  %v8825_v47 = vpack.c.bf16 %v2870_v29, %v2870_v29  ;;  %v4132_v62 = vsel %vm3109_vm6, %v4131_v38, %v4130_v20  ;;  %v9761_v58 = vpack.c.b16 %v8710_v16, %v8702_v55 }
 0x343   :  { %v4159_v11 = vpack.c.b16 %v8821_v44, %v8802_v14  ;;  %v4134_v53 = vsel %vm3112_vm7, %v4133_v40, %v4132_v62  ;;  %v4143_v61 = vrot.slane %v8286_v41, 7  ;;  %v4145_v60 = vrot.slane %v8288_v33, 6 }
 0x344   :  { %4278 = vmatmul.mubr.bf16.vlgmr.msra.gmra.mrb[48].mxu1 %v9761_v58  ;;  %v9479_v9 = vunpack.c.l.b16 %v8823_v15  ;;  %v9478_v38 = vunpack.c.l.b16 %v8825_v47  ;;  %v4136_v55 = vsel %vm3115_vm8, %v4135_v0, %v4134_v53  ;;  %v4147_v16 = vrot.slane %v8300_v49, 5  ;;  %v9762_v58 = vld [vmem:[#allocation30_spill] sm:$0xff] }
 0x345   :  { %4576 = vmatpush1.bf16.msra.mxu1 %v6713_v6  ;;  %4287 = vmatprep.mubr.bf16.mxu1 %v9635_v50  ;;  %v4138_v40 = vsel %vm3118_vm9, %v4137_v39, %v4136_v55  ;;  %v4144_v12 = vsel %vm3106_vm5, %v4143_v61, %v8280_v22  ;;  %v4149_v6 = vrot.slane %v8302_v7, 4  ;;  %v4151_v29 = vrot.slane %v9718_v56, 3 }
 0x346   :  { %4577 = vmatprep.subr.bf16.mxu1 %v6718_v35  ;;  %v4140_v32 = vsel %vm3121_vm10, %v4139_v3, %v4138_v40  ;;  %v4141_v20 = vrot.slane %v9479_v9, 1  ;;  %v4146_v0 = vsel %vm3109_vm6, %v4145_v60, %v4144_v12  ;;  %v4153_v62 = vrot.slane %v8608_v8, 2  ;;  %v6719_v3 = vld [vmem:[#allocation2 + $0x220] ss:$8 sps:$4 sm:$0xff]  }
 0x347   :  { %v4148_v35 = vsel %vm3112_vm7, %v4147_v16, %v4146_v0  ;;  %v4155_v39 = vrot.slane %v9478_v38, 1  ;;  %v9763_v22 = vrot.slane %v9664_v17, 6  ;;  %v4379_v61 = vrot.slane %v9665_v54, 5  ;;  %v9764_v40 = vld [vmem:[#allocation54_spill] sm:$0xff]  ;;  %v6724_v17 = vld [vmem:[#allocation2 + $0x234] ss:$8 sps:$4 sm:$0xff]  }
 0x348   :  { %v8860_v55 = vsel %vm3124_vm11, %v4141_v20, %v4140_v32  ;;  %v4150_v60 = vsel %vm3115_vm8, %v4149_v6, %v4148_v35  ;;  %v9765_v16 = vrot.slane %v9669_v46, 6  ;;  %v4393_v0 = vrot.slane %v9670_v63, 5  ;;  %v9768_v32 = vld [vmem:[#allocation95_spill] sm:$0xff]  ;;  %v9769_v20 = vld [vmem:[#allocation13_spill] sm:$0xff] }
 0x349   :  { %v4378_v53 = vsel %vm3109_vm6, %v9763_v22, %v9762_v58  ;;  %4578 = vmatpush1.bf16.msra.mxu1 %v6716_v34  ;;  %v4152_v58 = vsel %vm3118_vm9, %v4151_v29, %v4150_v60  ;;  %v9766_v34 = vld [vmem:[#allocation81_spill] sm:$0xff]  ;;  %v9767_v22 = vld [vmem:[#allocation12_spill] sm:$0xff]  ;;  %v2727_v9 = vadd.f32 %v9769_v20, %v9768_v32  ;;  %v9770_v46 = vrot.slane %v9729_v24, 4 }
 0x34a   :  { %v4392_v12 = vsel %vm3109_vm6, %v9765_v16, %v9764_v40  ;;  %4579 = vmatprep.subr.bf16.mxu1 %v6721_v43  ;;  %v4380_v54 = vsel %vm3112_vm7, %v4379_v61, %v4378_v53  ;;  %v2715_v38 = vadd.f32 %v9767_v22, %v9766_v34  ;;  %v4154_v6 = vsel %vm3121_vm10, %v4153_v62, %v4152_v58  ;;  %v9772_v61 = vld [vmem:[#allocation32_spill] sm:$0xff]  ;;  %v6727_v32 = vld [vmem:[#allocation2 + $0x244] ss:$8 sps:$4 sm:$0xff]  }
 0x34b   :  { %v4382_v35 = vsel %vm3115_vm8, %v9770_v46, %v4380_v54  ;;  %v4394_v63 = vsel %vm3112_vm7, %v4393_v0, %v4392_v12  ;;  %v4403_v43 = vrot.slane %v7894_v31, 7  ;;  %v9771_v29 = vpack.c.b16 %v8771_v26, %v8752_v57  ;;  %v9774_v62 = vld [vmem:[#allocation60_spill] sm:$0xff]  ;;  %v9776_v57 = vld [vmem:[#allocation34_spill] sm:$0xff] }
 0x34c   :  { %v8884_v53 = vsel %vm3124_vm11, %v4155_v39, %v4154_v6  ;;  %v9773_v60 = vrot.slane %v9772_v61, 3  ;;  %v9775_v16 = vrot.slane %v9774_v62, 4  ;;  %v2811_v58 = vmax.f32 %v2715_v38, 0.0  ;;  %v6722_v12 = vld [vmem:[#allocation2 + $0x230] ss:$8 sps:$4 sm:$0xff]   ;;  %v9777_v39 = vld [vmem:[#allocation61_spill] sm:$0xff] }
 0x34d   :  { %4288 = vmatmul.mubr.bf16.gmra.mrb[52].mxu1 %v9771_v29  ;;  %v4160_v31 = vpack.c.b16 %v8884_v53, %v8860_v55  ;;  %v9778_v0 = vrot.slane %v9777_v39, 3  ;;  %v2823_v34 = vmax.f32 %v2727_v9, 0.0  ;;  %v9779_v6 = vld [vmem:[#allocation35_spill] sm:$0xff]  ;;  %v9782_v61 = vld [vmem:[#allocation68_spill] sm:$0xff]  ;;  %v9783_v62 = vld [vmem:[#allocation77_spill] sm:$0xff]  ;;  %v4431_v44 = vrot.slane %v9649_v2, 7 }
 0x34e   :  { %v4384_v40 = vsel %vm3118_vm9, %v9773_v60, %v4382_v35  ;;  %v4396_v24 = vsel %vm3115_vm8, %v9775_v16, %v4394_v63  ;;  %4580 = vmatpush1.bf16.msra.mxu1 %v6719_v3  ;;  %4297 = vmatprep.mubr.bf16.mxu1 %v9635_v50  ;;  %v9780_v3 = vld [vmem:[#allocation66_spill] sm:$0xff]  ;;  %v4336_v35 = vpack.c.bf16 %v2811_v58, %v2811_v58  ;;  %v9781_v63 = vld [vmem:[#allocation76_spill] sm:$0xff]  ;;  %v4405_v9 = vrot.slane %v9783_v62, 6  ;;  %v9787_v62 = vld [vmem:[#allocation93_spill] sm:$0xff] }
 0x34f   :  { %v4386_v26 = vsel %vm3121_vm10, %v9776_v57, %v4384_v40  ;;  %v4398_v54 = vsel %vm3118_vm9, %v9778_v0, %v4396_v24  ;;  %4581 = vmatprep.subr.bf16.mxu1 %v6724_v17  ;;  %v4404_v29 = vsel %vm3106_vm5, %v4403_v43, %v9781_v63  ;;  %v4337_v40 = vpack.c.bf16 %v2823_v34, %v2823_v34  ;;  %v9784_v17 = vld [vmem:[#allocation80_spill] sm:$0xff]  ;;  %v6725_v0 = vld [vmem:[#allocation2 + $0x240] ss:$8 sps:$4 sm:$0xff]  }
 0x350   :  { %v8902_v38 = vsel %vm3124_vm11, %v9779_v6, %v4386_v26  ;;  %v4400_v46 = vsel %vm3121_vm10, %v9780_v3, %v4398_v54  ;;  %v4407_v16 = vrot.slane %v9784_v17, 5  ;;  %v4369_v57 = vunpack.c.l.b16 %v4336_v35  ;;  %v9785_v26 = vld [vmem:[#allocation85_spill] sm:$0xff]  ;;  %v9797_v53 = vld [vmem:[#allocation62_spill] sm:$0xff] }
 0x351   :  { %v8910_v60 = vsel %vm3124_vm11, %v9782_v61, %v4400_v46  ;;  %v4409_v39 = vrot.slane %v9785_v26, 4  ;;  %v4411_v58 = vrot.slane %v9743_v10, 3  ;;  %v4370_v43 = vunpack.c.l.b16 %v4337_v40  ;;  %v6730_v46 = vld [vmem:[#allocation2 + $0x254] ss:$8 sps:$4 sm:$0xff]  }
 0x352   :  { %v4487_v24 = vpack.c.b16 %v8910_v60, %v8902_v38  ;;  %4582 = vmatpush1.bf16.msra.mxu1 %v6722_v12  ;;  %v4406_v54 = vsel %vm3109_vm6, %v4405_v9, %v4404_v29  ;;  %v9786_v6 = vunpack.c.l.b16 %v8712_v13  ;;  %v4417_v3 = vrot.slane %v9745_v5, 7  ;;  %v9788_v12 = vld [vmem:[#allocation89_spill] sm:$0xff]  ;;  %v9789_v13 = vld [vmem:[#allocation74_spill] sm:$0xff] }
 0x353   :  { %4583 = vmatprep.subr.bf16.mxu1 %v6727_v32  ;;  %v4408_v63 = vsel %vm3112_vm7, %v4407_v16, %v4406_v54  ;;  %v4415_v61 = vrot.slane %v4369_v57, 1  ;;  %v4419_v35 = vrot.slane %v9703_v30, 6  ;;  %v4421_v17 = vrot.slane %v9787_v62, 5  ;;  %v9790_v30 = vld [vmem:[#allocation75_spill] sm:$0xff]  ;;  %v9794_v62 = vld [vmem:[#allocation6_spill] sm:$0xff] }
 0x354   :  { %v4413_v34 = vrot.slane %v9786_v6, 2  ;;  %v4410_v10 = vsel %vm3115_vm8, %v4409_v39, %v4408_v63  ;;  %v4418_v40 = vsel %vm3106_vm5, %v4417_v3, %v9788_v12  ;;  %v4423_v29 = vrot.slane %v9705_v4, 4  ;;  %v6728_v39 = vld [vmem:[#allocation2 + $0x250] ss:$8 sps:$4 sm:$0xff]  }
 0x355   :  { %v4425_v9 = vrot.slane %v9789_v13, 3  ;;  %4298 = vmatmul.mubr.bf16.gmra.mrb[56].mxu1 %v4159_v11  ;;  %v4412_v5 = vsel %vm3118_vm9, %v4411_v58, %v4410_v10  ;;  %v4420_v32 = vsel %vm3109_vm6, %v4419_v35, %v4418_v40  ;;  %v9791_v16 = vunpack.c.l.b16 %v9790_v30  ;;  %v9792_v6 = vld [vmem:[#allocation16_spill] sm:$0xff]  ;;  %v6733_v11 = vld [vmem:[#allocation2 + $0x264] ss:$8 sps:$4 sm:$0xff]   ;;  %v6731_v40 = vld [vmem:[#allocation2 + $0x260] ss:$8 sps:$4 sm:$0xff]  }
 0x356   :  { %v4429_v26 = vrot.slane %v4370_v43, 1  ;;  %4584 = vmatpush1.bf16.msra.mxu1 %v6725_v0  ;;  %4307 = vmatprep.mubr.bf16.mxu1 %v9635_v50  ;;  %v4414_v4 = vsel %vm3121_vm10, %v4413_v34, %v4412_v5  ;;  %v4422_v54 = vsel %vm3112_vm7, %v4421_v17, %v4420_v32  ;;  %v2739_v14 = vadd.f32 %v9767_v22, %v9792_v6  ;;  %v9793_v0 = vld [vmem:[#allocation20_spill] sm:$0xff] }
 0x357   :  { %v4427_v57 = vrot.slane %v9791_v16, 2  ;;  %4585 = vmatprep.subr.bf16.mxu1 %v6730_v46  ;;  %v8944_v58 = vsel %vm3124_vm11, %v4415_v61, %v4414_v4  ;;  %v4424_v43 = vsel %vm3115_vm8, %v4423_v29, %v4422_v54  ;;  %v2751_v3 = vadd.f32 %v9769_v20, %v9793_v0  ;;  %v6736_v5 = vld [vmem:[#allocation2 + $0x274] ss:$8 sps:$4 sm:$0xff]   ;;  %v9799_v0 = vld [vmem:[#allocation37_spill] sm:$0xff] }
 0x358   :  { %v4433_v63 = vrot.slane %v9650_v28, 6  ;;  %v4426_v34 = vsel %vm3118_vm9, %v4425_v9, %v4424_v43  ;;  %v2835_v35 = vmax.f32 %v2739_v14, 0.0  ;;  %v4432_v17 = vsel %vm3106_vm5, %v4431_v44, %v9794_v62  ;;  %v6734_v14 = vld [vmem:[#allocation2 + $0x270] ss:$8 sps:$4 sm:$0xff]  }
 0x359   :  { %v4435_v2 = vrot.slane %v9753_v52, 5  ;;  %v4428_v46 = vsel %vm3121_vm10, %v4427_v57, %v4426_v34  ;;  %v2847_v10 = vmax.f32 %v2751_v3, 0.0  ;;  %v4437_v12 = vrot.slane %v9711_v21, 4  ;;  %v9800_v3 = vld [vmem:[#allocation52_spill] sm:$0xff] }
 0x35a   :  { %v4434_v61 = vsel %vm3109_vm6, %v4433_v63, %v4432_v17  ;;  %4586 = vmatpush1.bf16.msra.mxu1 %v6728_v39  ;;  %v8958_v29 = vsel %vm3124_vm11, %v4429_v26, %v4428_v46  ;;  %v4338_v28 = vpack.c.bf16 %v2835_v35, %v2835_v35  ;;  %v4439_v9 = vrot.slane %v8559_v45, 3 }
 0x35b   :  { %v4436_v13 = vsel %vm3112_vm7, %v4435_v2, %v4434_v61  ;;  %4587 = vmatprep.subr.bf16.mxu1 %v6733_v11  ;;  %v4488_v52 = vpack.c.b16 %v8958_v29, %v8944_v58  ;;  %v4339_v32 = vpack.c.bf16 %v2847_v10, %v2847_v10  ;;  %v9795_v21 = vunpack.c.l.b16 %v8766_v27  ;;  %v6738_v58 = vld [vmem:[%s9375_s5 + $0x48] sm:$0xff]   ;;  %v6740_v29 = vld [vmem:[%s9375_s5 + $0x58] sm:$0xff]  }
 0x35c   :  { %v4438_v30 = vsel %vm3115_vm8, %v4437_v12, %v4436_v13  ;;  %v4371_v57 = vunpack.c.l.b16 %v4338_v28  ;;  %v4445_v39 = vrot.slane %v9756_v1, 7  ;;  %v4447_v4 = vrot.slane %v9757_v42, 6  ;;  %v9796_v42 = vld [vmem:[#allocation57_spill] sm:$0xff] }
 0x35d   :  { %v4441_v16 = vrot.slane %v9795_v21, 2  ;;  %v4440_v26 = vsel %vm3118_vm9, %v4439_v9, %v4438_v30  ;;  %4308 = vmatmul.mubr.bf16.gmra.mrb[60].mxu1 %v4160_v31  ;;  %v4372_v45 = vunpack.c.l.b16 %v4339_v32  ;;  %v4449_v6 = vrot.slane %v8125_v48, 5 }
 0x35e   :  { %4588 = vmatpush1.bf16.msra.mxu1 %v6731_v40  ;;  %4607 = vmatprep.mubr.bf16.mxu1 %v9635_v50  ;;  %v4443_v27 = vrot.slane %v4371_v57, 1  ;;  %v4446_v44 = vsel %vm3106_vm5, %v4445_v39, %v8113_v18  ;;  %v4451_v1 = vrot.slane %v9713_v51, 4  ;;  %v4453_v11 = vrot.slane %v9796_v42, 3  ;;  %v6088_v42 = vld [vmem:[%s9374_s4] ss:$0 sm:$0xff] }
 0x35f   :  { %v4442_v54 = vsel %vm3121_vm10, %v4441_v16, %v4440_v26  ;;  %4589 = vmatprep.subr.bf16.mxu1 %v6736_v5  ;;  %v4448_v55 = vsel %vm3109_vm6, %v4447_v4, %v4446_v44  ;;  %v9798_v31 = vunpack.c.l.b16 %v9797_v53  ;;  %v2763_v48 = vadd.f32 %v9767_v22, %v9799_v0  ;;  %v6743_v44 = vld [vmem:[%s9375_s5 + $0x70] sm:$0xff]  }
 0x360   :  { %v2775_v63 = vadd.f32 %v9769_v20, %v9800_v3  ;;  %v4450_v34 = vsel %vm3112_vm7, %v4449_v6, %v4448_v55  ;;  %v4457_v35 = vrot.slane %v4372_v45, 1  ;;  %v4459_v18 = vrot.slane %v8225_v19, 7  ;;  %v9803_v55 = vld [vmem:[#allocation9_spill] sm:$0xff] }
 0x361   :  { %v4455_v43 = vrot.slane %v9798_v31, 2  ;;  %v4461_v51 = vrot.slane %v8227_v37, 6  ;;  %v4452_v62 = vsel %vm3115_vm8, %v4451_v1, %v4450_v34  ;;  %v2859_v17 = vmax.f32 %v2763_v48, 0.0  ;;  %v6744_v1 = vld [vmem:[%s9375_s5 + $0x78] sm:$0xff]  }
 0x362   :  { %v2871_v2 = vmax.f32 %v2775_v63, 0.0  ;;  %v4463_v46 = vrot.slane %v8237_v25, 5  ;;  %4590 = vmatpush1.bf16.msra.mxu1 %v6734_v14  ;;  %v4454_v10 = vsel %vm3118_vm9, %v4453_v11, %v4452_v62  ;;  %v4460_v22 = vsel %vm3106_vm5, %v4459_v18, %v8219_v36  ;;  %v6737_v14 = vld [vmem:[%s9375_s5 + $0x40] sm:$0xff]  }
 0x363   :  { %v4465_v20 = vrot.slane %v9716_v59, 4  ;;  %v4467_v61 = vrot.slane %v8603_v23, 3  ;;  %v4456_v19 = vsel %vm3121_vm10, %v4455_v43, %v4454_v10  ;;  %v4340_v12 = vpack.c.bf16 %v2859_v17, %v2859_v17 }
 0x364   :  { %v4341_v37 = vpack.c.bf16 %v2871_v2, %v2871_v2  ;;  %v4462_v40 = vsel %vm3109_vm6, %v4461_v51, %v4460_v22  ;;  %v4444_v28 = vsel %vm3124_vm11, %v4443_v27, %v4442_v54  ;;  %v4458_v25 = vsel %vm3124_vm11, %v4457_v35, %v4456_v19  ;;  %v6742_v27 = vld [vmem:[%s9375_s5 + $0x68] sm:$0xff]  }
 0x365   :  { %v4464_v13 = vsel %vm3112_vm7, %v4463_v46, %v4462_v40  ;;  %v4473_v9 = vrot.slane %v8288_v33, 7  ;;  %4608 = vmatmul.mubr.bf16.vlgmr.msra.gmra.mrb[48].mxu1 %v4487_v24  ;;  %v4489_v36 = vpack.c.b16 %v4458_v25, %v4444_v28  ;;  %v4373_v23 = vunpack.c.l.b16 %v4340_v12 }
 0x366   :  { %v4466_v59 = vsel %vm3115_vm8, %v4465_v20, %v4464_v13  ;;  %4617 = vmatprep.mubr.bf16.mxu1 %v9635_v50  ;;  %v9801_v5 = vunpack.c.l.b16 %v8823_v15  ;;  %v4475_v21 = vrot.slane %v8300_v49, 6  ;;  %v4477_v33 = vrot.slane %v8302_v7, 5 }
 0x367   :  { %v4474_v30 = vsel %vm3106_vm5, %v4473_v9, %v8286_v41  ;;  %v4374_v16 = vunpack.c.l.b16 %v4341_v37  ;;  %v4468_v38 = vsel %vm3118_vm9, %v4467_v61, %v4466_v59  ;;  %v4479_v24 = vrot.slane %v9718_v56, 4 }
 0x368   :  { %v4469_v32 = vrot.slane %v9801_v5, 2  ;;  %v4476_v60 = vsel %vm3109_vm6, %v4475_v21, %v4474_v30  ;;  %v4471_v57 = vrot.slane %v4373_v23, 1  ;;  %v4481_v15 = vrot.slane %v8608_v8, 3 }
 0x369   :  { %v4478_v26 = vsel %vm3112_vm7, %v4477_v33, %v4476_v60  ;;  %v9802_v49 = vunpack.c.l.b16 %v8825_v47  ;;  %v4485_v45 = vrot.slane %v4374_v16, 1  ;;  %v6814_v47 = vmov 0.0  }
 0x36a   :  { %v4470_v39 = vsel %vm3121_vm10, %v4469_v32, %v4468_v38  ;;  %v4480_v41 = vsel %vm3115_vm8, %v4479_v24, %v4478_v26  ;;  %6224 = vmatprep.subr.bf16.mxu1 %v6814_v47  ;;  %v4982_v11 = vcombine.high %v6088_v42, %v6088_v42  ;;  %v9071_v53 = vrot.slane %v6088_v42, %v9803_v55 }
 0x36b   :  { %v4483_v4 = vrot.slane %v9802_v49, 2  ;;  %v4482_v7 = vsel %vm3118_vm9, %v4481_v15, %v4480_v41  ;;  %v4472_v56 = vsel %vm3124_vm11, %v4471_v57, %v4470_v39  ;;  %6225 = vmatpush3.bf16.msra.mxu1 %v6737_v14 }
 0x36c   :  { %6226 = vmatprep.subr.bf16.mxu1 %v6814_v47  ;;  %v9074_v0 = vrot.slane %v4982_v11, %v9803_v55  ;;  %v9078_v63 = vcombine.high %v9071_v53, %v9071_v53  ;;  %v9087_v22 = vrot.slane %v9071_v53, 1 }
 0x36d   :  { %v4484_v54 = vsel %vm3121_vm10, %v4483_v4, %v4482_v7  ;;  %4618 = vmatmul.mubr.bf16.gmra.mrb[52].mxu1 %v4488_v52  ;;  %v6741_v52 = vld [vmem:[%s9375_s5 + $0x60] sm:$0xff]  }
 0x36e   :  { %v4486_v8 = vsel %vm3124_vm11, %v4485_v45, %v4484_v54  ;;  %4627 = vmatprep.mubr.bf16.mxu1 %v9635_v50  ;;  %v9083_v62 = vcombine.high %v9074_v0, %v9074_v0  ;;  %v9090_v20 = vrot.slane %v9078_v63, 1  ;;  %v9094_v19 = vrot.slane %v9074_v0, 1 }
 0x36f   :  { %v4490_v6 = vpack.c.b16 %v4486_v8, %v4472_v56  ;;  %6227 = vmatpush3.bf16.msra.mxu1 %v6738_v58 }
 0x370   :  { %6228 = vmatprep.subr.bf16.mxu1 %v6814_v47  ;;  %v9098_v23 = vrot.slane %v9083_v62, 1 }
 0x375   :  { %4628 = vmatmul.mubr.bf16.gmra.mrb[56].mxu1 %v4489_v36 }
 0x376   :  { %4637 = vmatprep.mubr.bf16.mxu1 %v9635_v50  ;;  %v6739_v50 = vld [vmem:[%s9375_s5 + $0x50] sm:$0xff]  }
 0x377   :  { %6229 = vmatpush3.bf16.msra.mxu1 %v6739_v50 }
 0x378   :  { %6230 = vmatprep.subr.bf16.mxu1 %v6814_v47 }
 0x37b   :  { %6231 = vmatpush3.bf16.msra.mxu1 %v6740_v29 }
 0x37c   :  { %6232 = vmatprep.subr.bf16.mxu1 %v6814_v47 }
 0x37d   :  { %4638 = vmatmul.mubr.bf16.gmra.mrb[60].mxu1 %v4490_v6 }
 0x37e   :  { %6240 = vmatprep.mubr.msk.bf16.mxu1 %vm6815_vm12, %v6814_v47 }
 0x37f   :  { %6233 = vmatpush3.bf16.msra.mxu1 %v6741_v52 }
 0x380   :  { %6234 = vmatprep.subr.bf16.mxu1 %v6814_v47 }
 0x383   :  { %6235 = vmatpush3.bf16.msra.mxu1 %v6742_v27 }
 0x384   :  { %6236 = vmatprep.subr.bf16.mxu1 %v6814_v47 }
 0x387   :  { %6237 = vmatpush3.bf16.msra.mxu1 %v6743_v44 }
 0x388   :  { %6238 = vmatprep.subr.bf16.mxu1 %v6814_v47 }
 0x38b   :  { %6239 = vmatpush3.bf16.msra.mxu1 %v6744_v1 }
 0x38c   :  { %6244 = vmatprep.subr.bf16.mxu1 %v6814_v47 }
 0x438   :  { %v4609_v31 = vpop.f32.mrb[48].mxu1 }
 0x439   :  { %v4611_v43 = vpop.f32.mrb[49].mxu1 }
 0x43a   :  { %v4664_v48 = vmax.f32 %v4609_v31, %v4611_v43  ;;  %v4613_v3 = vpop.f32.mrb[50].mxu1 }
 0x43b   :  { %v4615_v34 = vpop.f32.mrb[51].mxu1 }
 0x43c   :  { %v4680_v35 = vcombine.high %v4664_v48, %v4664_v48  ;;  %v4687_v18 = vrot.slane %v4664_v48, %v9803_v55  ;;  %v4665_v51 = vmax.f32 %v4613_v3, %v4615_v34 }
 0x43e   :  { %v4694_v17 = vrot.slane %v4680_v35, %v9803_v55  ;;  %v4695_v2 = vcombine.high %v4687_v18, %v4687_v18  ;;  %v6056_v46 = vrot.slane %v4687_v18, 9  ;;  %v4697_v10 = vcombine.high %v4665_v51, %v4665_v51 }
 0x43f   :  { %v4704_v61 = vrot.slane %v4665_v51, %v9803_v55 }
 0x440   :  { %v4696_v12 = vcombine.high %v4694_v17, %v4694_v17  ;;  %v6057_v37 = vrot.slane %v4695_v2, 9  ;;  %v6058_v40 = vrot.slane %v4694_v17, 9  ;;  %v4944_v28 = vmax.f32 %v4687_v18, %v6056_v46  ;;  %v4619_v25 = vpop.f32.mrb[52].mxu1 }
 0x441   :  { %v4711_v13 = vrot.slane %v4697_v10, %v9803_v55  ;;  %v4712_v9 = vcombine.high %v4704_v61, %v4704_v61  ;;  %v6060_v36 = vrot.slane %v4704_v61, 9  ;;  %v4621_v59 = vpop.f32.mrb[53].mxu1 }
 0x442   :  { %v6059_v5 = vrot.slane %v4696_v12, 9  ;;  %v4945_v32 = vmax.f32 %v4695_v2, %v6057_v37  ;;  %v4946_v30 = vmax.f32 %v4694_v17, %v6058_v40  ;;  %v5011_v21 = vadd.f32 %v9071_v53, %v4944_v28  ;;  %v4623_v33 = vpop.f32.mrb[54].mxu1 }
 0x443   :  { %v4713_v16 = vcombine.high %v4711_v13, %v4711_v13  ;;  %v6061_v38 = vrot.slane %v4712_v9, 9  ;;  %v6062_v60 = vrot.slane %v4711_v13, 9  ;;  %v4948_v24 = vmax.f32 %v4704_v61, %v6060_v36  ;;  %v4625_v57 = vpop.f32.mrb[55].mxu1 }
 0x444   :  { %v4947_v26 = vmax.f32 %v4696_v12, %v6059_v5  ;;  %v5012_v15 = vadd.f32 %v9087_v22, %v4945_v32  ;;  %v5013_v39 = vadd.f32 %v9078_v63, %v4946_v30  ;;  %v5043_v41 = vmax.f32 %v5011_v21, 0.0 }
 0x445   :  { %v6063_v49 = vrot.slane %v4713_v16, 9  ;;  %v4949_v4 = vmax.f32 %v4712_v9, %v6061_v38  ;;  %v4950_v7 = vmax.f32 %v4711_v13, %v6062_v60  ;;  %v5015_v45 = vadd.f32 %v9074_v0, %v4948_v24 }
 0x446   :  { %v5014_v54 = vadd.f32 %v9090_v20, %v4947_v26  ;;  %v5044_v56 = vmax.f32 %v5012_v15, 0.0  ;;  %v5045_v8 = vmax.f32 %v5013_v39, 0.0  ;;  %v5075_v6 = vpack.c.bf16 %v5043_v41, %v5043_v41 }
 0x447   :  { %v4951_v14 = vmax.f32 %v4713_v16, %v6063_v49  ;;  %v5016_v58 = vadd.f32 %v9094_v19, %v4949_v4  ;;  %v5017_v50 = vadd.f32 %v9083_v62, %v4950_v7  ;;  %v5047_v29 = vmax.f32 %v5015_v45, 0.0 }
 0x448   :  { %v5046_v52 = vmax.f32 %v5014_v54, 0.0  ;;  %v5099_v27 = vpack.c.bf16 %v5044_v56, %v5044_v56  ;;  %v5252_v44 = vunpack.c.l.b16 %v5075_v6  ;;  %v5364_v1 = vpack.c.bf16 %v5045_v8, %v5045_v8  ;;  %v9107_v42 = vpop.f32.mrb[56].mxu1 }
 0x449   :  { %v5018_v11 = vadd.f32 %v9098_v23, %v4951_v14  ;;  %v5048_v31 = vmax.f32 %v5016_v58, 0.0  ;;  %v5049_v43 = vmax.f32 %v5017_v50, 0.0  ;;  %v5076_v48 = vpack.c.bf16 %v5047_v29, %v5047_v29  ;;  %v9110_v3 = vpop.f32.mrb[57].mxu1 }
 0x44a   :  { %v5132_v34 = vunpack.c.l.b16 %v5099_v27  ;;  %v5397_v35 = vunpack.c.l.b16 %v5364_v1  ;;  %v5510_v18 = vpack.c.bf16 %v5046_v52, %v5046_v52  ;;  %v4666_v51 = vmax.f32 %v4619_v25, %v4621_v59  ;;  %v9112_v17 = vpop.f32.mrb[58].mxu1 }
 0x44b   :  { %v5050_v2 = vmax.f32 %v5018_v11, 0.0  ;;  %v5100_v46 = vpack.c.bf16 %v5048_v31, %v5048_v31  ;;  %v5253_v10 = vunpack.c.l.b16 %v5076_v48  ;;  %v5365_v61 = vpack.c.bf16 %v5049_v43, %v5049_v43  ;;  %v9114_v12 = vpop.f32.mrb[59].mxu1 }
 0x44c   :  { %v5543_v37 = vunpack.c.l.b16 %v5510_v18  ;;  %v4714_v40 = vcombine.high %v4666_v51, %v4666_v51  ;;  %v4721_v28 = vrot.slane %v4666_v51, %v9803_v55  ;;  %v4667_v13 = vmax.f32 %v4623_v33, %v4625_v57 }
 0x44d   :  { %v5133_v9 = vunpack.c.l.b16 %v5100_v46  ;;  %v5260_v36 = vrot.slane %v5253_v10, 7  ;;  %v5398_v5 = vunpack.c.l.b16 %v5365_v61  ;;  %v5511_v32 = vpack.c.bf16 %v5050_v2, %v5050_v2 }
 0x44e   :  { %v4728_v30 = vrot.slane %v4714_v40, %v9803_v55  ;;  %v4729_v25 = vcombine.high %v4721_v28, %v4721_v28  ;;  %v6064_v59 = vrot.slane %v4721_v28, 9  ;;  %v4731_v21 = vcombine.high %v4667_v13, %v4667_v13 }
 0x44f   :  { %v5140_v16 = vrot.slane %v5133_v9, 7  ;;  %v5261_v38 = vsel %vm3106_vm5, %v5260_v36, %v5252_v44  ;;  %v5405_v60 = vrot.slane %v5398_v5, 7  ;;  %v5544_v24 = vunpack.c.l.b16 %v5511_v32 }
 0x450   :  { %v4730_v26 = vcombine.high %v4728_v30, %v4728_v30  ;;  %v6065_v15 = vrot.slane %v4729_v25, 9  ;;  %v6066_v39 = vrot.slane %v4728_v30, 9  ;;  %v4952_v41 = vmax.f32 %v4721_v28, %v6064_v59  ;;  %v9119_v49 = vpop.f32.mrb[60].mxu1 }
 0x451   :  { %v5141_v33 = vsel %vm3106_vm5, %v5140_v16, %v5132_v34  ;;  %v5406_v57 = vsel %vm3106_vm5, %v5405_v60, %v5397_v35  ;;  %v5551_v4 = vrot.slane %v5544_v24, 7  ;;  %v4738_v7 = vrot.slane %v4667_v13, %v9803_v55  ;;  %v4641_v45 = vpop.f32.mrb[61].mxu1 }
 0x452   :  { %v6067_v54 = vrot.slane %v4730_v26, 9  ;;  %v4953_v56 = vmax.f32 %v4729_v25, %v6065_v15  ;;  %v4954_v8 = vmax.f32 %v4728_v30, %v6066_v39  ;;  %v5019_v6 = vadd.f32 %v9071_v53, %v4952_v41  ;;  %v9125_v14 = vpop.f32.mrb[62].mxu1 }
 0x453   :  { %v9128_v58 = vsel %vm3106_vm5, %v5551_v4, %v5543_v37  ;;  %v4745_v50 = vrot.slane %v4731_v21, %v9803_v55  ;;  %v4746_v29 = vcombine.high %v4738_v7, %v4738_v7  ;;  %v6068_v52 = vrot.slane %v4738_v7, 9  ;;  %v9131_v27 = vpop.f32.mrb[63].mxu1 }
 0x454   :  { %v4955_v44 = vmax.f32 %v4730_v26, %v6067_v54  ;;  %v5020_v1 = vadd.f32 %v9087_v22, %v4953_v56  ;;  %v5021_v11 = vadd.f32 %v9078_v63, %v4954_v8  ;;  %v5051_v31 = vmax.f32 %v5019_v6, 0.0 }
 0x455   :  { %v4747_v43 = vcombine.high %v4745_v50, %v4745_v50  ;;  %v6069_v48 = vrot.slane %v4746_v29, 9  ;;  %v6070_v34 = vrot.slane %v4745_v50, 9  ;;  %v4956_v35 = vmax.f32 %v4738_v7, %v6068_v52 }
 0x456   :  { %v5022_v18 = vadd.f32 %v9090_v20, %v4955_v44  ;;  %v5052_v51 = vmax.f32 %v5020_v1, 0.0  ;;  %v5053_v2 = vmax.f32 %v5021_v11, 0.0  ;;  %v5077_v46 = vpack.c.bf16 %v5051_v31, %v5051_v31 }
 0x457   :  { %v6071_v10 = vrot.slane %v4747_v43, 9  ;;  %v4957_v61 = vmax.f32 %v4746_v29, %v6069_v48  ;;  %v4958_v37 = vmax.f32 %v4745_v50, %v6070_v34  ;;  %v5023_v40 = vadd.f32 %v9074_v0, %v4956_v35 }
 0x458   :  { %v5054_v28 = vmax.f32 %v5022_v18, 0.0  ;;  %v5101_v13 = vpack.c.bf16 %v5052_v51, %v5052_v51  ;;  %v5254_v9 = vunpack.c.l.b16 %v5077_v46  ;;  %v5366_v36 = vpack.c.bf16 %v5053_v2, %v5053_v2 }
 0x459   :  { %v4959_v5 = vmax.f32 %v4747_v43, %v6071_v10  ;;  %v5024_v32 = vadd.f32 %v9094_v19, %v4957_v61  ;;  %v5025_v30 = vadd.f32 %v9083_v62, %v4958_v37  ;;  %v5055_v25 = vmax.f32 %v5023_v40, 0.0 }
 0x45a   :  { %v5134_v59 = vunpack.c.l.b16 %v5101_v13  ;;  %v5262_v21 = vrot.slane %v5254_v9, 6  ;;  %v5399_v16 = vunpack.c.l.b16 %v5366_v36  ;;  %v5512_v60 = vpack.c.bf16 %v5054_v28, %v5054_v28 }
 0x45b   :  { %v5026_v24 = vadd.f32 %v9098_v23, %v4959_v5  ;;  %v5056_v26 = vmax.f32 %v5024_v32, 0.0  ;;  %v5057_v15 = vmax.f32 %v5025_v30, 0.0  ;;  %v5078_v39 = vpack.c.bf16 %v5055_v25, %v5055_v25 }
 0x45c   :  { %v5142_v41 = vrot.slane %v5134_v59, 6  ;;  %v5263_v4 = vsel %vm3109_vm6, %v5262_v21, %v5261_v38  ;;  %v5407_v7 = vrot.slane %v5399_v16, 6  ;;  %v5545_v54 = vunpack.c.l.b16 %v5512_v60 }
 0x45d   :  { %v5058_v56 = vmax.f32 %v5026_v24, 0.0  ;;  %v5102_v8 = vpack.c.bf16 %v5056_v26, %v5056_v26  ;;  %v5255_v6 = vunpack.c.l.b16 %v5078_v39  ;;  %v5367_v50 = vpack.c.bf16 %v5057_v15, %v5057_v15 }
 0x45e   :  { %v5143_v29 = vsel %vm3109_vm6, %v5142_v41, %v5141_v33  ;;  %v9143_v52 = vsel %vm3109_vm6, %v5407_v7, %v5406_v57  ;;  %v9145_v44 = vrot.slane %v5545_v54, 6  ;;  %v4668_v1 = vmax.f32 %v9107_v42, %v9110_v3 }
 0x45f   :  { %v5135_v11 = vunpack.c.l.b16 %v5102_v8  ;;  %v5264_v31 = vrot.slane %v5255_v6, 5  ;;  %v5400_v43 = vunpack.c.l.b16 %v5367_v50  ;;  %v5513_v38 = vpack.c.bf16 %v5058_v56, %v5058_v56 }
 0x460   :  { %v4748_v48 = vcombine.high %v4668_v1, %v4668_v1  ;;  %v4755_v34 = vrot.slane %v4668_v1, %v9803_v55  ;;  %v4669_v35 = vmax.f32 %v9112_v17, %v9114_v12  ;;  %v9153_v33 = vmax.f32 %v9119_v49, %v4641_v45 }
 0x461   :  { %v5144_v57 = vrot.slane %v5135_v11, 5  ;;  %v9156_v18 = vsel %vm3112_vm7, %v5264_v31, %v5263_v4  ;;  %v9158_v51 = vrot.slane %v5400_v43, 5  ;;  %v5546_v42 = vunpack.c.l.b16 %v5513_v38 }
 0x462   :  { %v4762_v3 = vrot.slane %v4748_v48, %v9803_v55  ;;  %v4763_v2 = vcombine.high %v4755_v34, %v4755_v34  ;;  %v6072_v46 = vrot.slane %v4755_v34, 9  ;;  %v4765_v10 = vcombine.high %v4669_v35, %v4669_v35 }
 0x463   :  { %v5145_v61 = vsel %vm3112_vm7, %v5144_v57, %v5143_v29  ;;  %v9162_v37 = vrot.slane %v5546_v42, 5  ;;  %v4772_v17 = vrot.slane %v4669_v35, %v9803_v55  ;;  %v4782_v12 = vcombine.high %v9153_v33, %v9153_v33 }
 0x464   :  { %v4764_v49 = vcombine.high %v4762_v3, %v4762_v3  ;;  %v6073_v45 = vrot.slane %v4763_v2, 9  ;;  %v6074_v40 = vrot.slane %v4762_v3, 9  ;;  %v4960_v28 = vmax.f32 %v4755_v34, %v6072_v46 }
 0x465   :  { %v4779_v13 = vrot.slane %v4765_v10, %v9803_v55  ;;  %v4780_v9 = vcombine.high %v4772_v17, %v4772_v17  ;;  %v6076_v36 = vrot.slane %v4772_v17, 9  ;;  %v4789_v5 = vrot.slane %v9153_v33, %v9803_v55 }
 0x466   :  { %v6075_v32 = vrot.slane %v4764_v49, 9  ;;  %v4961_v30 = vmax.f32 %v4763_v2, %v6073_v45  ;;  %v4962_v25 = vmax.f32 %v4762_v3, %v6074_v40  ;;  %v5027_v59 = vadd.f32 %v9071_v53, %v4960_v28 }
 0x467   :  { %v4781_v21 = vcombine.high %v4779_v13, %v4779_v13  ;;  %v6077_v16 = vrot.slane %v4780_v9, 9  ;;  %v6078_v60 = vrot.slane %v4779_v13, 9  ;;  %v4964_v24 = vmax.f32 %v4772_v17, %v6076_v36 }
 0x468   :  { %v4963_v26 = vmax.f32 %v4764_v49, %v6075_v32  ;;  %v5028_v15 = vadd.f32 %v9087_v22, %v4961_v30  ;;  %v5029_v39 = vadd.f32 %v9078_v63, %v4962_v25  ;;  %v5059_v41 = vmax.f32 %v5027_v59, 0.0 }
 0x469   :  { %v6079_v4 = vrot.slane %v4781_v21, 9  ;;  %v4965_v7 = vmax.f32 %v4780_v9, %v6077_v16  ;;  %v4966_v54 = vmax.f32 %v4779_v13, %v6078_v60  ;;  %v5031_v56 = vadd.f32 %v9074_v0, %v4964_v24 }
 0x46a   :  { %v5030_v8 = vadd.f32 %v9090_v20, %v4963_v26  ;;  %v5060_v6 = vmax.f32 %v5028_v15, 0.0  ;;  %v5061_v50 = vmax.f32 %v5029_v39, 0.0  ;;  %v5079_v29 = vpack.c.bf16 %v5059_v41, %v5059_v41 }
 0x46b   :  { %v4967_v1 = vmax.f32 %v4781_v21, %v6079_v4  ;;  %v5032_v11 = vadd.f32 %v9094_v19, %v4965_v7  ;;  %v5033_v31 = vadd.f32 %v9083_v62, %v4966_v54  ;;  %v5063_v43 = vmax.f32 %v5031_v56, 0.0 }
 0x46c   :  { %v5062_v38 = vmax.f32 %v5030_v8, 0.0  ;;  %v5103_v48 = vpack.c.bf16 %v5060_v6, %v5060_v6  ;;  %v5256_v34 = vunpack.c.l.b16 %v5079_v29  ;;  %v5368_v35 = vpack.c.bf16 %v5061_v50, %v5061_v50 }
 0x46d   :  { %v5034_v33 = vadd.f32 %v9098_v23, %v4967_v1  ;;  %v5064_v57 = vmax.f32 %v5032_v11, 0.0  ;;  %v5065_v42 = vmax.f32 %v5033_v31, 0.0  ;;  %v5080_v3 = vpack.c.bf16 %v5063_v43, %v5063_v43 }
 0x46e   :  { %v5136_v2 = vunpack.c.l.b16 %v5103_v48  ;;  %v5266_v46 = vrot.slane %v5256_v34, 4  ;;  %v5401_v10 = vunpack.c.l.b16 %v5368_v35  ;;  %v5514_v17 = vpack.c.bf16 %v5062_v38, %v5062_v38 }
 0x46f   :  { %v5066_v49 = vmax.f32 %v5034_v33, 0.0  ;;  %v5104_v45 = vpack.c.bf16 %v5064_v57, %v5064_v57  ;;  %v5257_v40 = vunpack.c.l.b16 %v5080_v3  ;;  %v5369_v28 = vpack.c.bf16 %v5065_v42, %v5065_v42 }
 0x470   :  { %v5146_v13 = vrot.slane %v5136_v2, 4  ;;  %v5411_v9 = vrot.slane %v5401_v10, 4  ;;  %v5547_v36 = vunpack.c.l.b16 %v5514_v17  ;;  %v4796_v32 = vrot.slane %v4782_v12, %v9803_v55 }
 0x471   :  { %v5137_v30 = vunpack.c.l.b16 %v5104_v45  ;;  %v5268_v25 = vrot.slane %v5257_v40, 3  ;;  %v5402_v59 = vunpack.c.l.b16 %v5369_v28  ;;  %v5515_v21 = vpack.c.bf16 %v5066_v49, %v5066_v49 }
 0x472   :  { %v5147_v16 = vsel %vm3115_vm8, %v5146_v13, %v5145_v61  ;;  %v9180_v60 = vrot.slane %v5547_v36, 4  ;;  %v4797_v24 = vcombine.high %v4789_v5, %v4789_v5  ;;  %v4798_v26 = vcombine.high %v4796_v32, %v4796_v32 }
 0x473   :  { %v5148_v15 = vrot.slane %v5137_v30, 3  ;;  %v5413_v39 = vrot.slane %v5402_v59, 3  ;;  %v5548_v41 = vunpack.c.l.b16 %v5515_v21  ;;  %v6080_v4 = vrot.slane %v4789_v5, 9 }
 0x474   :  { %v6081_v7 = vrot.slane %v4797_v24, 9  ;;  %v6082_v54 = vrot.slane %v4796_v32, 9  ;;  %v6083_v56 = vrot.slane %v4798_v26, 9  ;;  %v4671_v12 = vmax.f32 %v9125_v14, %v9131_v27 }
 0x475   :  { %v9184_v8 = vrot.slane %v5548_v41, 3  ;;  %v4968_v6 = vmax.f32 %v4789_v5, %v6080_v4  ;;  %v5149_v50 = vsel %vm3118_vm9, %v5148_v15, %v5147_v16  ;;  %v5267_v61 = vsel %vm3115_vm8, %v5266_v46, %v9156_v18 }
 0x476   :  { %v4969_v29 = vmax.f32 %v4797_v24, %v6081_v7  ;;  %v4970_v1 = vmax.f32 %v4796_v32, %v6082_v54  ;;  %v4971_v11 = vmax.f32 %v4798_v26, %v6083_v56  ;;  %v4799_v31 = vcombine.high %v4671_v12, %v4671_v12 }
 0x477   :  { %v5035_v43 = vadd.f32 %v9071_v53, %v4968_v6  ;;  %v4806_v38 = vrot.slane %v4671_v12, %v9803_v55  ;;  %v5269_v48 = vsel %vm3118_vm9, %v5268_v25, %v5267_v61  ;;  %v5410_v14 = vsel %vm3112_vm7, %v9158_v51, %v9143_v52 }
 0x478   :  { %v5036_v27 = vadd.f32 %v9087_v22, %v4969_v29  ;;  %v5037_v5 = vadd.f32 %v9078_v63, %v4970_v1  ;;  %v5038_v18 = vadd.f32 %v9090_v20, %v4971_v11  ;;  %v4813_v34 = vrot.slane %v4799_v31, %v9803_v55 }
 0x479   :  { %v5067_v35 = vmax.f32 %v5035_v43, 0.0  ;;  %v4814_v33 = vcombine.high %v4806_v38, %v4806_v38  ;;  %v6084_v57 = vrot.slane %v4806_v38, 9  ;;  %v5412_v53 = vsel %vm3115_vm8, %v5411_v9, %v5410_v14 }
 0x47a   :  { %v5068_v42 = vmax.f32 %v5036_v27, 0.0  ;;  %v5069_v3 = vmax.f32 %v5037_v5, 0.0  ;;  %v5070_v2 = vmax.f32 %v5038_v18, 0.0  ;;  %v4815_v46 = vcombine.high %v4813_v34, %v4813_v34 }
 0x47b   :  { %v5081_v10 = vpack.c.bf16 %v5067_v35, %v5067_v35  ;;  %v6085_v17 = vrot.slane %v4814_v33, 9  ;;  %v6086_v52 = vrot.slane %v4813_v34, 9  ;;  %v4972_v51 = vmax.f32 %v4806_v38, %v6084_v57  ;;  %v6747_v35 = vld [vmem:[%s9375_s5 + $0x10] sm:$0xff]   ;;  %v6749_v57 = vld [vmem:[%s9375_s5 + $0x20] sm:$0xff]  }
 0x47c   :  { %v5105_v22 = vpack.c.bf16 %v5068_v42, %v5068_v42  ;;  %v5370_v49 = vpack.c.bf16 %v5069_v3, %v5069_v3  ;;  %v5516_v63 = vpack.c.bf16 %v5070_v2, %v5070_v2  ;;  %v6087_v45 = vrot.slane %v4815_v46, 9  ;;  %v6751_v42 = vld [vmem:[%s9375_s5 + $0x30] sm:$0xff]   ;;  %v6752_v3 = vld [vmem:[%s9375_s5 + $0x38] sm:$0xff]   ;;  %v6753_v2 = vld [vmem:[%s9375_s5 + $0x80] sm:$0xff]  }
 0x47d   :  { %v5258_v20 = vunpack.c.l.b16 %v5081_v10  ;;  %v4973_v40 = vmax.f32 %v4814_v33, %v6085_v17  ;;  %v4974_v55 = vmax.f32 %v4813_v34, %v6086_v52  ;;  %v5039_v28 = vadd.f32 %v9074_v0, %v4972_v51  ;;  %v6748_v33 = vld [vmem:[%s9375_s5 + $0x18] sm:$0xff]   ;;  %v6754_v10 = vld [vmem:[%s9375_s5 + $0x88] sm:$0xff]   ;;  %v6755_v17 = vld [vmem:[%s9375_s5 + $0x90] sm:$0xff]  }
 0x47e   :  { %v5138_v13 = vunpack.c.l.b16 %v5105_v22  ;;  %v5403_v36 = vunpack.c.l.b16 %v5370_v49  ;;  %v5549_v9 = vunpack.c.l.b16 %v5516_v63  ;;  %v4975_v32 = vmax.f32 %v4815_v46, %v6087_v45  ;;  %v6756_v52 = vld [vmem:[%s9375_s5 + $0x98] sm:$0xff]   ;;  %v6757_v51 = vld [vmem:[%s9375_s5 + $0xa0] sm:$0xff]   ;;  %v6758_v22 = vld [vmem:[%s9375_s5 + $0xa8] sm:$0xff]  }
 0x47f   :  { %v5270_v30 = vrot.slane %v5258_v20, 2  ;;  %v5040_v25 = vadd.f32 %v9094_v19, %v4973_v40  ;;  %v5041_v59 = vadd.f32 %v9083_v62, %v4974_v55  ;;  %v5071_v21 = vmax.f32 %v5039_v28, 0.0  ;;  %v6759_v49 = vld [vmem:[%s9375_s5 + $0xb0] sm:$0xff]   ;;  %v6760_v63 = vld [vmem:[%s9375_s5 + $0xb8] sm:$0xff]   ;;  %v6761_v45 = vld [vmem:[%s9375_s5 + $0xc0] sm:$0xff]  }
 0x480   :  { %v5150_v16 = vrot.slane %v5138_v13, 2  ;;  %v5415_v24 = vrot.slane %v5403_v36, 2  ;;  %v5042_v26 = vadd.f32 %v9098_v23, %v4975_v32  ;;  %v5414_v15 = vsel %vm3118_vm9, %v5413_v39, %v5412_v53  ;;  %v6750_v53 = vld [vmem:[%s9375_s5 + $0x28] sm:$0xff]   ;;  %v6763_v55 = vld [vmem:[%s9375_s5 + $0xd0] sm:$0xff]   ;;  %v6764_v28 = vld [vmem:[%s9375_s5 + $0xd8] sm:$0xff]  }
 0x481   :  { %v5072_v41 = vmax.f32 %v5040_v25, 0.0  ;;  %v5073_v4 = vmax.f32 %v5041_v59, 0.0  ;;  %v5082_v7 = vpack.c.bf16 %v5071_v21, %v5071_v21  ;;  %v5271_v0 = vsel %vm3121_vm10, %v5270_v30, %v5269_v48  ;;  %v6762_v40 = vld [vmem:[%s9375_s5 + $0xc8] sm:$0xff]   ;;  %v6765_v13 = vld [vmem:[%s9375_s5 + $0xe0] sm:$0xff]   ;;  %v6768_v32 = vld [vmem:[%s9375_s5 + $0xf8] sm:$0xff]  }
 0x482   :  { %v5074_v54 = vmax.f32 %v5042_v26, 0.0  ;;  %v5151_v56 = vsel %vm3121_vm10, %v5150_v16, %v5149_v50  ;;  %v5416_v12 = vsel %vm3121_vm10, %v5415_v24, %v5414_v15  ;;  %v5554_v62 = vsel %vm3109_vm6, %v9145_v44, %v9128_v58  ;;  %v6766_v36 = vld [vmem:[%s9375_s5 + $0xe8] sm:$0xff]   ;;  %v6769_v25 = vld [vmem:[%s9377_s7] sm:$0xff]   ;;  %v6771_v21 = vld [vmem:[%s9377_s7 + $0x10] sm:$0xff]  }
 0x483   :  { %v5106_v19 = vpack.c.bf16 %v5072_v41, %v5072_v41  ;;  %v5259_v6 = vunpack.c.l.b16 %v5082_v7  ;;  %v5371_v61 = vpack.c.bf16 %v5073_v4, %v5073_v4  ;;  %v5556_v23 = vsel %vm3112_vm7, %v9162_v37, %v5554_v62  ;;  %v6770_v59 = vld [vmem:[%s9377_s7 + $0x8] sm:$0xff]   ;;  %v6772_v16 = vld [vmem:[%s9377_s7 + $0x18] sm:$0xff]   ;;  %v6773_v24 = vld [vmem:[%s9377_s7 + $0x20] sm:$0xff]  }
 0x484   :  { %v5517_v39 = vpack.c.bf16 %v5074_v54, %v5074_v54  ;;  %v5558_v29 = vsel %vm3115_vm8, %v9180_v60, %v5556_v23  ;;  %v5561_v1 = vrot.slane %v5549_v9, 2  ;;  %v6745_v60 = vld [vmem:[%s9375_s5] sm:$0xff]   ;;  %v6767_v9 = vld [vmem:[%s9375_s5 + $0xf0] sm:$0xff]   ;;  %v6774_v26 = vld [vmem:[%s9377_s7 + $0x28] sm:$0xff]  }
 0x485   :  { %v5139_v11 = vunpack.c.l.b16 %v5106_v19  ;;  %v5272_v31 = vrot.slane %v5259_v6, 1  ;;  %v5404_v50 = vunpack.c.l.b16 %v5371_v61  ;;  %v5560_v43 = vsel %vm3118_vm9, %v9184_v8, %v5558_v29  ;;  %v6746_v8 = vld [vmem:[%s9375_s5 + $0x8] sm:$0xff]   ;;  %v6775_v15 = vld [vmem:[%s9377_s7 + $0x30] sm:$0xff]   ;;  %v6776_v41 = vld [vmem:[%s9377_s7 + $0x38] sm:$0xff]  }
 0x486   :  { %v5550_v38 = vunpack.c.l.b16 %v5517_v39  ;;  %v5562_v58 = vsel %vm3121_vm10, %v5561_v1, %v5560_v43 }
 0x487   :  { %v5152_v44 = vrot.slane %v5139_v11, 1  ;;  %v5273_v48 = vsel %vm3124_vm11, %v5272_v31, %v5271_v0  ;;  %v5417_v14 = vrot.slane %v5404_v50, 1 }
 0x488   :  { %v5563_v27 = vrot.slane %v5550_v38, 1  ;;  %v5274_v46 = vpack.c.b16 %v5273_v48, %v5273_v48 }
 0x489   :  { %v5153_v37 = vsel %vm3124_vm11, %v5152_v44, %v5151_v56  ;;  %v5418_v5 = vsel %vm3124_vm11, %v5417_v14, %v5416_v12  ;;  %v6170_v14 = vld [vmem:[%s9378_s8] ss:$0 sm:$0xff] }
 0x48a   :  { %v5154_v18 = vpack.c.b16 %v5153_v37, %v5153_v37  ;;  %v9225_v34 = vsel %vm3124_vm11, %v5563_v27, %v5562_v58  ;;  %v5419_v20 = vpack.c.b16 %v5418_v5, %v5418_v5 }
 0x48b   :  { %v5565_v30 = vpack.c.b16 %v9225_v34, %v9225_v34 }
 0x48c   :  { %6241 = vmatmul.mubr.bf16.vlgmr.msra.gmra.mrb[64].mxu1 %v5154_v18 }
 0x48d   :  { %6245 = vmatpush3.bf16.msra.mxu1 %v6745_v60  ;;  %6260 = vmatprep.mubr.msk.bf16.mxu1 %vm6815_vm12, %v6814_v47 }
 0x48e   :  { %6246 = vmatprep.subr.bf16.mxu1 %v6814_v47 }
 0x491   :  { %6247 = vmatpush3.bf16.msra.mxu1 %v6746_v8 }
 0x492   :  { %6248 = vmatprep.subr.bf16.mxu1 %v6814_v47 }
 0x495   :  { %6249 = vmatpush3.bf16.msra.mxu1 %v6747_v35 }
 0x496   :  { %6250 = vmatprep.subr.bf16.mxu1 %v6814_v47 }
 0x499   :  { %6251 = vmatpush3.bf16.msra.mxu1 %v6748_v33 }
 0x49a   :  { %6252 = vmatprep.subr.bf16.mxu1 %v6814_v47 }
 0x49d   :  { %6253 = vmatpush3.bf16.msra.mxu1 %v6749_v57 }
 0x49e   :  { %6254 = vmatprep.subr.bf16.mxu1 %v6814_v47 }
 0x4a1   :  { %6255 = vmatpush3.bf16.msra.mxu1 %v6750_v53 }
 0x4a2   :  { %6256 = vmatprep.subr.bf16.mxu1 %v6814_v47 }
 0x4a5   :  { %6257 = vmatpush3.bf16.msra.mxu1 %v6751_v42 }
 0x4a6   :  { %6258 = vmatprep.subr.bf16.mxu1 %v6814_v47 }
 0x4a9   :  { %6259 = vmatpush3.bf16.msra.mxu1 %v6752_v3 }
 0x4aa   :  { %6264 = vmatprep.subr.bf16.mxu1 %v6814_v47 }
 0x4ac   :  { %6261 = vmatmul.mubr.bf16.vlgmr.msra.gmra.mrb[68].mxu1 %v5274_v46 }
 0x4ad   :  { %6265 = vmatpush3.bf16.msra.mxu1 %v6753_v2  ;;  %6280 = vmatprep.mubr.msk.bf16.mxu1 %vm6815_vm12, %v6814_v47 }
 0x4ae   :  { %6266 = vmatprep.subr.bf16.mxu1 %v6814_v47 }
 0x4b1   :  { %6267 = vmatpush3.bf16.msra.mxu1 %v6754_v10 }
 0x4b2   :  { %6268 = vmatprep.subr.bf16.mxu1 %v6814_v47 }
 0x4b5   :  { %6269 = vmatpush3.bf16.msra.mxu1 %v6755_v17 }
 0x4b6   :  { %6270 = vmatprep.subr.bf16.mxu1 %v6814_v47 }
 0x4b9   :  { %6271 = vmatpush3.bf16.msra.mxu1 %v6756_v52 }
 0x4ba   :  { %6272 = vmatprep.subr.bf16.mxu1 %v6814_v47 }
 0x4bd   :  { %6273 = vmatpush3.bf16.msra.mxu1 %v6757_v51 }
 0x4be   :  { %6274 = vmatprep.subr.bf16.mxu1 %v6814_v47 }
 0x4c1   :  { %6275 = vmatpush3.bf16.msra.mxu1 %v6758_v22 }
 0x4c2   :  { %6276 = vmatprep.subr.bf16.mxu1 %v6814_v47 }
 0x4c5   :  { %6277 = vmatpush3.bf16.msra.mxu1 %v6759_v49 }
 0x4c6   :  { %6278 = vmatprep.subr.bf16.mxu1 %v6814_v47 }
 0x4c9   :  { %6279 = vmatpush3.bf16.msra.mxu1 %v6760_v63 }
 0x4ca   :  { %6284 = vmatprep.subr.bf16.mxu1 %v6814_v47 }
 0x4cc   :  { %6281 = vmatmul.mubr.bf16.vlgmr.msra.gmra.mrb[72].mxu1 %v5419_v20 }
 0x4cd   :  { %6285 = vmatpush3.bf16.msra.mxu1 %v6761_v45  ;;  %6300 = vmatprep.mubr.msk.bf16.mxu1 %vm6815_vm12, %v6814_v47 }
 0x4ce   :  { %6286 = vmatprep.subr.bf16.mxu1 %v6814_v47 }
 0x4d1   :  { %6287 = vmatpush3.bf16.msra.mxu1 %v6762_v40 }
 0x4d2   :  { %6288 = vmatprep.subr.bf16.mxu1 %v6814_v47 }
 0x4d5   :  { %6289 = vmatpush3.bf16.msra.mxu1 %v6763_v55 }
 0x4d6   :  { %6290 = vmatprep.subr.bf16.mxu1 %v6814_v47 }
 0x4d9   :  { %6291 = vmatpush3.bf16.msra.mxu1 %v6764_v28 }
 0x4da   :  { %6292 = vmatprep.subr.bf16.mxu1 %v6814_v47 }
 0x4dd   :  { %6293 = vmatpush3.bf16.msra.mxu1 %v6765_v13 }
 0x4de   :  { %6294 = vmatprep.subr.bf16.mxu1 %v6814_v47 }
 0x4e1   :  { %6295 = vmatpush3.bf16.msra.mxu1 %v6766_v36 }
 0x4e2   :  { %6296 = vmatprep.subr.bf16.mxu1 %v6814_v47 }
 0x4e5   :  { %6297 = vmatpush3.bf16.msra.mxu1 %v6767_v9 }
 0x4e6   :  { %6298 = vmatprep.subr.bf16.mxu1 %v6814_v47 }
 0x4e9   :  { %6299 = vmatpush3.bf16.msra.mxu1 %v6768_v32 }
 0x4ea   :  { %6304 = vmatprep.subr.bf16.mxu1 %v6814_v47 }
 0x4ec   :  { %6301 = vmatmul.mubr.bf16.vlgmr.msra.gmra.mrb[76].mxu1 %v5565_v30 }
 0x4ed   :  { %6320 = vmatprep.mubr.msk.bf16.mxu1 %vm6815_vm12, %v6814_v47  ;;  %6305 = vmatpush3.bf16.msra.mxu1 %v6769_v25 }
 0x4ee   :  { %6306 = vmatprep.subr.bf16.mxu1 %v6814_v47 }
 0x4f1   :  { %6307 = vmatpush3.bf16.msra.mxu1 %v6770_v59 }
 0x4f2   :  { %6308 = vmatprep.subr.bf16.mxu1 %v6814_v47 }
 0x4f5   :  { %6309 = vmatpush3.bf16.msra.mxu1 %v6771_v21 }
 0x4f6   :  { %6310 = vmatprep.subr.bf16.mxu1 %v6814_v47 }
 0x4f9   :  { %6311 = vmatpush3.bf16.msra.mxu1 %v6772_v16 }
 0x4fa   :  { %6312 = vmatprep.subr.bf16.mxu1 %v6814_v47 }
 0x4fd   :  { %6313 = vmatpush3.bf16.msra.mxu1 %v6773_v24 }
 0x4fe   :  { %6314 = vmatprep.subr.bf16.mxu1 %v6814_v47 }
 0x501   :  { %6315 = vmatpush3.bf16.msra.mxu1 %v6774_v26 }
 0x502   :  { %6316 = vmatprep.subr.bf16.mxu1 %v6814_v47 }
 0x505   :  { %6317 = vmatpush3.bf16.msra.mxu1 %v6775_v15 }
 0x506   :  { %6318 = vmatprep.subr.bf16.mxu1 %v6814_v47  ;;  %v6169_v47 = vld [vmem:[%s9376_s6] ss:$0 sm:$0xff] }
 0x509   :  { %6319 = vmatpush3.bf16.msra.mxu1 %v6776_v41 }
 0x55f   :  { %v5238_v4 = vpop.f32.mrb[64].mxu1 }
 0x560   :  { %v6242_v7 = vpop.f32.mrb[65].mxu1 }
 0x561   :  { %v5241_v0 = vpop.f32.mrb[66].mxu1 }
 0x562   :  { %v6243_v54 = vpop.f32.mrb[67].mxu1 }
 0x57f   :  { %v5358_v56 = vpop.f32.mrb[68].mxu1 }
 0x580   :  { %v5359_v12 = vadd.f32 %v5358_v56, %v5238_v4  ;;  %v6262_v62 = vpop.f32.mrb[69].mxu1 }
 0x581   :  { %v5361_v19 = vpop.f32.mrb[70].mxu1 }
 0x582   :  { %v6263_v6 = vpop.f32.mrb[71].mxu1 }
 0x59f   :  { %v5503_v61 = vpop.f32.mrb[72].mxu1 }
 0x5a0   :  { %v5509_v23 = vadd.f32 %v5503_v61, %v5359_v12  ;;  %v6282_v39 = vpop.f32.mrb[73].mxu1 }
 0x5a1   :  { %v5506_v29 = vpop.f32.mrb[74].mxu1 }
 0x5a2   :  { %v6283_v1 = vpop.f32.mrb[75].mxu1 }
 0x5bf   :  { %v5649_v11 = vpop.f32.mrb[76].mxu1 }
 0x5c0   :  { %v5655_v31 = vadd.f32 %v5649_v11, %v5509_v23  ;;  %v6302_v50 = vpop.f32.mrb[77].mxu1 }
 0x5c1   :  { %v5652_v43 = vpop.f32.mrb[78].mxu1 }
 0x5c2   :  { %v5663_v38 = vadd.f32 %v6169_v47, %v5655_v31  ;;  %v6303_v58 = vpop.f32.mrb[79].mxu1 }
 0x5c4   :  { %v5664_v44 = vmax.f32 %v5663_v38, 0.0 }
 0x5c6   :  { %v5665_v48 = vpack.c.bf16 %v5664_v44, %v5664_v44 }
 0x5c8   :  { %6321 = vmatmul.mubr.bf16.vlgmr.msra.gmra.mrb[80].mxu1 %v5665_v48 }
 0x69b   :  { %v5771_v27 = vpop.f32.mrb[80].mxu1 }
 0x69c   :  { %v5772_v37 = vadd.f32 %v6170_v14, %v5771_v27  ;;  %v6322_v60 = vpop.f32.mrb[81].mxu1 }
 0x69d   :  { %v5774_v5 = vpop.f32.mrb[82].mxu1 }
 0x69e   :  { %5777 = vst [vmem:[%s9379_s9] sm:$0xff] %v5772_v37  ;;  %v6323_v18 = vpop.f32.mrb[83].mxu1 }
 0x69f   :  { %5782 = vsyncpa [#allocation3], 1 }

</bundles_post_ra>
